<compile_context>
chip_gen: v7x
topology: tpu7x:2x2x1
jax: 0.10.0
libtpu: 0.0.40
codegen_flags: <defaults>
</compile_context>

<pallas_src>
import jax
import jax.numpy as jnp
from jax.experimental import pallas as pl
from jax.experimental.pallas import tpu as pltpu


# --------------------------- Stage 1: psi + max-pool ---------------------------

def _make_psi_pool_kernel(n_total, tn):
    """psi conv stack (channels on sublanes, points on lanes) + running max-pool."""
    needs_mask = (n_total % tn) != 0

    def kernel(x_ref, w1_ref, b1_ref, w2_ref, b2_ref, w3_ref, b3_ref, out_ref):
        relu = lambda t: jnp.maximum(t, 0.0)
        f32 = jnp.float32
        n = pl.program_id(1)

        # Init the resident pooled accumulator (output block index is constant
        # over the N axis, so it stays in VMEM across n steps).
        @pl.when(n == 0)
        def _():
            out_ref[...] = jnp.zeros_like(out_ref)   # valid: ReLU outputs are >= 0

        x = x_ref[...]                                                    # (k, TN)
        h = relu(jnp.dot(w1_ref[...], x, preferred_element_type=f32) + b1_ref[...])   # (64,  TN)
        h = relu(jnp.dot(w2_ref[...], h, preferred_element_type=f32) + b2_ref[...])   # (128, TN)
        h = relu(jnp.dot(w3_ref[...], h, preferred_element_type=f32) + b3_ref[...])   # (1024,TN)

        if needs_mask:
            # Last tile may extend past N: zero the padded lanes before the max
            # (safe because all valid activations are >= 0 post-ReLU).
            valid = n_total - n * tn
            lane = jax.lax.broadcasted_iota(jnp.int32, h.shape, 1)
            h = jnp.where(lane < valid, h, 0.0)

        tile_max = jnp.max(h, axis=1, keepdims=True)                      # (1024, 1)
        out_ref[...] = jnp.maximum(out_ref[...], tile_max)

    return kernel


# ------------------------------- Stage 2: phi MLP -------------------------------

def _phi_kernel(p_ref, w4_ref, b4_ref, w5_ref, b5_ref, w6_ref, b6_ref, out_ref):
    relu = lambda t: jnp.maximum(t, 0.0)
    f32 = jnp.float32
    v = relu(jnp.dot(p_ref[...], w4_ref[...], preferred_element_type=f32) + b4_ref[...])  # (B, 512)
    v = relu(jnp.dot(v, w5_ref[...], preferred_element_type=f32) + b5_ref[...])           # (B, 256)
    out_ref[...] = relu(jnp.dot(v, w6_ref[...], preferred_element_type=f32) + b6_ref[...])  # (B, k*k)


# ------------------------------ Stage 3: mat @ x --------------------------------

def _matx_kernel(m_ref, x_ref, o_ref):
    # (k,k) @ (k,TN) -> single lane-dense full-block store.
    o_ref[...] = jnp.dot(m_ref[...], x_ref[...], preferred_element_type=jnp.float32)


# --------------------------------- wrapper ---------------------------------------

def tnet_forward(x, params, tn=None):
    """x: (B, k, N) float32 -> (B, k, N) float32 (same as Tnet.forward, eval BN)."""
    B, k, N = x.shape
    (w1, b1), (w2, b2), (w3, b3), (w4, b4), (w5, b5), (w6, b6) = params

    if tn is None:
        tn = N if N <= 512 else 512     # bigger tile => better pipelining; bounded VMEM
    assert tn == N or tn % 128 == 0, "tile must be lane-aligned or cover full N"
    n_tiles = pl.cdiv(N, tn)

    # ---- Stage 1: psi + global max pool -> pooled (B, 1024, 1) ----
    flops = 2 * B * N * (k * 64 + 64 * 128 + 128 * 1024)
    bytes_accessed = 4 * (B * k * N
                          + (64 * k + 64 + 128 * 64 + 128 + 1024 * 128 + 1024)
                          + B * 1024)
    pooled = pl.pallas_call(
        _make_psi_pool_kernel(N, tn),
        out_shape=jax.ShapeDtypeStruct((B, 1024, 1), jnp.float32),
        grid=(B, n_tiles),
        in_specs=[
            pl.BlockSpec((None, k, tn), lambda b, n: (b, 0, n)),          # x tile (lane-dense)
            pl.BlockSpec(w1.shape, lambda b, n: (0, 0)),
            pl.BlockSpec(b1.shape, lambda b, n: (0, 0)),
            pl.BlockSpec(w2.shape, lambda b, n: (0, 0)),
            pl.BlockSpec(b2.shape, lambda b, n: (0, 0)),
            pl.BlockSpec(w3.shape, lambda b, n: (0, 0)),
            pl.BlockSpec(b3.shape, lambda b, n: (0, 0)),
        ],
        out_specs=pl.BlockSpec((None, 1024, 1), lambda b, n: (b, 0, 0)),  # resident accumulator
        compiler_params=pltpu.CompilerParams(
            dimension_semantics=("parallel", "arbitrary")),
        cost_estimate=pl.CostEstimate(flops=flops, transcendentals=0,
                                      bytes_accessed=bytes_accessed),
    )(x, w1, b1, w2, b2, w3, b3)

    pooled = pooled.reshape(B, 1024)                                       # cheap squeeze

    # ---- Stage 2: phi MLP, batched over B (one kernel step) ----
    mats_flat = pl.pallas_call(
        _phi_kernel,
        out_shape=jax.ShapeDtypeStruct((B, k * k), jnp.float32),
        grid=(1,),
        in_specs=[pl.BlockSpec(a.shape, lambda i: (0, 0))
                  for a in (pooled, w4, b4, w5, b5, w6, b6)],
        out_specs=pl.BlockSpec((B, k * k), lambda i: (0, 0)),
    )(pooled, w4, b4, w5, b5, w6, b6)

    mats = mats_flat.reshape(B, k, k)

    # ---- Stage 3: out = mat @ x, tiled over N (both axes independent) ----
    out = pl.pallas_call(
        _matx_kernel,
        out_shape=jax.ShapeDtypeStruct((B, k, N), jnp.float32),
        grid=(B, n_tiles),
        in_specs=[
            pl.BlockSpec((None, k, k), lambda b, n: (b, 0, 0)),
            pl.BlockSpec((None, k, tn), lambda b, n: (b, 0, n)),
        ],
        out_specs=pl.BlockSpec((None, k, tn), lambda b, n: (b, 0, n)),
        compiler_params=pltpu.CompilerParams(
            dimension_semantics=("parallel", "parallel")),
    )(mats, x)

    return out


# ------------------------- parameter construction -------------------------

def init_params(key, k):
    """Deterministic synthetic params; Conv1d(kernel=1)+BatchNorm1d folded (eval mode)."""
    eps = 1e-5

    def conv_bn(key, cin, cout):
        kw, kb, kg, kbe, km, kv = jax.random.split(key, 6)
        W = 0.1 * jax.random.normal(kw, (cout, cin), jnp.float32)          # Conv1d weight (cout,cin,1)
        b = 0.1 * jax.random.normal(kb, (cout,), jnp.float32)
        gamma = 1.0 + 0.1 * jax.random.normal(kg, (cout,), jnp.float32)
        beta = 0.1 * jax.random.normal(kbe, (cout,), jnp.float32)
        mean = 0.1 * jax.random.normal(km, (cout,), jnp.float32)
        var = 0.5 + 0.1 * jnp.abs(jax.random.normal(kv, (cout,), jnp.float32))
        s = gamma / jnp.sqrt(var + eps)                                    # eval-mode BN fold
        Wf = W * s[:, None]                                                # (cout, cin): W @ x_tile
        bf = ((b - mean) * s + beta).reshape(cout, 1)                      # broadcasts over lanes
        return Wf, bf

    def linear(key, cin, cout):
        kw, kb = jax.random.split(key)
        W = 0.1 * jax.random.normal(kw, (cout, cin), jnp.float32)          # torch Linear weight (out,in)
        b = 0.1 * jax.random.normal(kb, (cout,), jnp.float32)
        return W.T, b.reshape(1, cout)                                     # (in,out) for (B,in)@(in,out)

    keys = jax.random.split(key, 6)
    return (conv_bn(keys[0], k, 64),
            conv_bn(keys[1], 64, 128),
            conv_bn(keys[2], 128, 1024),
            linear(keys[3], 1024, 512),
            linear(keys[4], 512, 256),
            linear(keys[5], 256, k * k))


def tnet_reference(x, params):
    """Pure-JAX reference mirroring the PyTorch forward (for validation)."""
    (W1, b1), (W2, b2), (W3, b3), (w4, b4), (w5, b5), (w6, b6) = params
    B, k, N = x.shape
    relu = lambda t: jnp.maximum(t, 0.0)
    h = relu(jnp.einsum('oc,bcn->bon', W1, x) + b1)                        # (B, 64,  N)
    h = relu(jnp.einsum('oc,bcn->bon', W2, h) + b2)                        # (B, 128, N)
    h = relu(jnp.einsum('oc,bcn->bon', W3, h) + b3)                        # (B, 1024,N)
    v = jnp.max(h, axis=2)                                                 # (B, 1024)
    v = relu(v @ w4 + b4)
    v = relu(v @ w5 + b5)
    m = relu(v @ w6 + b6).reshape(B, k, k)
    return jnp.einsum('bij,bjn->bin', m, x)


if __name__ == "__main__":
    B, K, N = 2, 4, 320          # N=320 with tn=128 -> 3 tiles, masked partial tail
    key = jax.random.PRNGKey(0)
    kx, kp = jax.random.split(key)
    x = jax.random.normal(kx, (B, K, N), jnp.float32)
    params = init_params(kp, K)

    out = tnet_forward(x, params, tn=128)
    out = jax.block_until_ready(out)

    ref = tnet_reference(x, params)
    assert out.shape == (B, K, N)
    assert jnp.allclose(out, ref, rtol=1e-3, atol=1e-3), "mismatch vs reference"
    print("KERNEL_OK")
</pallas_src>

<mosaic_0001>
module attributes {stable_mosaic.version = 11 : i64} {
  func.func @kernel(%arg0: i32, %arg1: i32, %arg2: memref<1x4x128xf32, #tpu.memory_space<vmem>>, %arg3: memref<64x4xf32, #tpu.memory_space<vmem>>, %arg4: memref<64x1xf32, #tpu.memory_space<vmem>>, %arg5: memref<128x64xf32, #tpu.memory_space<vmem>>, %arg6: memref<128x1xf32, #tpu.memory_space<vmem>>, %arg7: memref<1024x128xf32, #tpu.memory_space<vmem>>, %arg8: memref<1024x1xf32, #tpu.memory_space<vmem>>, %arg9: memref<1x1024x1xf32, #tpu.memory_space<vmem>>) attributes {dimension_semantics = [#tpu.dimension_semantics<parallel>, #tpu.dimension_semantics<arbitrary>], iteration_bounds = array<i64: 2, 3>, scalar_prefetch = 0 : i64, scratch_operands = 0 : i64, tpu.core_type = #tpu.core_type<tc>, window_params = [{transform_indices = @transform_0, window_bounds = array<i64: 1, 4, 128>}, {pipeline_mode = #tpu.pipeline_mode<synchronous>, transform_indices = @transform_1, window_bounds = array<i64: 64, 4>}, {pipeline_mode = #tpu.pipeline_mode<synchronous>, transform_indices = @transform_2, window_bounds = array<i64: 64, 1>}, {pipeline_mode = #tpu.pipeline_mode<synchronous>, transform_indices = @transform_3, window_bounds = array<i64: 128, 64>}, {pipeline_mode = #tpu.pipeline_mode<synchronous>, transform_indices = @transform_4, window_bounds = array<i64: 128, 1>}, {pipeline_mode = #tpu.pipeline_mode<synchronous>, transform_indices = @transform_5, window_bounds = array<i64: 1024, 128>}, {pipeline_mode = #tpu.pipeline_mode<synchronous>, transform_indices = @transform_6, window_bounds = array<i64: 1024, 1>}, {transform_indices = @transform_7, window_bounds = array<i64: 1, 1024, 1>}]} {
    %c0_i32 = arith.constant 0 : i32
    %0 = arith.cmpi eq, %arg1, %c0_i32 : i32
    %1 = arith.extui %0 : i1 to i32
    %c0_i32_0 = arith.constant 0 : i32
    %2 = arith.cmpi ne, %1, %c0_i32_0 : i32
    scf.if %2 {
      %cst_28 = arith.constant 0.000000e+00 : f32
      %41 = vector.broadcast %cst_28 : f32 to vector<1024x1xf32>
      %c0_29 = arith.constant 0 : index
      %c0_30 = arith.constant 0 : index
      %c0_31 = arith.constant 0 : index
      %42 = vector.load %arg9[%c0_29, %c0_30, %c0_31] : memref<1x1024x1xf32, #tpu.memory_space<vmem>>, vector<1x1024x1xf32>
      %43 = vector.shape_cast %42 : vector<1x1024x1xf32> to vector<1024x1xf32>
      %44 = vector.shape_cast %41 : vector<1024x1xf32> to vector<1x1024x1xf32>
      tpu.vector_store %arg9[%c0_29, %c0_30, %c0_31], %44 {strides = array<i32>} : memref<1x1024x1xf32, #tpu.memory_space<vmem>>, vector<1x1024x1xf32>,
    } else {
    }
    %c0 = arith.constant 0 : index
    %c0_1 = arith.constant 0 : index
    %c0_2 = arith.constant 0 : index
    %3 = vector.load %arg2[%c0, %c0_1, %c0_2] : memref<1x4x128xf32, #tpu.memory_space<vmem>>, vector<1x4x128xf32>
    %4 = vector.shape_cast %3 : vector<1x4x128xf32> to vector<4x128xf32>
    %c0_3 = arith.constant 0 : index
    %c0_4 = arith.constant 0 : index
    %5 = vector.load %arg3[%c0_3, %c0_4] : memref<64x4xf32, #tpu.memory_space<vmem>>, vector<64x4xf32>
    %cst = arith.constant dense<0.000000e+00> : vector<64x128xf32>
    %6 = tpu.matmul %5, %4, %cst {dimension_numbers = #tpu.dot_dimension_numbers<[1], [0], [0], [1], [0, 0, 1, 1], [], []>} : vector<64x4xf32>, vector<4x128xf32>, vector<64x128xf32> -> vector<64x128xf32>
    %c0_5 = arith.constant 0 : index
    %c0_6 = arith.constant 0 : index
    %7 = vector.load %arg4[%c0_5, %c0_6] : memref<64x1xf32, #tpu.memory_space<vmem>>, vector<64x1xf32>
    %8 = vector.broadcast %7 : vector<64x1xf32> to vector<64x128xf32>
    %9 = arith.addf %6, %8 : vector<64x128xf32>
    %cst_7 = arith.constant 0.000000e+00 : f32
    %10 = vector.broadcast %cst_7 : f32 to vector<64x128xf32>
    %11 = arith.maximumf %9, %10 : vector<64x128xf32>
    %c0_8 = arith.constant 0 : index
    %c0_9 = arith.constant 0 : index
    %12 = vector.load %arg5[%c0_8, %c0_9] : memref<128x64xf32, #tpu.memory_space<vmem>>, vector<128x64xf32>
    %cst_10 = arith.constant dense<0.000000e+00> : vector<128x128xf32>
    %13 = tpu.matmul %12, %11, %cst_10 {dimension_numbers = #tpu.dot_dimension_numbers<[1], [0], [0], [1], [0, 0, 1, 1], [], []>} : vector<128x64xf32>, vector<64x128xf32>, vector<128x128xf32> -> vector<128x128xf32>
    %c0_11 = arith.constant 0 : index
    %c0_12 = arith.constant 0 : index
    %14 = vector.load %arg6[%c0_11, %c0_12] : memref<128x1xf32, #tpu.memory_space<vmem>>, vector<128x1xf32>
    %15 = vector.broadcast %14 : vector<128x1xf32> to vector<128x128xf32>
    %16 = arith.addf %13, %15 : vector<128x128xf32>
    %cst_13 = arith.constant 0.000000e+00 : f32
    %17 = vector.broadcast %cst_13 : f32 to vector<128x128xf32>
    %18 = arith.maximumf %16, %17 : vector<128x128xf32>
    %c0_14 = arith.constant 0 : index
    %c0_15 = arith.constant 0 : index
    %19 = vector.load %arg7[%c0_14, %c0_15] : memref<1024x128xf32, #tpu.memory_space<vmem>>, vector<1024x128xf32>
    %cst_16 = arith.constant dense<0.000000e+00> : vector<1024x128xf32>
    %20 = tpu.matmul %19, %18, %cst_16 {dimension_numbers = #tpu.dot_dimension_numbers<[1], [0], [0], [1], [0, 0, 1, 1], [], []>} : vector<1024x128xf32>, vector<128x128xf32>, vector<1024x128xf32> -> vector<1024x128xf32>
    %c0_17 = arith.constant 0 : index
    %c0_18 = arith.constant 0 : index
    %21 = vector.load %arg8[%c0_17, %c0_18] : memref<1024x1xf32, #tpu.memory_space<vmem>>, vector<1024x1xf32>
    %22 = vector.broadcast %21 : vector<1024x1xf32> to vector<1024x128xf32>
    %23 = arith.addf %20, %22 : vector<1024x128xf32>
    %cst_19 = arith.constant 0.000000e+00 : f32
    %24 = vector.broadcast %cst_19 : f32 to vector<1024x128xf32>
    %25 = arith.maximumf %23, %24 : vector<1024x128xf32>
    %c128_i32 = arith.constant 128 : i32
    %26 = arith.muli %arg1, %c128_i32 : i32
    %c320_i32 = arith.constant 320 : i32
    %27 = arith.subi %c320_i32, %26 : i32
    %28 = tpu.iota {dimensions = array<i32: 1>} : vector<1024x128xi32>
    %29 = vector.broadcast %27 : i32 to vector<1024x128xi32>
    %30 = arith.cmpi slt, %28, %29 : vector<1024x128xi32>
    %cst_20 = arith.constant 0.000000e+00 : f32
    %31 = vector.broadcast %cst_20 : f32 to vector<1024x128xf32>
    %32 = arith.select %30, %25, %31 : vector<1024x128xi1>, vector<1024x128xf32>
    %cst_21 = arith.constant dense<0xFF800000> : vector<1024xf32>
    %33 = vector.multi_reduction <maximumf>, %32, %cst_21 [1] : vector<1024x128xf32> to vector<1024xf32>
    %34 = vector.shape_cast %33 : vector<1024xf32> to vector<1024x1xf32>
    %c0_22 = arith.constant 0 : index
    %c0_23 = arith.constant 0 : index
    %c0_24 = arith.constant 0 : index
    %35 = vector.load %arg9[%c0_22, %c0_23, %c0_24] : memref<1x1024x1xf32, #tpu.memory_space<vmem>>, vector<1x1024x1xf32>
    %36 = vector.shape_cast %35 : vector<1x1024x1xf32> to vector<1024x1xf32>
    %37 = arith.maximumf %36, %34 : vector<1024x1xf32>
    %c0_25 = arith.constant 0 : index
    %c0_26 = arith.constant 0 : index
    %c0_27 = arith.constant 0 : index
    %38 = vector.load %arg9[%c0_25, %c0_26, %c0_27] : memref<1x1024x1xf32, #tpu.memory_space<vmem>>, vector<1x1024x1xf32>
    %39 = vector.shape_cast %38 : vector<1x1024x1xf32> to vector<1024x1xf32>
    %40 = vector.shape_cast %37 : vector<1024x1xf32> to vector<1x1024x1xf32>
    tpu.vector_store %arg9[%c0_25, %c0_26, %c0_27], %40 {strides = array<i32>} : memref<1x1024x1xf32, #tpu.memory_space<vmem>>, vector<1x1024x1xf32>,
    return
  }
  func.func @transform_0(%arg0: i32, %arg1: i32) -> (i32, i32, i32) {
    %c0_i32 = arith.constant 0 : i32
    %c0_i32_0 = arith.constant 0 : i32
    return %arg0, %c0_i32, %arg1 : i32, i32, i32
  }
  func.func @transform_1(%arg0: i32, %arg1: i32) -> (i32, i32) {
    %c0_i32 = arith.constant 0 : i32
    %c0_i32_0 = arith.constant 0 : i32
    %c0_i32_1 = arith.constant 0 : i32
    return %c0_i32, %c0_i32_0 : i32, i32
  }
  func.func @transform_2(%arg0: i32, %arg1: i32) -> (i32, i32) {
    %c0_i32 = arith.constant 0 : i32
    %c0_i32_0 = arith.constant 0 : i32
    %c0_i32_1 = arith.constant 0 : i32
    return %c0_i32, %c0_i32_0 : i32, i32
  }
  func.func @transform_3(%arg0: i32, %arg1: i32) -> (i32, i32) {
    %c0_i32 = arith.constant 0 : i32
    %c0_i32_0 = arith.constant 0 : i32
    %c0_i32_1 = arith.constant 0 : i32
    return %c0_i32, %c0_i32_0 : i32, i32
  }
  func.func @transform_4(%arg0: i32, %arg1: i32) -> (i32, i32) {
    %c0_i32 = arith.constant 0 : i32
    %c0_i32_0 = arith.constant 0 : i32
    %c0_i32_1 = arith.constant 0 : i32
    return %c0_i32, %c0_i32_0 : i32, i32
  }
  func.func @transform_5(%arg0: i32, %arg1: i32) -> (i32, i32) {
    %c0_i32 = arith.constant 0 : i32
    %c0_i32_0 = arith.constant 0 : i32
    %c0_i32_1 = arith.constant 0 : i32
    return %c0_i32, %c0_i32_0 : i32, i32
  }
  func.func @transform_6(%arg0: i32, %arg1: i32) -> (i32, i32) {
    %c0_i32 = arith.constant 0 : i32
    %c0_i32_0 = arith.constant 0 : i32
    %c0_i32_1 = arith.constant 0 : i32
    return %c0_i32, %c0_i32_0 : i32, i32
  }
  func.func @transform_7(%arg0: i32, %arg1: i32) -> (i32, i32, i32) {
    %c0_i32 = arith.constant 0 : i32
    %c0_i32_0 = arith.constant 0 : i32
    %c0_i32_1 = arith.constant 0 : i32
    return %arg0, %c0_i32, %c0_i32_0 : i32, i32, i32
  }
}

</mosaic_0001>

<bundles_post_ra>
// kernel: tpu_custom_call.1
= control target key start
LH: loop header
LB: loop body
LE: loop exit
PB: predicated region body
PF: predicated region fallthrough
CT: control target
= control target key end

     0   :  { %s4216_s24 = smov 0   ;;  %s4218_s25 = smov 0   ;;  %s6995_s0 = inlined_call_operand.vmem [shape: f32[2,4,320], index: 0, kind: input, shape index: {}]   ;;  %s6996_s1 = inlined_call_operand.vmem [shape: f32[64,4], index: 1, kind: input, shape index: {}]   ;;  %s6997_s2 = inlined_call_operand.vmem [shape: f32[64,1], index: 2, kind: input, shape index: {}]   ;;  %s6998_s3 = inlined_call_operand.vmem [shape: f32[128,64], index: 3, kind: input, shape index: {}]   ;;  %s6999_s4 = inlined_call_operand.vmem [shape: f32[128,1], index: 4, kind: input, shape index: {}]   ;;  %s7000_s5 = inlined_call_operand.vmem [shape: f32[1024,128], index: 5, kind: input, shape index: {}]   ;;  %s7001_s6 = inlined_call_operand.vmem [shape: f32[1024,1], index: 6, kind: input, shape index: {}]   ;;  %s7002_s7 = inlined_call_operand.vmem [shape: f32[2,1024,1], index: 7, kind: output, shape index: {}]  }
   0x1   :  { %s4220_s26 = smov 0   ;;  %s4222_s27 = smov 0  }
   0x2   :  { %s4224_s28 = smov 0  }
   0x3 LB: > { %s26_s29 = sadd.s32 1, %s4164_s26  ;;  %s29_s30 = sadd.s32 1, %s4168_s27  ;;  %s4172_s28 = sphi %s4224_s28, %s17_s28   ;;  %s4168_s27 = sphi %s4222_s27, %s7174_s27   ;;  %s4164_s26 = sphi %s4220_s26, %s7173_s26   ;;  %s4160_s25 = sphi %s4218_s25, %s7172_s25   ;;  %s4156_s24 = sphi %s4216_s24, %s7171_s24  }
   0x4   : > { %p27_p0 = scmp.ge.s32.totalorder %s26_s29, 3  ;;  %p3536_p1 = scmp.ge.s32.totalorder %s4172_s28, 1 }
   0x5   : > { %p254_p2 = scmp.lt.s32.totalorder %s4172_s28, 7 }
   0x6   : > { %s7176_s29 = smov (%p27_p0, %s26_s29), 0  ;;  %s7178_s30 = smov (!%p27_p0, %s29_s30), %s4168_s27 }
   0x7   : > { %p255_p3 = pnand %p3536_p1, %p254_p2  ;;  %p31_p4 = scmp.ge.s32.totalorder %s7178_s30, 2 }
   0x9   : > { %s7180_s30 = smov (%p31_p4, %s7178_s30), 0  ;;  %258 = sbr.rel (%p255_p3) target bundleno = 1195 (0x4ab), region = 48 }
  0x10   : > { %p289_p5 = scmp.lt.s32.totalorder %s4160_s25, 1  ;;  %p291_p6 = scmp.lt.s32.totalorder %s4156_s24, 2 }
  0x11   : > { %p3540_p7 = scmp.ne.s32.totalorder %s4156_s24, 0 }
  0x12   : > { %s7182_s25 = smov (!%p289_p5, %s4160_s25), 1  ;;  %vm306_vm0 = vcmask (!%p3540_p7), 7168   ;;  %v4174_v0 = vmov (!%p3540_p7), 0.0  }
  0x13   : > { %s292_s8 = scalar_select %p291_p6, %s4156_s24, 2 }
  0x14   : > { %s4089_s9 = smul.u32 3, %s7182_s25  ;;  %s3569_s10 = sshll.u32 %s7182_s25, 10 }
  0x15   : > { %s4253_s13 = scalar_lea.vmem %s7002_s7, %s3569_s10  ;;  %305 = sbr.rel (%p3540_p7) target bundleno = 86 (0x56), region = 52 }
  0x16   : > { %s294_s14 = sadd.s32 %s4089_s9, %s292_s8  ;;  %307 = vst.msk [vmem:[%s4253_s13] sm:$0xff] (!%p3540_p7), %vm306_vm0, %v4174_v0  ;;  %308 = vst.msk [vmem:[%s4253_s13 + $0x8] sm:$0xff] (!%p3540_p7), %vm306_vm0, %v4174_v0 }
  0x17   : > { %s3537_s15 = sshll.u32 %s294_s14, 2  ;;  %309 = vst.msk [vmem:[%s4253_s13 + $0x10] sm:$0xff] (!%p3540_p7), %vm306_vm0, %v4174_v0  ;;  %310 = vst.msk [vmem:[%s4253_s13 + $0x18] sm:$0xff] (!%p3540_p7), %vm306_vm0, %v4174_v0 }
  0x18   : > { %s4258_s18 = scalar_lea.vmem %s6995_s0, %s3537_s15  ;;  %311 = vst.msk [vmem:[%s4253_s13 + $0x20] sm:$0xff] (!%p3540_p7), %vm306_vm0, %v4174_v0  ;;  %312 = vst.msk [vmem:[%s4253_s13 + $0x28] sm:$0xff] (!%p3540_p7), %vm306_vm0, %v4174_v0 }
  0x19   : > { %313 = vst.msk [vmem:[%s4253_s13 + $0x30] sm:$0xff] (!%p3540_p7), %vm306_vm0, %v4174_v0  ;;  %314 = vst.msk [vmem:[%s4253_s13 + $0x38] sm:$0xff] (!%p3540_p7), %vm306_vm0, %v4174_v0 }
  0x1a   : > { %315 = vst.msk [vmem:[%s4253_s13 + $0x40] sm:$0xff] (!%p3540_p7), %vm306_vm0, %v4174_v0  ;;  %316 = vst.msk [vmem:[%s4253_s13 + $0x48] sm:$0xff] (!%p3540_p7), %vm306_vm0, %v4174_v0 }
  0x1b   : > { %317 = vst.msk [vmem:[%s4253_s13 + $0x50] sm:$0xff] (!%p3540_p7), %vm306_vm0, %v4174_v0  ;;  %318 = vst.msk [vmem:[%s4253_s13 + $0x58] sm:$0xff] (!%p3540_p7), %vm306_vm0, %v4174_v0 }
  0x1c   : > { %319 = vst.msk [vmem:[%s4253_s13 + $0x60] sm:$0xff] %vm306_vm0, %v4174_v0  ;;  %320 = vst.msk [vmem:[%s4253_s13 + $0x68] sm:$0xff] %vm306_vm0, %v4174_v0 }
  0x1d   : > { %321 = vst.msk [vmem:[%s4253_s13 + $0x70] sm:$0xff] %vm306_vm0, %v4174_v0  ;;  %322 = vst.msk [vmem:[%s4253_s13 + $0x78] sm:$0xff] %vm306_vm0, %v4174_v0 }
  0x1e   : > { %323 = vst.msk [vmem:[%s4253_s13 + $0x80] sm:$0xff] %vm306_vm0, %v4174_v0  ;;  %324 = vst.msk [vmem:[%s4253_s13 + $0x88] sm:$0xff] %vm306_vm0, %v4174_v0 }
  0x1f   : > { %325 = vst.msk [vmem:[%s4253_s13 + $0x90] sm:$0xff] %vm306_vm0, %v4174_v0  ;;  %326 = vst.msk [vmem:[%s4253_s13 + $0x98] sm:$0xff] %vm306_vm0, %v4174_v0 }
  0x20   : > { %327 = vst.msk [vmem:[%s4253_s13 + $0xa0] sm:$0xff] %vm306_vm0, %v4174_v0  ;;  %328 = vst.msk [vmem:[%s4253_s13 + $0xa8] sm:$0xff] %vm306_vm0, %v4174_v0 }
  0x21   : > { %329 = vst.msk [vmem:[%s4253_s13 + $0xb0] sm:$0xff] %vm306_vm0, %v4174_v0  ;;  %330 = vst.msk [vmem:[%s4253_s13 + $0xb8] sm:$0xff] %vm306_vm0, %v4174_v0 }
  0x22   : > { %331 = vst.msk [vmem:[%s4253_s13 + $0xc0] sm:$0xff] %vm306_vm0, %v4174_v0  ;;  %332 = vst.msk [vmem:[%s4253_s13 + $0xc8] sm:$0xff] %vm306_vm0, %v4174_v0 }
  0x23   : > { %333 = vst.msk [vmem:[%s4253_s13 + $0xd0] sm:$0xff] %vm306_vm0, %v4174_v0  ;;  %334 = vst.msk [vmem:[%s4253_s13 + $0xd8] sm:$0xff] %vm306_vm0, %v4174_v0 }
  0x24   : > { %335 = vst.msk [vmem:[%s4253_s13 + $0xe0] sm:$0xff] %vm306_vm0, %v4174_v0  ;;  %336 = vst.msk [vmem:[%s4253_s13 + $0xe8] sm:$0xff] %vm306_vm0, %v4174_v0 }
  0x25   : > { %337 = vst.msk [vmem:[%s4253_s13 + $0xf0] sm:$0xff] %vm306_vm0, %v4174_v0  ;;  %338 = vst.msk [vmem:[%s4253_s13 + $0xf8] sm:$0xff] %vm306_vm0, %v4174_v0 }
  0x26   : > { %339 = vst.msk [vmem:[%s4253_s13 + $0x100] sm:$0xff] %vm306_vm0, %v4174_v0  ;;  %340 = vst.msk [vmem:[%s4253_s13 + $0x108] sm:$0xff] %vm306_vm0, %v4174_v0 }
  0x27   : > { %341 = vst.msk [vmem:[%s4253_s13 + $0x110] sm:$0xff] %vm306_vm0, %v4174_v0  ;;  %342 = vst.msk [vmem:[%s4253_s13 + $0x118] sm:$0xff] %vm306_vm0, %v4174_v0 }
  0x28   : > { %343 = vst.msk [vmem:[%s4253_s13 + $0x120] sm:$0xff] %vm306_vm0, %v4174_v0  ;;  %344 = vst.msk [vmem:[%s4253_s13 + $0x128] sm:$0xff] %vm306_vm0, %v4174_v0 }
  0x29   : > { %345 = vst.msk [vmem:[%s4253_s13 + $0x130] sm:$0xff] %vm306_vm0, %v4174_v0  ;;  %346 = vst.msk [vmem:[%s4253_s13 + $0x138] sm:$0xff] %vm306_vm0, %v4174_v0 }
  0x2a   : > { %347 = vst.msk [vmem:[%s4253_s13 + $0x140] sm:$0xff] %vm306_vm0, %v4174_v0  ;;  %348 = vst.msk [vmem:[%s4253_s13 + $0x148] sm:$0xff] %vm306_vm0, %v4174_v0 }
  0x2b   : > { %349 = vst.msk [vmem:[%s4253_s13 + $0x150] sm:$0xff] %vm306_vm0, %v4174_v0  ;;  %350 = vst.msk [vmem:[%s4253_s13 + $0x158] sm:$0xff] %vm306_vm0, %v4174_v0 }
  0x2c   : > { %351 = vst.msk [vmem:[%s4253_s13 + $0x160] sm:$0xff] %vm306_vm0, %v4174_v0  ;;  %352 = vst.msk [vmem:[%s4253_s13 + $0x168] sm:$0xff] %vm306_vm0, %v4174_v0 }
  0x2d   : > { %353 = vst.msk [vmem:[%s4253_s13 + $0x170] sm:$0xff] %vm306_vm0, %v4174_v0  ;;  %354 = vst.msk [vmem:[%s4253_s13 + $0x178] sm:$0xff] %vm306_vm0, %v4174_v0 }
  0x2e   : > { %355 = vst.msk [vmem:[%s4253_s13 + $0x180] sm:$0xff] %vm306_vm0, %v4174_v0  ;;  %356 = vst.msk [vmem:[%s4253_s13 + $0x188] sm:$0xff] %vm306_vm0, %v4174_v0 }
  0x2f   : > { %357 = vst.msk [vmem:[%s4253_s13 + $0x190] sm:$0xff] %vm306_vm0, %v4174_v0  ;;  %358 = vst.msk [vmem:[%s4253_s13 + $0x198] sm:$0xff] %vm306_vm0, %v4174_v0 }
  0x30   : > { %359 = vst.msk [vmem:[%s4253_s13 + $0x1a0] sm:$0xff] %vm306_vm0, %v4174_v0  ;;  %360 = vst.msk [vmem:[%s4253_s13 + $0x1a8] sm:$0xff] %vm306_vm0, %v4174_v0 }
  0x31   : > { %361 = vst.msk [vmem:[%s4253_s13 + $0x1b0] sm:$0xff] %vm306_vm0, %v4174_v0  ;;  %362 = vst.msk [vmem:[%s4253_s13 + $0x1b8] sm:$0xff] %vm306_vm0, %v4174_v0 }
  0x32   : > { %363 = vst.msk [vmem:[%s4253_s13 + $0x1c0] sm:$0xff] %vm306_vm0, %v4174_v0  ;;  %364 = vst.msk [vmem:[%s4253_s13 + $0x1c8] sm:$0xff] %vm306_vm0, %v4174_v0 }
  0x33   : > { %365 = vst.msk [vmem:[%s4253_s13 + $0x1d0] sm:$0xff] %vm306_vm0, %v4174_v0  ;;  %366 = vst.msk [vmem:[%s4253_s13 + $0x1d8] sm:$0xff] %vm306_vm0, %v4174_v0 }
  0x34   : > { %367 = vst.msk [vmem:[%s4253_s13 + $0x1e0] sm:$0xff] %vm306_vm0, %v4174_v0  ;;  %368 = vst.msk [vmem:[%s4253_s13 + $0x1e8] sm:$0xff] %vm306_vm0, %v4174_v0 }
  0x35   : > { %369 = vst.msk [vmem:[%s4253_s13 + $0x1f0] sm:$0xff] %vm306_vm0, %v4174_v0  ;;  %370 = vst.msk [vmem:[%s4253_s13 + $0x1f8] sm:$0xff] %vm306_vm0, %v4174_v0 }
  0x36   : > { %371 = vst.msk [vmem:[%s4253_s13 + $0x200] sm:$0xff] %vm306_vm0, %v4174_v0  ;;  %372 = vst.msk [vmem:[%s4253_s13 + $0x208] sm:$0xff] %vm306_vm0, %v4174_v0 }
  0x37   : > { %373 = vst.msk [vmem:[%s4253_s13 + $0x210] sm:$0xff] %vm306_vm0, %v4174_v0  ;;  %374 = vst.msk [vmem:[%s4253_s13 + $0x218] sm:$0xff] %vm306_vm0, %v4174_v0 }
  0x38   : > { %375 = vst.msk [vmem:[%s4253_s13 + $0x220] sm:$0xff] %vm306_vm0, %v4174_v0  ;;  %376 = vst.msk [vmem:[%s4253_s13 + $0x228] sm:$0xff] %vm306_vm0, %v4174_v0 }
  0x39   : > { %377 = vst.msk [vmem:[%s4253_s13 + $0x230] sm:$0xff] %vm306_vm0, %v4174_v0  ;;  %378 = vst.msk [vmem:[%s4253_s13 + $0x238] sm:$0xff] %vm306_vm0, %v4174_v0 }
  0x3a   : > { %379 = vst.msk [vmem:[%s4253_s13 + $0x240] sm:$0xff] %vm306_vm0, %v4174_v0  ;;  %380 = vst.msk [vmem:[%s4253_s13 + $0x248] sm:$0xff] %vm306_vm0, %v4174_v0 }
  0x3b   : > { %381 = vst.msk [vmem:[%s4253_s13 + $0x250] sm:$0xff] %vm306_vm0, %v4174_v0  ;;  %382 = vst.msk [vmem:[%s4253_s13 + $0x258] sm:$0xff] %vm306_vm0, %v4174_v0 }
  0x3c   : > { %383 = vst.msk [vmem:[%s4253_s13 + $0x260] sm:$0xff] %vm306_vm0, %v4174_v0  ;;  %384 = vst.msk [vmem:[%s4253_s13 + $0x268] sm:$0xff] %vm306_vm0, %v4174_v0 }
  0x3d   : > { %385 = vst.msk [vmem:[%s4253_s13 + $0x270] sm:$0xff] %vm306_vm0, %v4174_v0  ;;  %386 = vst.msk [vmem:[%s4253_s13 + $0x278] sm:$0xff] %vm306_vm0, %v4174_v0 }
  0x3e   : > { %387 = vst.msk [vmem:[%s4253_s13 + $0x280] sm:$0xff] %vm306_vm0, %v4174_v0  ;;  %388 = vst.msk [vmem:[%s4253_s13 + $0x288] sm:$0xff] %vm306_vm0, %v4174_v0 }
  0x3f   : > { %389 = vst.msk [vmem:[%s4253_s13 + $0x290] sm:$0xff] %vm306_vm0, %v4174_v0  ;;  %390 = vst.msk [vmem:[%s4253_s13 + $0x298] sm:$0xff] %vm306_vm0, %v4174_v0 }
  0x40   : > { %391 = vst.msk [vmem:[%s4253_s13 + $0x2a0] sm:$0xff] %vm306_vm0, %v4174_v0  ;;  %392 = vst.msk [vmem:[%s4253_s13 + $0x2a8] sm:$0xff] %vm306_vm0, %v4174_v0 }
  0x41   : > { %393 = vst.msk [vmem:[%s4253_s13 + $0x2b0] sm:$0xff] %vm306_vm0, %v4174_v0  ;;  %394 = vst.msk [vmem:[%s4253_s13 + $0x2b8] sm:$0xff] %vm306_vm0, %v4174_v0 }
  0x42   : > { %395 = vst.msk [vmem:[%s4253_s13 + $0x2c0] sm:$0xff] %vm306_vm0, %v4174_v0  ;;  %396 = vst.msk [vmem:[%s4253_s13 + $0x2c8] sm:$0xff] %vm306_vm0, %v4174_v0 }
  0x43   : > { %397 = vst.msk [vmem:[%s4253_s13 + $0x2d0] sm:$0xff] %vm306_vm0, %v4174_v0  ;;  %398 = vst.msk [vmem:[%s4253_s13 + $0x2d8] sm:$0xff] %vm306_vm0, %v4174_v0 }
  0x44   : > { %399 = vst.msk [vmem:[%s4253_s13 + $0x2e0] sm:$0xff] %vm306_vm0, %v4174_v0  ;;  %400 = vst.msk [vmem:[%s4253_s13 + $0x2e8] sm:$0xff] %vm306_vm0, %v4174_v0 }
  0x45   : > { %401 = vst.msk [vmem:[%s4253_s13 + $0x2f0] sm:$0xff] %vm306_vm0, %v4174_v0  ;;  %402 = vst.msk [vmem:[%s4253_s13 + $0x2f8] sm:$0xff] %vm306_vm0, %v4174_v0 }
  0x46   : > { %403 = vst.msk [vmem:[%s4253_s13 + $0x300] sm:$0xff] %vm306_vm0, %v4174_v0  ;;  %404 = vst.msk [vmem:[%s4253_s13 + $0x308] sm:$0xff] %vm306_vm0, %v4174_v0 }
  0x47   : > { %405 = vst.msk [vmem:[%s4253_s13 + $0x310] sm:$0xff] %vm306_vm0, %v4174_v0  ;;  %406 = vst.msk [vmem:[%s4253_s13 + $0x318] sm:$0xff] %vm306_vm0, %v4174_v0 }
  0x48   : > { %407 = vst.msk [vmem:[%s4253_s13 + $0x320] sm:$0xff] %vm306_vm0, %v4174_v0  ;;  %408 = vst.msk [vmem:[%s4253_s13 + $0x328] sm:$0xff] %vm306_vm0, %v4174_v0 }
  0x49   : > { %409 = vst.msk [vmem:[%s4253_s13 + $0x330] sm:$0xff] %vm306_vm0, %v4174_v0  ;;  %410 = vst.msk [vmem:[%s4253_s13 + $0x338] sm:$0xff] %vm306_vm0, %v4174_v0 }
  0x4a   : > { %411 = vst.msk [vmem:[%s4253_s13 + $0x340] sm:$0xff] %vm306_vm0, %v4174_v0  ;;  %412 = vst.msk [vmem:[%s4253_s13 + $0x348] sm:$0xff] %vm306_vm0, %v4174_v0 }
  0x4b   : > { %413 = vst.msk [vmem:[%s4253_s13 + $0x350] sm:$0xff] %vm306_vm0, %v4174_v0  ;;  %414 = vst.msk [vmem:[%s4253_s13 + $0x358] sm:$0xff] %vm306_vm0, %v4174_v0 }
  0x4c   : > { %415 = vst.msk [vmem:[%s4253_s13 + $0x360] sm:$0xff] %vm306_vm0, %v4174_v0  ;;  %416 = vst.msk [vmem:[%s4253_s13 + $0x368] sm:$0xff] %vm306_vm0, %v4174_v0 }
  0x4d   : > { %417 = vst.msk [vmem:[%s4253_s13 + $0x370] sm:$0xff] %vm306_vm0, %v4174_v0  ;;  %418 = vst.msk [vmem:[%s4253_s13 + $0x378] sm:$0xff] %vm306_vm0, %v4174_v0 }
  0x4e   : > { %419 = vst.msk [vmem:[%s4253_s13 + $0x380] sm:$0xff] %vm306_vm0, %v4174_v0  ;;  %420 = vst.msk [vmem:[%s4253_s13 + $0x388] sm:$0xff] %vm306_vm0, %v4174_v0 }
  0x4f   : > { %421 = vst.msk [vmem:[%s4253_s13 + $0x390] sm:$0xff] %vm306_vm0, %v4174_v0  ;;  %422 = vst.msk [vmem:[%s4253_s13 + $0x398] sm:$0xff] %vm306_vm0, %v4174_v0 }
  0x50   : > { %423 = vst.msk [vmem:[%s4253_s13 + $0x3a0] sm:$0xff] %vm306_vm0, %v4174_v0  ;;  %424 = vst.msk [vmem:[%s4253_s13 + $0x3a8] sm:$0xff] %vm306_vm0, %v4174_v0 }
  0x51   : > { %425 = vst.msk [vmem:[%s4253_s13 + $0x3b0] sm:$0xff] %vm306_vm0, %v4174_v0  ;;  %426 = vst.msk [vmem:[%s4253_s13 + $0x3b8] sm:$0xff] %vm306_vm0, %v4174_v0 }
  0x52   : > { %427 = vst.msk [vmem:[%s4253_s13 + $0x3c0] sm:$0xff] %vm306_vm0, %v4174_v0  ;;  %428 = vst.msk [vmem:[%s4253_s13 + $0x3c8] sm:$0xff] %vm306_vm0, %v4174_v0 }
  0x53   : > { %429 = vst.msk [vmem:[%s4253_s13 + $0x3d0] sm:$0xff] %vm306_vm0, %v4174_v0  ;;  %430 = vst.msk [vmem:[%s4253_s13 + $0x3d8] sm:$0xff] %vm306_vm0, %v4174_v0 }
  0x54   : > { %431 = vst.msk [vmem:[%s4253_s13 + $0x3e0] sm:$0xff] %vm306_vm0, %v4174_v0  ;;  %432 = vst.msk [vmem:[%s4253_s13 + $0x3e8] sm:$0xff] %vm306_vm0, %v4174_v0 }
  0x55   : > { %433 = vst.msk [vmem:[%s4253_s13 + $0x3f0] sm:$0xff] %vm306_vm0, %v4174_v0  ;;  %434 = vst.msk [vmem:[%s4253_s13 + $0x3f8] sm:$0xff] %vm306_vm0, %v4174_v0 }
  0x56 PF: > { %v435_v1 = vld [vmem:[%s4258_s18] sm:$0xf]  ;;  %vm517_vm1 = vcmask 1043456   ;;  %v446_v2 = vld [vmem:[%s6997_s2 + $0x10] sm:$0xff]  ;;  %v4175_v4 = vmov 0   ;;  %vm492_vm2 = vcmask 31744  }
  0x57   : > { %v444_v3 = vld [vmem:[%s6997_s2] sm:$0xff]  ;;  %4133 = vset.pattern.permute.xlu1 %v4175_v4  ;;  %4132 = vset.pattern.permute.xlu0 %v4175_v4  ;;  %v437_v6 = vld [vmem:[%s6996_s1 + $0x8] sm:$0xff]  ;;  %v447_v7 = vld [vmem:[%s6997_s2 + $0x18] sm:$0xff]  ;;  %vm746_vm3 = vcmask 523264   ;;  %s3566_s19 = sshll.u32 %s4156_s24, 7  ;;  %vm3331_vm5 = vcmask 7168  }
  0x58   : > { %v436_v5 = vld [vmem:[%s6996_s1] sm:$0xff]  ;;  %3747 = vmatprep.subr.msk.mxu0 %vm517_vm1, %v435_v1  ;;  %464 = vperm.xlu1 %4133, %v446_v2   ;;  %v438_v8 = vld [vmem:[%s6996_s1 + $0x10] sm:$0xff]  ;;  %v445_v9 = vld [vmem:[%s6997_s2 + $0x8] sm:$0xff]  ;;  %s2686_s20 = ssub.s32 320, %s3566_s19 }
  0x59   : > { %454 = vperm.xlu0 %4132, %v444_v3   ;;  %3748 = vmatpush3.msk.msra.mxu0 %vm517_vm1, %v435_v1  ;;  %v439_v10 = vld [vmem:[%s6996_s1 + $0x18] sm:$0xff]  ;;  %v449_v11 = vld [vmem:[%s6997_s2 + $0x28] sm:$0xff]  ;;  %v440_v12 = vld [vmem:[%s6996_s1 + $0x20] sm:$0xff] }
  0x5a   : > { %3749 = vmatprep.mubr.msk.f32.mxu0 %vm492_vm2, %v436_v5  ;;  %v448_v13 = vld [vmem:[%s6997_s2 + $0x20] sm:$0xff]  ;;  %v441_v14 = vld [vmem:[%s6996_s1 + $0x28] sm:$0xff]  ;;  %v451_v15 = vld [vmem:[%s6997_s2 + $0x38] sm:$0xff] }
  0x5b   : > { %3750 = vmatmul.mubr.msk.f32.vlgmr.msra.gmra.mrb[0].mxu0 %vm492_vm2, %v437_v6  ;;  %v442_v16 = vld [vmem:[%s6996_s1 + $0x30] sm:$0xff]  ;;  %v443_v18 = vld [vmem:[%s6996_s1 + $0x38] sm:$0xff]  ;;  %v651_v19 = vld [vmem:[%s6999_s4 + $0x8] sm:$0xff] }
  0x5c   : > { %469 = vperm.xlu1 %4133, %v447_v7   ;;  %3752 = vmatprep.mubr.msk.f32.mxu0 %vm492_vm2, %v438_v8  ;;  %v450_v17 = vld [vmem:[%s6997_s2 + $0x30] sm:$0xff]  ;;  %v650_v20 = vld [vmem:[%s6999_s4] sm:$0xff]  ;;  %v653_v21 = vld [vmem:[%s6999_s4 + $0x18] sm:$0xff] }
  0x5d   : > { %459 = vperm.xlu0 %4132, %v445_v9   ;;  %v652_v22 = vld [vmem:[%s6999_s4 + $0x10] sm:$0xff]  ;;  %v655_v23 = vld [vmem:[%s6999_s4 + $0x28] sm:$0xff]  ;;  %v654_v24 = vld [vmem:[%s6999_s4 + $0x20] sm:$0xff] }
  0x5e   : > { %v657_v25 = vld [vmem:[%s6999_s4 + $0x38] sm:$0xff]  ;;  %v656_v26 = vld [vmem:[%s6999_s4 + $0x30] sm:$0xff]  ;;  %v659_v27 = vld [vmem:[%s6999_s4 + $0x48] sm:$0xff] }
  0x5f   : > { %3753 = vmatmul.mubr.msk.f32.gmra.mrb[2].mxu0 %vm492_vm2, %v439_v10  ;;  %v658_v28 = vld [vmem:[%s6999_s4 + $0x40] sm:$0xff]  ;;  %v661_v29 = vld [vmem:[%s6999_s4 + $0x58] sm:$0xff]  ;;  %v660_v30 = vld [vmem:[%s6999_s4 + $0x50] sm:$0xff] }
  0x60   : > { %479 = vperm.xlu1 %4133, %v449_v11   ;;  %3755 = vmatprep.mubr.msk.f32.mxu0 %vm492_vm2, %v440_v12  ;;  %v663_v31 = vld [vmem:[%s6999_s4 + $0x68] sm:$0xff]  ;;  %v662_v32 = vld [vmem:[%s6999_s4 + $0x60] sm:$0xff]  ;;  %v665_v33 = vld [vmem:[%s6999_s4 + $0x78] sm:$0xff] }
  0x61   : > { %474 = vperm.xlu0 %4132, %v448_v13   ;;  %v664_v34 = vld [vmem:[%s6999_s4 + $0x70] sm:$0xff]  ;;  %v1085_v35 = vld [vmem:[%s7001_s6 + $0x8] sm:$0xff]  ;;  %v1084_v36 = vld [vmem:[%s7001_s6] sm:$0xff] }
  0x62   : > { %v1087_v37 = vld [vmem:[%s7001_s6 + $0x18] sm:$0xff]  ;;  %v1086_v38 = vld [vmem:[%s7001_s6 + $0x10] sm:$0xff]  ;;  %v1089_v39 = vld [vmem:[%s7001_s6 + $0x28] sm:$0xff] }
  0x63   : > { %3756 = vmatmul.mubr.msk.f32.gmra.mrb[4].mxu0 %vm492_vm2, %v441_v14  ;;  %v1088_v40 = vld [vmem:[%s7001_s6 + $0x20] sm:$0xff]  ;;  %v1091_v41 = vld [vmem:[%s7001_s6 + $0x38] sm:$0xff]  ;;  %v1090_v42 = vld [vmem:[%s7001_s6 + $0x30] sm:$0xff] }
  0x64   : > { %489 = vperm.xlu1 %4133, %v451_v15   ;;  %3758 = vmatprep.mubr.msk.f32.mxu0 %vm492_vm2, %v442_v16  ;;  %v1093_v43 = vld [vmem:[%s7001_s6 + $0x48] sm:$0xff]  ;;  %v1092_v44 = vld [vmem:[%s7001_s6 + $0x40] sm:$0xff]  ;;  %v1095_v45 = vld [vmem:[%s7001_s6 + $0x58] sm:$0xff] }
  0x65   : > { %484 = vperm.xlu0 %4132, %v450_v17   ;;  %v1094_v46 = vld [vmem:[%s7001_s6 + $0x50] sm:$0xff]  ;;  %v1097_v47 = vld [vmem:[%s7001_s6 + $0x68] sm:$0xff]  ;;  %v1096_v48 = vld [vmem:[%s7001_s6 + $0x60] sm:$0xff] }
  0x66   : > { %v1099_v49 = vld [vmem:[%s7001_s6 + $0x78] sm:$0xff]  ;;  %v1098_v50 = vld [vmem:[%s7001_s6 + $0x70] sm:$0xff]  ;;  %v1101_v51 = vld [vmem:[%s7001_s6 + $0x88] sm:$0xff] }
  0x67   : > { %3759 = vmatmul.mubr.msk.f32.gmra.mrb[6].mxu0 %vm492_vm2, %v443_v18  ;;  %v1100_v52 = vld [vmem:[%s7001_s6 + $0x80] sm:$0xff]  ;;  %v1103_v53 = vld [vmem:[%s7001_s6 + $0x98] sm:$0xff]  ;;  %v1102_v54 = vld [vmem:[%s7001_s6 + $0x90] sm:$0xff] }
  0x68   : > { %673 = vperm.xlu1 %4133, %v651_v19   ;;  %v1105_v55 = vld [vmem:[%s7001_s6 + $0xa8] sm:$0xff]  ;;  %v1104_v56 = vld [vmem:[%s7001_s6 + $0xa0] sm:$0xff]  ;;  %v1107_v57 = vld [vmem:[%s7001_s6 + $0xb8] sm:$0xff] }
  0x69   : > { %668 = vperm.xlu0 %4132, %v650_v20   ;;  %v1106_v58 = vld [vmem:[%s7001_s6 + $0xb0] sm:$0xff]  ;;  %v1109_v59 = vld [vmem:[%s7001_s6 + $0xc8] sm:$0xff]  ;;  %v1108_v60 = vld [vmem:[%s7001_s6 + $0xc0] sm:$0xff] }
  0x6a   : > { %v1111_v61 = vld [vmem:[%s7001_s6 + $0xd8] sm:$0xff]  ;;  %v1110_v62 = vld [vmem:[%s7001_s6 + $0xd0] sm:$0xff]  ;;  %v1113_v63 = vld [vmem:[%s7001_s6 + $0xe8] sm:$0xff] }
  0x6b   : > { %v1112_v0 = vld [vmem:[%s7001_s6 + $0xe0] sm:$0xff]  ;;  %v1115_v1 = vld [vmem:[%s7001_s6 + $0xf8] sm:$0xff]  ;;  %v1114_v2 = vld [vmem:[%s7001_s6 + $0xf0] sm:$0xff] }
  0x6c   : > { %683 = vperm.xlu1 %4133, %v653_v21   ;;  %v634_v3 = vld [vmem:[%s6998_s3] sm:$0xff]  ;;  %v1117_v4 = vld [vmem:[%s7001_s6 + $0x108] sm:$0xff]  ;;  %v1119_v6 = vld [vmem:[%s7001_s6 + $0x118] sm:$0xff] }
  0x6d   : > { %678 = vperm.xlu0 %4132, %v652_v22   ;;  %3777 = vmatprep.mubr.msk.f32.mxu1 %vm746_vm3, %v634_v3  ;;  %v1116_v5 = vld [vmem:[%s7001_s6 + $0x100] sm:$0xff]  ;;  %v1118_v7 = vld [vmem:[%s7001_s6 + $0x110] sm:$0xff]  ;;  %v1121_v8 = vld [vmem:[%s7001_s6 + $0x128] sm:$0xff] }
  0x6e   : > { %v1120_v9 = vld [vmem:[%s7001_s6 + $0x120] sm:$0xff]  ;;  %v1123_v10 = vld [vmem:[%s7001_s6 + $0x138] sm:$0xff]  ;;  %v1122_v11 = vld [vmem:[%s7001_s6 + $0x130] sm:$0xff] }
  0x6f   : > { %v1125_v12 = vld [vmem:[%s7001_s6 + $0x148] sm:$0xff]  ;;  %v1124_v13 = vld [vmem:[%s7001_s6 + $0x140] sm:$0xff]  ;;  %v1127_v14 = vld [vmem:[%s7001_s6 + $0x158] sm:$0xff] }
  0x70   : > { %693 = vperm.xlu1 %4133, %v655_v23   ;;  %v1126_v15 = vld [vmem:[%s7001_s6 + $0x150] sm:$0xff]  ;;  %v1129_v16 = vld [vmem:[%s7001_s6 + $0x168] sm:$0xff]  ;;  %v1128_v17 = vld [vmem:[%s7001_s6 + $0x160] sm:$0xff] }
  0x71   : > { %688 = vperm.xlu0 %4132, %v654_v24   ;;  %v1131_v18 = vld [vmem:[%s7001_s6 + $0x178] sm:$0xff]  ;;  %v1130_v19 = vld [vmem:[%s7001_s6 + $0x170] sm:$0xff]  ;;  %v1133_v20 = vld [vmem:[%s7001_s6 + $0x188] sm:$0xff] }
  0x72   : > { %v1132_v21 = vld [vmem:[%s7001_s6 + $0x180] sm:$0xff]  ;;  %v1135_v24 = vld [vmem:[%s7001_s6 + $0x198] sm:$0xff] }
  0x74   : > { %703 = vperm.xlu1 %4133, %v657_v25   ;;  %v1134_v25 = vld [vmem:[%s7001_s6 + $0x190] sm:$0xff] }
  0x75   : > { %698 = vperm.xlu0 %4132, %v656_v26   ;;  %v1137_v26 = vld [vmem:[%s7001_s6 + $0x1a8] sm:$0xff] }
  0x78   : > { %713 = vperm.xlu1 %4133, %v659_v27  }
  0x79   : > { %708 = vperm.xlu0 %4132, %v658_v28   ;;  %v1136_v28 = vld [vmem:[%s7001_s6 + $0x1a0] sm:$0xff] }
  0x7c   : > { %723 = vperm.xlu1 %4133, %v661_v29  }
  0x7d   : > { %718 = vperm.xlu0 %4132, %v660_v30   ;;  %v1139_v30 = vld [vmem:[%s7001_s6 + $0x1b8] sm:$0xff] }
  0x80   : > { %733 = vperm.xlu1 %4133, %v663_v31   ;;  %v1138_v31 = vld [vmem:[%s7001_s6 + $0x1b0] sm:$0xff] }
  0x81   : > { %728 = vperm.xlu0 %4132, %v662_v32  }
  0x84   : > { %743 = vperm.xlu1 %4133, %v665_v33  }
  0x85   : > { %738 = vperm.xlu0 %4132, %v664_v34   ;;  %v1141_v34 = vld [vmem:[%s7001_s6 + $0x1c8] sm:$0xff] }
  0x88   : > { %1219 = vperm.xlu1 %4133, %v1085_v35   ;;  %v1140_v35 = vld [vmem:[%s7001_s6 + $0x1c0] sm:$0xff] }
  0x89   : > { %1214 = vperm.xlu0 %4132, %v1084_v36   ;;  %v1143_v36 = vld [vmem:[%s7001_s6 + $0x1d8] sm:$0xff] }
  0x8c   : > { %1229 = vperm.xlu1 %4133, %v1087_v37  }
  0x8d   : > { %1224 = vperm.xlu0 %4132, %v1086_v38   ;;  %v1142_v38 = vld [vmem:[%s7001_s6 + $0x1d0] sm:$0xff] }
  0x90   : > { %1239 = vperm.xlu1 %4133, %v1089_v39  }
  0x91   : > { %1234 = vperm.xlu0 %4132, %v1088_v40   ;;  %v1145_v40 = vld [vmem:[%s7001_s6 + $0x1e8] sm:$0xff] }
  0x94   : > { %1249 = vperm.xlu1 %4133, %v1091_v41   ;;  %v1144_v41 = vld [vmem:[%s7001_s6 + $0x1e0] sm:$0xff] }
  0x95   : > { %1244 = vperm.xlu0 %4132, %v1090_v42  }
  0x98   : > { %1259 = vperm.xlu1 %4133, %v1093_v43  }
  0x99   : > { %1254 = vperm.xlu0 %4132, %v1092_v44   ;;  %v1147_v44 = vld [vmem:[%s7001_s6 + $0x1f8] sm:$0xff] }
  0x9c   : > { %1269 = vperm.xlu1 %4133, %v1095_v45   ;;  %v1146_v45 = vld [vmem:[%s7001_s6 + $0x1f0] sm:$0xff] }
  0x9d   : > { %1264 = vperm.xlu0 %4132, %v1094_v46   ;;  %v1149_v46 = vld [vmem:[%s7001_s6 + $0x208] sm:$0xff] }
  0xa0   : > { %1279 = vperm.xlu1 %4133, %v1097_v47  }
  0xa1   : > { %1274 = vperm.xlu0 %4132, %v1096_v48   ;;  %v1148_v48 = vld [vmem:[%s7001_s6 + $0x200] sm:$0xff] }
  0xa4   : > { %1289 = vperm.xlu1 %4133, %v1099_v49  }
  0xa5   : > { %1284 = vperm.xlu0 %4132, %v1098_v50   ;;  %v1151_v50 = vld [vmem:[%s7001_s6 + $0x218] sm:$0xff] }
  0xa8   : > { %1299 = vperm.xlu1 %4133, %v1101_v51   ;;  %v1150_v51 = vld [vmem:[%s7001_s6 + $0x210] sm:$0xff] }
  0xa9   : > { %1294 = vperm.xlu0 %4132, %v1100_v52  }
  0xac   : > { %1309 = vperm.xlu1 %4133, %v1103_v53  }
  0xad   : > { %1304 = vperm.xlu0 %4132, %v1102_v54   ;;  %v1153_v54 = vld [vmem:[%s7001_s6 + $0x228] sm:$0xff] }
  0xb0   : > { %1319 = vperm.xlu1 %4133, %v1105_v55   ;;  %v1152_v55 = vld [vmem:[%s7001_s6 + $0x220] sm:$0xff] }
  0xb1   : > { %1314 = vperm.xlu0 %4132, %v1104_v56   ;;  %v1155_v56 = vld [vmem:[%s7001_s6 + $0x238] sm:$0xff] }
  0xb4   : > { %1329 = vperm.xlu1 %4133, %v1107_v57  }
  0xb5   : > { %1324 = vperm.xlu0 %4132, %v1106_v58   ;;  %v1154_v58 = vld [vmem:[%s7001_s6 + $0x230] sm:$0xff] }
  0xb8   : > { %1339 = vperm.xlu1 %4133, %v1109_v59  }
  0xb9   : > { %1334 = vperm.xlu0 %4132, %v1108_v60   ;;  %v1157_v60 = vld [vmem:[%s7001_s6 + $0x248] sm:$0xff] }
  0xbc   : > { %1349 = vperm.xlu1 %4133, %v1111_v61   ;;  %v1156_v61 = vld [vmem:[%s7001_s6 + $0x240] sm:$0xff] }
  0xbd   : > { %1344 = vperm.xlu0 %4132, %v1110_v62  }
  0xc0   : > { %1359 = vperm.xlu1 %4133, %v1113_v63  }
  0xc1   : > { %1354 = vperm.xlu0 %4132, %v1112_v0   ;;  %v1159_v0 = vld [vmem:[%s7001_s6 + $0x258] sm:$0xff] }
  0xc4   : > { %1369 = vperm.xlu1 %4133, %v1115_v1   ;;  %v1158_v1 = vld [vmem:[%s7001_s6 + $0x250] sm:$0xff] }
  0xc5   : > { %1364 = vperm.xlu0 %4132, %v1114_v2   ;;  %v1161_v2 = vld [vmem:[%s7001_s6 + $0x268] sm:$0xff] }
  0xc8   : > { %1379 = vperm.xlu1 %4133, %v1117_v4   ;;  %v1160_v4 = vld [vmem:[%s7001_s6 + $0x260] sm:$0xff] }
  0xc9   : > { %1374 = vperm.xlu0 %4132, %v1116_v5  }
  0xcc   : > { %1389 = vperm.xlu1 %4133, %v1119_v6   ;;  %v1163_v6 = vld [vmem:[%s7001_s6 + $0x278] sm:$0xff] }
  0xcd   : > { %1384 = vperm.xlu0 %4132, %v1118_v7   ;;  %v1162_v7 = vld [vmem:[%s7001_s6 + $0x270] sm:$0xff] }
  0xd0   : > { %1399 = vperm.xlu1 %4133, %v1121_v8  }
  0xd1   : > { %1394 = vperm.xlu0 %4132, %v1120_v9  }
  0xd4   : > { %1409 = vperm.xlu1 %4133, %v1123_v10   ;;  %v1165_v10 = vld [vmem:[%s7001_s6 + $0x288] sm:$0xff] }
  0xd5   : > { %1404 = vperm.xlu0 %4132, %v1122_v11   ;;  %v1164_v11 = vld [vmem:[%s7001_s6 + $0x280] sm:$0xff] }
  0xd7   : > { %v4904_v22 = vpop.permute.xlu1 %464 }
  0xd8   : > { %1419 = vperm.xlu1 %4133, %v1125_v12   ;;  %v4906_v23 = vpop.permute.xlu0 %454  ;;  %v1167_v12 = vld [vmem:[%s7001_s6 + $0x298] sm:$0xff] }
  0xd9   : > { %1414 = vperm.xlu0 %4132, %v1124_v13  }
  0xdb   : > { %v4917_v27 = vpop.permute.xlu1 %469 }
  0xdc   : > { %1429 = vperm.xlu1 %4133, %v1127_v14   ;;  %v4922_v29 = vpop.permute.xlu0 %459  ;;  %v1166_v14 = vld [vmem:[%s7001_s6 + $0x290] sm:$0xff] }
  0xdd   : > { %1424 = vperm.xlu0 %4132, %v1126_v15  }
  0xdf   : > { %v4930_v32 = vpop.permute.xlu1 %479 }
  0xe0   : > { %1439 = vperm.xlu1 %4133, %v1129_v16   ;;  %v4932_v33 = vpop.permute.xlu0 %474  ;;  %v1169_v16 = vld [vmem:[%s7001_s6 + $0x2a8] sm:$0xff] }
  0xe1   : > { %1434 = vperm.xlu0 %4132, %v1128_v17  }
  0xe3   : > { %v4943_v37 = vpop.permute.xlu1 %489 }
  0xe4   : > { %1449 = vperm.xlu1 %4133, %v1131_v18   ;;  %v4948_v39 = vpop.permute.xlu0 %484  ;;  %v1168_v18 = vld [vmem:[%s7001_s6 + $0x2a0] sm:$0xff] }
  0xe5   : > { %1444 = vperm.xlu0 %4132, %v1130_v19  }
  0xe7   : > { %v4956_v42 = vpop.permute.xlu1 %673 }
  0xe8   : > { %1459 = vperm.xlu1 %4133, %v1133_v20   ;;  %v4958_v43 = vpop.permute.xlu0 %668 }
  0xe9   : > { %1454 = vperm.xlu0 %4132, %v1132_v21  }
  0xeb   : > { %v4969_v47 = vpop.permute.xlu1 %683 }
  0xec   : > { %1469 = vperm.xlu1 %4133, %v1135_v24   ;;  %v4974_v49 = vpop.permute.xlu0 %678 }
  0xed   : > { %1464 = vperm.xlu0 %4132, %v1134_v25  }
  0xef   : > { %v4982_v52 = vpop.permute.xlu1 %693 }
  0xf0   : > { %1479 = vperm.xlu1 %4133, %v1137_v26   ;;  %v4984_v53 = vpop.permute.xlu0 %688 }
  0xf1   : > { %1474 = vperm.xlu0 %4132, %v1136_v28   ;;  %v1171_v28 = vld [vmem:[%s7001_s6 + $0x2b8] sm:$0xff] }
  0xf3   : > { %v4995_v57 = vpop.permute.xlu1 %703 }
  0xf4   : > { %1489 = vperm.xlu1 %4133, %v1139_v30   ;;  %v5000_v59 = vpop.permute.xlu0 %698 }
  0xf5   : > { %1484 = vperm.xlu0 %4132, %v1138_v31  }
  0xf7   : > { %v5008_v62 = vpop.permute.xlu1 %713 }
  0xf8   : > { %1499 = vperm.xlu1 %4133, %v1141_v34   ;;  %v5010_v63 = vpop.permute.xlu0 %708 }
  0xf9   : > { %1494 = vperm.xlu0 %4132, %v1140_v35  }
  0xfb   : > { %v5021_v3 = vpop.permute.xlu1 %723 }
  0xfc   : > { %1509 = vperm.xlu1 %4133, %v1143_v36   ;;  %v5026_v5 = vpop.permute.xlu0 %718 }
  0xfd   : > { %1504 = vperm.xlu0 %4132, %v1142_v38  }
  0xff   : > { %v5034_v8 = vpop.permute.xlu1 %733 }
 0x100   : > { %1519 = vperm.xlu1 %4133, %v1145_v40   ;;  %v5036_v9 = vpop.permute.xlu0 %728  ;;  %v1173_v40 = vld [vmem:[%s7001_s6 + $0x2c8] sm:$0xff] }
 0x101   : > { %1514 = vperm.xlu0 %4132, %v1144_v41  }
 0x103   : > { %v5047_v13 = vpop.permute.xlu1 %743 }
 0x104   : > { %1529 = vperm.xlu1 %4133, %v1147_v44   ;;  %v5052_v15 = vpop.permute.xlu0 %738 }
 0x105   : > { %1524 = vperm.xlu0 %4132, %v1146_v45  }
 0x107   : > { %v5061_v21 = vpop.permute.xlu1 %1219 }
 0x108   : > { %1539 = vperm.xlu1 %4133, %v1149_v46   ;;  %v5064_v25 = vpop.permute.xlu0 %1214 }
 0x109   : > { %1534 = vperm.xlu0 %4132, %v1148_v48  }
 0x10b   : > { %v5077_v41 = vpop.permute.xlu1 %1229 }
 0x10c   : > { %1549 = vperm.xlu1 %4133, %v1151_v50   ;;  %v5082_v46 = vpop.permute.xlu0 %1224 }
 0x10d   : > { %1544 = vperm.xlu0 %4132, %v1150_v51  }
 0x110   : > { %1559 = vperm.xlu1 %4133, %v1153_v54  }
 0x111   : > { %1554 = vperm.xlu0 %4132, %v1152_v55   ;;  %v1175_v55 = vld [vmem:[%s7001_s6 + $0x2d8] sm:$0xff] }
 0x114   : > { %1569 = vperm.xlu1 %4133, %v1155_v56  }
 0x115   : > { %1564 = vperm.xlu0 %4132, %v1154_v58  }
 0x118   : > { %1579 = vperm.xlu1 %4133, %v1157_v60   ;;  %v1174_v60 = vld [vmem:[%s7001_s6 + $0x2d0] sm:$0xff] }
 0x119   : > { %1574 = vperm.xlu0 %4132, %v1156_v61  }
 0x11c   : > { %1589 = vperm.xlu1 %4133, %v1159_v0   ;;  %v5093_v0 = vpop.permute.xlu1 %1239 }
 0x11d   : > { %1584 = vperm.xlu0 %4132, %v1158_v1  }
 0x120   : > { %1599 = vperm.xlu1 %4133, %v1161_v2   ;;  %v5096_v2 = vpop.permute.xlu0 %1234 }
 0x121   : > { %1594 = vperm.xlu0 %4132, %v1160_v4  }
 0x124   : > { %1609 = vperm.xlu1 %4133, %v1163_v6   ;;  %v1177_v6 = vld [vmem:[%s7001_s6 + $0x2e8] sm:$0xff] }
 0x125   : > { %1604 = vperm.xlu0 %4132, %v1162_v7  }
 0x128   : > { %1619 = vperm.xlu1 %4133, %v1165_v10  }
 0x129   : > { %1614 = vperm.xlu0 %4132, %v1164_v11   ;;  %v5107_v11 = vpop.permute.xlu1 %1249 }
 0x12c   : > { %1629 = vperm.xlu1 %4133, %v1167_v12   ;;  %v1178_v12 = vld [vmem:[%s7001_s6 + $0x2f0] sm:$0xff] }
 0x12d   : > { %1624 = vperm.xlu0 %4132, %v1166_v14   ;;  %v5112_v14 = vpop.permute.xlu0 %1244 }
 0x12e   : > { %v3751_v17 = vpop.f32.mrb[0].mxu0 }
 0x12f   : > { %v593_v19 = vadd.f32 %v3751_v17, %v4922_v29  ;;  %v587_v20 = vpop.f32.mrb[1].mxu0  ;;  %v1170_v29 = vld [vmem:[%s7001_s6 + $0x2b0] sm:$0xff] }
 0x130   : > { %v588_v24 = vadd.f32 %v587_v20, %v4906_v23  ;;  %1639 = vperm.xlu1 %4133, %v1169_v16   ;;  %v635_v16 = vld [vmem:[%s6998_s3 + $0x8] sm:$0xff]  ;;  %v636_v17 = vld [vmem:[%s6998_s3 + $0x10] sm:$0xff]  ;;  %v637_v20 = vld [vmem:[%s6998_s3 + $0x18] sm:$0xff] }
 0x131   : > { %v627_v26 = vmax.f32 %v593_v19, 0.0  ;;  %1634 = vperm.xlu0 %4132, %v1168_v18   ;;  %v1181_v18 = vld [vmem:[%s7001_s6 + $0x308] sm:$0xff]  ;;  %v1180_v19 = vld [vmem:[%s7001_s6 + $0x300] sm:$0xff] }
 0x132   : > { %v626_v30 = vmax.f32 %v588_v24, 0.0  ;;  %v3754_v31 = vpop.f32.mrb[2].mxu0  ;;  %v5131_v24 = vpop.permute.xlu1 %1259 }
 0x133   : > { %v603_v34 = vadd.f32 %v3754_v31, %v4917_v27  ;;  %v597_v35 = vpop.f32.mrb[3].mxu0  ;;  %v1172_v27 = vld [vmem:[%s7001_s6 + $0x2c0] sm:$0xff]  ;;  %v1182_v31 = vld [vmem:[%s7001_s6 + $0x310] sm:$0xff] }
 0x134   : > { %v598_v23 = vadd.f32 %v597_v35, %v4904_v22  ;;  %1649 = vperm.xlu1 %4133, %v1171_v28   ;;  %v4025_v36 = vpack.c.bf16 %v627_v26, %v626_v30  ;;  %v638_v26 = vld [vmem:[%s6998_s3 + $0x20] sm:$0xff]  ;;  %v5136_v28 = vpop.permute.xlu0 %1254  ;;  %v1183_v30 = vld [vmem:[%s7001_s6 + $0x318] sm:$0xff]  ;;  %v1185_v35 = vld [vmem:[%s7001_s6 + $0x328] sm:$0xff] }
 0x135   : > { %v629_v38 = vmax.f32 %v603_v34, 0.0  ;;  %1644 = vperm.xlu0 %4132, %v1170_v29   ;;  %v639_v29 = vld [vmem:[%s6998_s3 + $0x28] sm:$0xff]  ;;  %v640_v34 = vld [vmem:[%s6998_s3 + $0x30] sm:$0xff] }
 0x136   : > { %v628_v44 = vmax.f32 %v598_v23, 0.0  ;;  %v3757_v45 = vpop.f32.mrb[4].mxu0  ;;  %4026 = vmatprep.subr.bf16.mxu1 %v4025_v36  ;;  %v5155_v23 = vpop.permute.xlu1 %1269 }
 0x137   : > { %v613_v22 = vadd.f32 %v3757_v45, %v4930_v32  ;;  %v607_v48 = vpop.f32.mrb[5].mxu0  ;;  %4028 = vmatpush3.bf16.msra.mxu1 %v4025_v36  ;;  %v1184_v36 = vld [vmem:[%s7001_s6 + $0x320] sm:$0xff]  ;;  %v1187_v45 = vld [vmem:[%s7001_s6 + $0x338] sm:$0xff] }
 0x138   : > { %v4029_v50 = vpack.c.bf16 %v629_v38, %v628_v44  ;;  %v608_v51 = vadd.f32 %v607_v48, %v4932_v33  ;;  %1659 = vperm.xlu1 %4133, %v1173_v40   ;;  %v5161_v38 = vpop.permute.xlu0 %1264  ;;  %v641_v40 = vld [vmem:[%s6998_s3 + $0x38] sm:$0xff]  ;;  %v642_v44 = vld [vmem:[%s6998_s3 + $0x40] sm:$0xff] }
 0x139   : > { %v631_v54 = vmax.f32 %v613_v22, 0.0  ;;  %1654 = vperm.xlu0 %4132, %v1172_v27   ;;  %v1186_v27 = vld [vmem:[%s7001_s6 + $0x330] sm:$0xff]  ;;  %v643_v22 = vld [vmem:[%s6998_s3 + $0x48] sm:$0xff] }
 0x13a   : > { %v630_v56 = vmax.f32 %v608_v51, 0.0  ;;  %v3760_v58 = vpop.f32.mrb[6].mxu0  ;;  %4030 = vmatprep.subr.bf16.mxu1 %v4029_v50  ;;  %v5181_v48 = vpop.permute.xlu1 %1279 }
 0x13b   : > { %v623_v32 = vadd.f32 %v3760_v58, %v4943_v37  ;;  %v617_v61 = vpop.f32.mrb[7].mxu0  ;;  %4032 = vmatpush3.bf16.msra.mxu1 %v4029_v50  ;;  %v1176_v37 = vld [vmem:[%s7001_s6 + $0x2e0] sm:$0xff]  ;;  %v644_v50 = vld [vmem:[%s6998_s3 + $0x50] sm:$0xff] }
 0x13c   : > { %v4033_v33 = vpack.c.bf16 %v631_v54, %v630_v56  ;;  %v618_v1 = vadd.f32 %v617_v61, %v4948_v39  ;;  %1669 = vperm.xlu1 %4133, %v1175_v55   ;;  %v1179_v39 = vld [vmem:[%s7001_s6 + $0x2f8] sm:$0xff]  ;;  %v5186_v51 = vpop.permute.xlu0 %1274  ;;  %v1189_v54 = vld [vmem:[%s7001_s6 + $0x348] sm:$0xff]  ;;  %v1188_v55 = vld [vmem:[%s7001_s6 + $0x340] sm:$0xff] }
 0x13d   : > { %v633_v4 = vmax.f32 %v623_v32, 0.0  ;;  %1664 = vperm.xlu0 %4132, %v1174_v60   ;;  %v645_v56 = vld [vmem:[%s6998_s3 + $0x58] sm:$0xff]  ;;  %v646_v58 = vld [vmem:[%s6998_s3 + $0x60] sm:$0xff]  ;;  %v1190_v61 = vld [vmem:[%s7001_s6 + $0x350] sm:$0xff] }
 0x13e   : > { %v632_v7 = vmax.f32 %v618_v1, 0.0  ;;  %4034 = vmatprep.subr.bf16.mxu1 %v4033_v33  ;;  %v1191_v60 = vld [vmem:[%s7001_s6 + $0x358] sm:$0xff]  ;;  %v5205_v32 = vpop.permute.xlu1 %1289  ;;  %v647_v1 = vld [vmem:[%s6998_s3 + $0x68] sm:$0xff] }
 0x13f   : > { %4036 = vmatpush3.bf16.msra.mxu1 %v4033_v33 }
 0x140   : > { %v4037_v10 = vpack.c.bf16 %v633_v4, %v632_v7  ;;  %1679 = vperm.xlu1 %4133, %v1177_v6   ;;  %v5211_v33 = vpop.permute.xlu0 %1284  ;;  %v648_v4 = vld [vmem:[%s6998_s3 + $0x70] sm:$0xff]  ;;  %v1193_v6 = vld [vmem:[%s7001_s6 + $0x368] sm:$0xff]  ;;  %v1192_v7 = vld [vmem:[%s7001_s6 + $0x360] sm:$0xff] }
 0x141   : > { %1674 = vperm.xlu0 %4132, %v1176_v37   ;;  %v649_v37 = vld [vmem:[%s6998_s3 + $0x78] sm:$0xff] }
 0x142   : > { %4038 = vmatprep.subr.bf16.mxu1 %v4037_v10 }
 0x143   : > { %4040 = vmatpush3.bf16.msra.mxu1 %v4037_v10  ;;  %v5231_v10 = vpop.permute.xlu1 %1299 }
 0x144   : > { %1689 = vperm.xlu1 %4133, %v1179_v39   ;;  %v5233_v39 = vpop.permute.xlu0 %1294 }
 0x145   : > { %1684 = vperm.xlu0 %4132, %v1178_v12   ;;  %v1195_v12 = vld [vmem:[%s7001_s6 + $0x378] sm:$0xff] }
 0x146   : > { %3778 = vmatmul.mubr.msk.f32.vlgmr.msra.gmra.mrb[0].mxu1 %vm746_vm3, %v635_v16  ;;  %v1194_v16 = vld [vmem:[%s7001_s6 + $0x370] sm:$0xff] }
 0x147   : > { %3780 = vmatprep.mubr.msk.f32.mxu1 %vm746_vm3, %v636_v17  ;;  %v1197_v17 = vld [vmem:[%s7001_s6 + $0x388] sm:$0xff] }
 0x148   : > { %1699 = vperm.xlu1 %4133, %v1181_v18   ;;  %v5245_v18 = vpop.permute.xlu1 %1309 }
 0x149   : > { %1694 = vperm.xlu0 %4132, %v1180_v19   ;;  %v1196_v19 = vld [vmem:[%s7001_s6 + $0x380] sm:$0xff] }
 0x14a   : > { %3781 = vmatmul.mubr.msk.f32.gmra.mrb[2].mxu1 %vm746_vm3, %v637_v20  ;;  %v5250_v20 = vpop.permute.xlu0 %1304 }
 0x14b   : > { %3783 = vmatprep.mubr.msk.f32.mxu1 %vm746_vm3, %v638_v26  ;;  %v1199_v26 = vld [vmem:[%s7001_s6 + $0x398] sm:$0xff] }
 0x14c   : > { %1709 = vperm.xlu1 %4133, %v1183_v30   ;;  %v1198_v30 = vld [vmem:[%s7001_s6 + $0x390] sm:$0xff] }
 0x14d   : > { %1704 = vperm.xlu0 %4132, %v1182_v31   ;;  %v5258_v31 = vpop.permute.xlu1 %1319 }
 0x14e   : > { %3784 = vmatmul.mubr.msk.f32.gmra.mrb[4].mxu1 %vm746_vm3, %v639_v29  ;;  %v5260_v29 = vpop.permute.xlu0 %1314 }
 0x14f   : > { %3786 = vmatprep.mubr.msk.f32.mxu1 %vm746_vm3, %v640_v34  ;;  %v1201_v34 = vld [vmem:[%s7001_s6 + $0x3a8] sm:$0xff] }
 0x150   : > { %1719 = vperm.xlu1 %4133, %v1185_v35   ;;  %v1200_v35 = vld [vmem:[%s7001_s6 + $0x3a0] sm:$0xff] }
 0x151   : > { %1714 = vperm.xlu0 %4132, %v1184_v36   ;;  %v1203_v36 = vld [vmem:[%s7001_s6 + $0x3b8] sm:$0xff] }
 0x152   : > { %3787 = vmatmul.mubr.msk.f32.gmra.mrb[6].mxu1 %vm746_vm3, %v641_v40  ;;  %v5271_v40 = vpop.permute.xlu1 %1329 }
 0x153   : > { %3789 = vmatprep.mubr.msk.f32.mxu1 %vm746_vm3, %v642_v44  ;;  %7003 = vst [vmem:[#allocation2_spill] sm:$0xff] %v5271_v40  ;;  %v1202_v44 = vld [vmem:[%s7001_s6 + $0x3b0] sm:$0xff] }
 0x154   : > { %1729 = vperm.xlu1 %4133, %v1187_v45   ;;  %v5276_v45 = vpop.permute.xlu0 %1324 }
 0x155   : > { %1724 = vperm.xlu0 %4132, %v1186_v27   ;;  %v1205_v27 = vld [vmem:[%s7001_s6 + $0x3c8] sm:$0xff] }
 0x156   : > { %3790 = vmatmul.mubr.msk.f32.gmra.mrb[8].mxu1 %vm746_vm3, %v643_v22  ;;  %v1204_v22 = vld [vmem:[%s7001_s6 + $0x3c0] sm:$0xff] }
 0x157   : > { %3792 = vmatprep.mubr.msk.f32.mxu1 %vm746_vm3, %v644_v50  ;;  %v5284_v50 = vpop.permute.xlu1 %1339 }
 0x158   : > { %1739 = vperm.xlu1 %4133, %v1189_v54   ;;  %7004 = vst [vmem:[#allocation3_spill] sm:$0xff] %v5284_v50  ;;  %v5286_v54 = vpop.permute.xlu0 %1334 }
 0x159   : > { %1734 = vperm.xlu0 %4132, %v1188_v55   ;;  %7005 = vst [vmem:[#allocation4_spill] sm:$0xff] %v5286_v54  ;;  %v1207_v55 = vld [vmem:[%s7001_s6 + $0x3d8] sm:$0xff] }
 0x15a   : > { %3793 = vmatmul.mubr.msk.f32.gmra.mrb[10].mxu1 %vm746_vm3, %v645_v56  ;;  %v1206_v56 = vld [vmem:[%s7001_s6 + $0x3d0] sm:$0xff] }
 0x15b   : > { %3795 = vmatprep.mubr.msk.f32.mxu1 %vm746_vm3, %v646_v58  ;;  %v1209_v58 = vld [vmem:[%s7001_s6 + $0x3e8] sm:$0xff] }
 0x15c   : > { %1749 = vperm.xlu1 %4133, %v1191_v60   ;;  %v5297_v60 = vpop.permute.xlu1 %1349 }
 0x15d   : > { %1744 = vperm.xlu0 %4132, %v1190_v61   ;;  %7006 = vst [vmem:[#allocation5_spill] sm:$0xff] %v5297_v60  ;;  %v1208_v61 = vld [vmem:[%s7001_s6 + $0x3e0] sm:$0xff] }
 0x15e   : > { %3796 = vmatmul.mubr.msk.f32.gmra.mrb[12].mxu1 %vm746_vm3, %v647_v1  ;;  %v5302_v1 = vpop.permute.xlu0 %1344 }
 0x15f   : > { %3798 = vmatprep.mubr.msk.f32.mxu1 %vm746_vm3, %v648_v4  ;;  %7007 = vst [vmem:[#allocation6_spill] sm:$0xff] %v5302_v1  ;;  %v1211_v4 = vld [vmem:[%s7001_s6 + $0x3f8] sm:$0xff] }
 0x160   : > { %1759 = vperm.xlu1 %4133, %v1193_v6   ;;  %v1210_v6 = vld [vmem:[%s7001_s6 + $0x3f0] sm:$0xff] }
 0x161   : > { %1754 = vperm.xlu0 %4132, %v1192_v7   ;;  %v5310_v7 = vpop.permute.xlu1 %1359 }
 0x162   : > { %3799 = vmatmul.mubr.msk.f32.gmra.mrb[14].mxu1 %vm746_vm3, %v649_v37  ;;  %7008 = vst [vmem:[#allocation7_spill] sm:$0xff] %v5310_v7  ;;  %v5312_v37 = vpop.permute.xlu0 %1354 }
 0x163   : > { %7009 = vst [vmem:[#allocation8_spill] sm:$0xff] %v5312_v37 }
 0x164   : > { %1769 = vperm.xlu1 %4133, %v1195_v12   ;;  %v956_v12 = vld [vmem:[%s7000_s5] sm:$0xff] }
 0x165   : > { %1764 = vperm.xlu0 %4132, %v1194_v16   ;;  %v1024_v16 = vld [vmem:[%s7000_s5 + $0x220] sm:$0xff]  ;;  %3833 = vmatprep.mubr.f32.mxu0 %v956_v12 }
 0x166   : > { %3935 = vmatprep.mubr.f32.mxu1 %v1024_v16 }
 0x168   : > { %1779 = vperm.xlu1 %4133, %v1197_v17  }
 0x169   : > { %1774 = vperm.xlu0 %4132, %v1196_v19  }
 0x16c   : > { %1789 = vperm.xlu1 %4133, %v1199_v26  }
 0x16d   : > { %1784 = vperm.xlu0 %4132, %v1198_v30  }
 0x170   : > { %1799 = vperm.xlu1 %4133, %v1201_v34  }
 0x171   : > { %1794 = vperm.xlu0 %4132, %v1200_v35  }
 0x174   : > { %1809 = vperm.xlu1 %4133, %v1203_v36  }
 0x175   : > { %1804 = vperm.xlu0 %4132, %v1202_v44  }
 0x178   : > { %1819 = vperm.xlu1 %4133, %v1205_v27  }
 0x179   : > { %1814 = vperm.xlu0 %4132, %v1204_v22  }
 0x17c   : > { %1829 = vperm.xlu1 %4133, %v1207_v55  }
 0x17d   : > { %1824 = vperm.xlu0 %4132, %v1206_v56  }
 0x180   : > { %1839 = vperm.xlu1 %4133, %v1209_v58  }
 0x181   : > { %1834 = vperm.xlu0 %4132, %v1208_v61  }
 0x184   : > { %1849 = vperm.xlu1 %4133, %v1211_v4  }
 0x185   : > { %1844 = vperm.xlu0 %4132, %v1210_v6  }
 0x219   : > { %v3779_v17 = vpop.f32.mrb[0].mxu1 }
 0x21a   : > { %v867_v19 = vadd.f32 %v3779_v17, %v4956_v42  ;;  %v861_v26 = vpop.f32.mrb[1].mxu1 }
 0x21b   : > { %v862_v30 = vadd.f32 %v861_v26, %v4958_v43 }
 0x21c   : > { %v941_v34 = vmax.f32 %v867_v19, 0.0 }
 0x21d   : > { %v940_v35 = vmax.f32 %v862_v30, 0.0  ;;  %v3782_v36 = vpop.f32.mrb[2].mxu1 }
 0x21e   : > { %v877_v44 = vadd.f32 %v3782_v36, %v4969_v47  ;;  %v871_v27 = vpop.f32.mrb[3].mxu1 }
 0x21f   : > { %v4041_v22 = vpack.c.bf16 %v941_v34, %v940_v35  ;;  %v872_v55 = vadd.f32 %v871_v27, %v4974_v49 }
 0x220   : > { %v943_v56 = vmax.f32 %v877_v44, 0.0 }
 0x221   : > { %v942_v58 = vmax.f32 %v872_v55, 0.0  ;;  %v3785_v61 = vpop.f32.mrb[4].mxu1  ;;  %4042 = vmatprep.subr.bf16.mxu0 %v4041_v22  ;;  %4073 = vmatprep.subr.bf16.mxu1 %v4041_v22 }
 0x222   : > { %v887_v4 = vadd.f32 %v3785_v61, %v4982_v52  ;;  %v881_v42 = vpop.f32.mrb[5].mxu1  ;;  %4044 = vmatpush3.bf16.msra.mxu0 %v4041_v22  ;;  %4081 = vmatpush3.bf16.msra.mxu1 %v4041_v22 }
 0x223   : > { %v4045_v43 = vpack.c.bf16 %v943_v56, %v942_v58  ;;  %v882_v6 = vadd.f32 %v881_v42, %v4984_v53 }
 0x224   : > { %v945_v12 = vmax.f32 %v887_v4, 0.0 }
 0x225   : > { %v944_v16 = vmax.f32 %v882_v6, 0.0  ;;  %v3788_v47 = vpop.f32.mrb[6].mxu1  ;;  %4046 = vmatprep.subr.bf16.mxu0 %v4045_v43  ;;  %4074 = vmatprep.subr.bf16.mxu1 %v4045_v43 }
 0x226   : > { %v897_v49 = vadd.f32 %v3788_v47, %v4995_v57  ;;  %v891_v17 = vpop.f32.mrb[7].mxu1  ;;  %4048 = vmatpush3.bf16.msra.mxu0 %v4045_v43  ;;  %4082 = vmatpush3.bf16.msra.mxu1 %v4045_v43 }
 0x227   : > { %v4049_v19 = vpack.c.bf16 %v945_v12, %v944_v16  ;;  %v892_v26 = vadd.f32 %v891_v17, %v5000_v59 }
 0x228   : > { %v947_v52 = vmax.f32 %v897_v49, 0.0 }
 0x229   : > { %v946_v30 = vmax.f32 %v892_v26, 0.0  ;;  %v3791_v34 = vpop.f32.mrb[8].mxu1  ;;  %4050 = vmatprep.subr.bf16.mxu0 %v4049_v19  ;;  %4075 = vmatprep.subr.bf16.mxu1 %v4049_v19  ;;  %v1025_v26 = vld [vmem:[%s7000_s5 + $0x228] sm:$0xff] }
 0x22a   : > { %v907_v53 = vadd.f32 %v3791_v34, %v5008_v62  ;;  %v901_v35 = vpop.f32.mrb[9].mxu1  ;;  %4052 = vmatpush3.bf16.msra.mxu0 %v4049_v19  ;;  %4083 = vmatpush3.bf16.msra.mxu1 %v4049_v19  ;;  %v1027_v34 = vld [vmem:[%s7000_s5 + $0x238] sm:$0xff] }
 0x22b   : > { %v4053_v36 = vpack.c.bf16 %v947_v52, %v946_v30  ;;  %v902_v44 = vadd.f32 %v901_v35, %v5010_v63  ;;  %v1026_v52 = vld [vmem:[%s7000_s5 + $0x230] sm:$0xff]  ;;  %v959_v30 = vld [vmem:[%s7000_s5 + $0x18] sm:$0xff]  ;;  %v1028_v35 = vld [vmem:[%s7000_s5 + $0x240] sm:$0xff] }
 0x22c   : > { %v949_v57 = vmax.f32 %v907_v53, 0.0  ;;  %v960_v53 = vld [vmem:[%s7000_s5 + $0x20] sm:$0xff] }
 0x22d   : > { %v948_v27 = vmax.f32 %v902_v44, 0.0  ;;  %v3794_v22 = vpop.f32.mrb[10].mxu1  ;;  %4054 = vmatprep.subr.bf16.mxu0 %v4053_v36  ;;  %4076 = vmatprep.subr.bf16.mxu1 %v4053_v36  ;;  %v1029_v44 = vld [vmem:[%s7000_s5 + $0x248] sm:$0xff] }
 0x22e   : > { %v917_v59 = vadd.f32 %v3794_v22, %v5021_v3  ;;  %v911_v55 = vpop.f32.mrb[11].mxu1  ;;  %4056 = vmatpush3.bf16.msra.mxu0 %v4053_v36  ;;  %4084 = vmatpush3.bf16.msra.mxu1 %v4053_v36  ;;  %v961_v36 = vld [vmem:[%s7000_s5 + $0x28] sm:$0xff]  ;;  %v963_v22 = vld [vmem:[%s7000_s5 + $0x38] sm:$0xff] }
 0x22f   : > { %v4057_v56 = vpack.c.bf16 %v949_v57, %v948_v27  ;;  %v912_v58 = vadd.f32 %v911_v55, %v5026_v5  ;;  %v962_v57 = vld [vmem:[%s7000_s5 + $0x30] sm:$0xff]  ;;  %v964_v55 = vld [vmem:[%s7000_s5 + $0x40] sm:$0xff] }
 0x230   : > { %v951_v62 = vmax.f32 %v917_v59, 0.0  ;;  %v1030_v27 = vld [vmem:[%s7000_s5 + $0x250] sm:$0xff]  ;;  %v1031_v59 = vld [vmem:[%s7000_s5 + $0x258] sm:$0xff] }
 0x231   : > { %v950_v61 = vmax.f32 %v912_v58, 0.0  ;;  %v3797_v4 = vpop.f32.mrb[12].mxu1  ;;  %4058 = vmatprep.subr.bf16.mxu0 %v4057_v56  ;;  %4077 = vmatprep.subr.bf16.mxu1 %v4057_v56  ;;  %v965_v58 = vld [vmem:[%s7000_s5 + $0x48] sm:$0xff] }
 0x232   : > { %v927_v63 = vadd.f32 %v3797_v4, %v5034_v8  ;;  %v921_v42 = vpop.f32.mrb[13].mxu1  ;;  %4060 = vmatpush3.bf16.msra.mxu0 %v4057_v56  ;;  %4085 = vmatpush3.bf16.msra.mxu1 %v4057_v56  ;;  %v1032_v56 = vld [vmem:[%s7000_s5 + $0x260] sm:$0xff]  ;;  %v1034_v4 = vld [vmem:[%s7000_s5 + $0x270] sm:$0xff] }
 0x233   : > { %v4061_v43 = vpack.c.bf16 %v951_v62, %v950_v61  ;;  %v922_v6 = vadd.f32 %v921_v42, %v5036_v9  ;;  %v1033_v62 = vld [vmem:[%s7000_s5 + $0x268] sm:$0xff]  ;;  %v966_v61 = vld [vmem:[%s7000_s5 + $0x50] sm:$0xff]  ;;  %v1035_v42 = vld [vmem:[%s7000_s5 + $0x278] sm:$0xff] }
 0x234   : > { %v953_v3 = vmax.f32 %v927_v63, 0.0  ;;  %v967_v63 = vld [vmem:[%s7000_s5 + $0x58] sm:$0xff] }
 0x235   : > { %v952_v12 = vmax.f32 %v922_v6, 0.0  ;;  %v3800_v16 = vpop.f32.mrb[14].mxu1  ;;  %4062 = vmatprep.subr.bf16.mxu0 %v4061_v43  ;;  %4078 = vmatprep.subr.bf16.mxu1 %v4061_v43  ;;  %v1036_v6 = vld [vmem:[%s7000_s5 + $0x280] sm:$0xff] }
 0x236   : > { %v937_v5 = vadd.f32 %v3800_v16, %v5047_v13  ;;  %v931_v47 = vpop.f32.mrb[15].mxu1  ;;  %4064 = vmatpush3.bf16.msra.mxu0 %v4061_v43  ;;  %4086 = vmatpush3.bf16.msra.mxu1 %v4061_v43  ;;  %v957_v13 = vld [vmem:[%s7000_s5 + $0x8] sm:$0xff]  ;;  %v968_v43 = vld [vmem:[%s7000_s5 + $0x60] sm:$0xff]  ;;  %v970_v16 = vld [vmem:[%s7000_s5 + $0x70] sm:$0xff] }
 0x237   : > { %v4065_v49 = vpack.c.bf16 %v953_v3, %v952_v12  ;;  %v932_v17 = vadd.f32 %v931_v47, %v5052_v15  ;;  %v958_v15 = vld [vmem:[%s7000_s5 + $0x10] sm:$0xff]  ;;  %v969_v3 = vld [vmem:[%s7000_s5 + $0x68] sm:$0xff]  ;;  %v971_v47 = vld [vmem:[%s7000_s5 + $0x78] sm:$0xff] }
 0x238   : > { %v955_v8 = vmax.f32 %v937_v5, 0.0  ;;  %v1037_v12 = vld [vmem:[%s7000_s5 + $0x288] sm:$0xff]  ;;  %v1038_v5 = vld [vmem:[%s7000_s5 + $0x290] sm:$0xff] }
 0x239   : > { %v954_v19 = vmax.f32 %v932_v17, 0.0  ;;  %4066 = vmatprep.subr.bf16.mxu0 %v4065_v49  ;;  %4079 = vmatprep.subr.bf16.mxu1 %v4065_v49  ;;  %v972_v17 = vld [vmem:[%s7000_s5 + $0x80] sm:$0xff] }
 0x23a   : > { %4068 = vmatpush3.bf16.msra.mxu0 %v4065_v49  ;;  %4087 = vmatpush3.bf16.msra.mxu1 %v4065_v49  ;;  %v1039_v49 = vld [vmem:[%s7000_s5 + $0x298] sm:$0xff] }
 0x23b   : > { %v4069_v9 = vpack.c.bf16 %v955_v8, %v954_v19  ;;  %v1040_v8 = vld [vmem:[%s7000_s5 + $0x2a0] sm:$0xff]  ;;  %v5432_v19 = vpop.permute.xlu0 %1364 }
 0x23c   : > { %7010 = vst [vmem:[#allocation9_spill] sm:$0xff] %v5432_v19 }
 0x23d   : > { %4070 = vmatprep.subr.bf16.mxu0 %v4069_v9  ;;  %4080 = vmatprep.subr.bf16.mxu1 %v4069_v9 }
 0x23e   : > { %4072 = vmatpush3.bf16.msra.mxu0 %v4069_v9  ;;  %4088 = vmatpush3.bf16.msra.mxu1 %v4069_v9  ;;  %v973_v9 = vld [vmem:[%s7000_s5 + $0x88] sm:$0xff] }
 0x241   : > { %3834 = vmatmul.mubr.f32.vlgmr.msra.gmra.mrb[8].mxu0 %v957_v13  ;;  %3936 = vmatmul.mubr.f32.vlgmr.msra.gmra.mrb[16].mxu1 %v1025_v26  ;;  %v1041_v13 = vld [vmem:[%s7000_s5 + $0x2a8] sm:$0xff]  ;;  %v974_v26 = vld [vmem:[%s7000_s5 + $0x90] sm:$0xff] }
 0x242   : > { %3836 = vmatprep.mubr.f32.mxu0 %v958_v15  ;;  %3938 = vmatprep.mubr.f32.mxu1 %v1026_v52  ;;  %v1042_v15 = vld [vmem:[%s7000_s5 + $0x2b0] sm:$0xff]  ;;  %v975_v52 = vld [vmem:[%s7000_s5 + $0x98] sm:$0xff] }
 0x245   : > { %3837 = vmatmul.mubr.f32.gmra.mrb[10].mxu0 %v959_v30  ;;  %3939 = vmatmul.mubr.f32.gmra.mrb[18].mxu1 %v1027_v34  ;;  %v1043_v30 = vld [vmem:[%s7000_s5 + $0x2b8] sm:$0xff]  ;;  %v5452_v34 = vpop.permute.xlu1 %1369 }
 0x246   : > { %3839 = vmatprep.mubr.f32.mxu0 %v960_v53  ;;  %3941 = vmatprep.mubr.f32.mxu1 %v1028_v35  ;;  %7011 = vst [vmem:[#allocation10_spill] sm:$0xff] %v5452_v34  ;;  %v5454_v53 = vpop.permute.xlu0 %1374  ;;  %v976_v35 = vld [vmem:[%s7000_s5 + $0xa0] sm:$0xff] }
 0x247   : > { %7012 = vst [vmem:[#allocation11_spill] sm:$0xff] %v5454_v53 }
 0x249   : > { %3840 = vmatmul.mubr.f32.gmra.mrb[12].mxu0 %v961_v36  ;;  %3942 = vmatmul.mubr.f32.gmra.mrb[20].mxu1 %v1029_v44  ;;  %v1044_v36 = vld [vmem:[%s7000_s5 + $0x2c0] sm:$0xff]  ;;  %v977_v44 = vld [vmem:[%s7000_s5 + $0xa8] sm:$0xff] }
 0x24a   : > { %3842 = vmatprep.mubr.f32.mxu0 %v962_v57  ;;  %3944 = vmatprep.mubr.f32.mxu1 %v1030_v27  ;;  %v1045_v57 = vld [vmem:[%s7000_s5 + $0x2c8] sm:$0xff]  ;;  %v978_v27 = vld [vmem:[%s7000_s5 + $0xb0] sm:$0xff] }
 0x24d   : > { %3843 = vmatmul.mubr.f32.gmra.mrb[14].mxu0 %v963_v22  ;;  %3945 = vmatmul.mubr.f32.gmra.mrb[22].mxu1 %v1031_v59  ;;  %v1046_v22 = vld [vmem:[%s7000_s5 + $0x2d0] sm:$0xff]  ;;  %v5474_v59 = vpop.permute.xlu1 %1379 }
 0x24e   : > { %3845 = vmatprep.mubr.f32.mxu0 %v964_v55  ;;  %3947 = vmatprep.mubr.f32.mxu1 %v1032_v56  ;;  %7013 = vst [vmem:[#allocation12_spill] sm:$0xff] %v5474_v59  ;;  %v5476_v55 = vpop.permute.xlu0 %1384  ;;  %v979_v56 = vld [vmem:[%s7000_s5 + $0xb8] sm:$0xff] }
 0x24f   : > { %7014 = vst [vmem:[#allocation13_spill] sm:$0xff] %v5476_v55 }
 0x251   : > { %3846 = vmatmul.mubr.f32.gmra.mrb[16].mxu0 %v965_v58  ;;  %3948 = vmatmul.mubr.f32.gmra.mrb[24].mxu1 %v1033_v62  ;;  %v1047_v58 = vld [vmem:[%s7000_s5 + $0x2d8] sm:$0xff]  ;;  %v980_v62 = vld [vmem:[%s7000_s5 + $0xc0] sm:$0xff] }
 0x252   : > { %3848 = vmatprep.mubr.f32.mxu0 %v966_v61  ;;  %3950 = vmatprep.mubr.f32.mxu1 %v1034_v4  ;;  %v1048_v61 = vld [vmem:[%s7000_s5 + $0x2e0] sm:$0xff]  ;;  %v981_v4 = vld [vmem:[%s7000_s5 + $0xc8] sm:$0xff] }
 0x255   : > { %3849 = vmatmul.mubr.f32.gmra.mrb[18].mxu0 %v967_v63  ;;  %3951 = vmatmul.mubr.f32.gmra.mrb[26].mxu1 %v1035_v42  ;;  %v1049_v63 = vld [vmem:[%s7000_s5 + $0x2e8] sm:$0xff]  ;;  %v5496_v42 = vpop.permute.xlu1 %1389 }
 0x256   : > { %3851 = vmatprep.mubr.f32.mxu0 %v968_v43  ;;  %3953 = vmatprep.mubr.f32.mxu1 %v1036_v6  ;;  %7015 = vst [vmem:[#allocation14_spill] sm:$0xff] %v5496_v42  ;;  %v5498_v43 = vpop.permute.xlu0 %1394  ;;  %v982_v6 = vld [vmem:[%s7000_s5 + $0xd0] sm:$0xff] }
 0x257   : > { %7016 = vst [vmem:[#allocation15_spill] sm:$0xff] %v5498_v43 }
 0x259   : > { %3852 = vmatmul.mubr.f32.gmra.mrb[20].mxu0 %v969_v3  ;;  %3954 = vmatmul.mubr.f32.gmra.mrb[28].mxu1 %v1037_v12  ;;  %v1050_v3 = vld [vmem:[%s7000_s5 + $0x2f0] sm:$0xff]  ;;  %v983_v12 = vld [vmem:[%s7000_s5 + $0xd8] sm:$0xff] }
 0x25a   : > { %3854 = vmatprep.mubr.f32.mxu0 %v970_v16  ;;  %3956 = vmatprep.mubr.f32.mxu1 %v1038_v5  ;;  %v1051_v16 = vld [vmem:[%s7000_s5 + $0x2f8] sm:$0xff]  ;;  %v984_v5 = vld [vmem:[%s7000_s5 + $0xe0] sm:$0xff] }
 0x25d   : > { %3855 = vmatmul.mubr.f32.gmra.mrb[22].mxu0 %v971_v47  ;;  %3957 = vmatmul.mubr.f32.gmra.mrb[30].mxu1 %v1039_v49  ;;  %v1052_v47 = vld [vmem:[%s7000_s5 + $0x300] sm:$0xff]  ;;  %v5518_v49 = vpop.permute.xlu1 %1399 }
 0x25e   : > { %3857 = vmatprep.mubr.f32.mxu0 %v972_v17  ;;  %3959 = vmatprep.mubr.f32.mxu1 %v1040_v8  ;;  %7017 = vst [vmem:[#allocation16_spill] sm:$0xff] %v5518_v49  ;;  %v5520_v17 = vpop.permute.xlu0 %1404  ;;  %v985_v8 = vld [vmem:[%s7000_s5 + $0xe8] sm:$0xff] }
 0x25f   : > { %7018 = vst [vmem:[#allocation17_spill] sm:$0xff] %v5520_v17  ;;  %v2689_v17 = vstv %s2686_s20 }
 0x261   : > { %3858 = vmatmul.mubr.f32.gmra.mrb[24].mxu0 %v973_v9  ;;  %3960 = vmatmul.mubr.f32.gmra.mrb[32].mxu1 %v1041_v13  ;;  %v1053_v9 = vld [vmem:[%s7000_s5 + $0x308] sm:$0xff]  ;;  %v986_v13 = vld [vmem:[%s7000_s5 + $0xf0] sm:$0xff] }
 0x262   : > { %3860 = vmatprep.mubr.f32.mxu0 %v974_v26  ;;  %3962 = vmatprep.mubr.f32.mxu1 %v1042_v15  ;;  %v1054_v26 = vld [vmem:[%s7000_s5 + $0x310] sm:$0xff]  ;;  %v987_v15 = vld [vmem:[%s7000_s5 + $0xf8] sm:$0xff] }
 0x265   : > { %3861 = vmatmul.mubr.f32.gmra.mrb[26].mxu0 %v975_v52  ;;  %3963 = vmatmul.mubr.f32.gmra.mrb[34].mxu1 %v1043_v30  ;;  %v1055_v52 = vld [vmem:[%s7000_s5 + $0x318] sm:$0xff]  ;;  %v5540_v30 = vpop.permute.xlu1 %1409 }
 0x266   : > { %3863 = vmatprep.mubr.f32.mxu0 %v976_v35  ;;  %3965 = vmatprep.mubr.f32.mxu1 %v1044_v36  ;;  %7019 = vst [vmem:[#allocation18_spill] sm:$0xff] %v5540_v30  ;;  %v5542_v35 = vpop.permute.xlu0 %1414  ;;  %v988_v36 = vld [vmem:[%s7000_s5 + $0x100] sm:$0xff] }
 0x267   : > { %7020 = vst [vmem:[#allocation19_spill] sm:$0xff] %v5542_v35 }
 0x269   : > { %3864 = vmatmul.mubr.f32.gmra.mrb[28].mxu0 %v977_v44  ;;  %3966 = vmatmul.mubr.f32.gmra.mrb[36].mxu1 %v1045_v57  ;;  %v1056_v44 = vld [vmem:[%s7000_s5 + $0x320] sm:$0xff]  ;;  %v989_v57 = vld [vmem:[%s7000_s5 + $0x108] sm:$0xff] }
 0x26a   : > { %3866 = vmatprep.mubr.f32.mxu0 %v978_v27  ;;  %3968 = vmatprep.mubr.f32.mxu1 %v1046_v22  ;;  %v1057_v27 = vld [vmem:[%s7000_s5 + $0x328] sm:$0xff]  ;;  %v990_v22 = vld [vmem:[%s7000_s5 + $0x110] sm:$0xff] }
 0x26d   : > { %3867 = vmatmul.mubr.f32.gmra.mrb[30].mxu0 %v979_v56  ;;  %3969 = vmatmul.mubr.f32.gmra.mrb[38].mxu1 %v1047_v58  ;;  %v1058_v56 = vld [vmem:[%s7000_s5 + $0x330] sm:$0xff]  ;;  %v5562_v58 = vpop.permute.xlu1 %1419 }
 0x26e   : > { %3869 = vmatprep.mubr.f32.mxu0 %v980_v62  ;;  %3971 = vmatprep.mubr.f32.mxu1 %v1048_v61  ;;  %7021 = vst [vmem:[#allocation20_spill] sm:$0xff] %v5562_v58  ;;  %v5564_v62 = vpop.permute.xlu0 %1424  ;;  %v991_v61 = vld [vmem:[%s7000_s5 + $0x118] sm:$0xff] }
 0x26f   : > { %7022 = vst [vmem:[#allocation21_spill] sm:$0xff] %v5564_v62  ;;  %v2687_v62 = vlaneseq }
 0x271   : > { %3870 = vmatmul.mubr.f32.gmra.mrb[32].mxu0 %v981_v4  ;;  %3972 = vmatmul.mubr.f32.gmra.mrb[40].mxu1 %v1049_v63  ;;  %v1059_v4 = vld [vmem:[%s7000_s5 + $0x338] sm:$0xff]  ;;  %v992_v63 = vld [vmem:[%s7000_s5 + $0x120] sm:$0xff]  ;;  %v2688_v30 = vand.u32 127, %v2687_v62 }
 0x272   : > { %3872 = vmatprep.mubr.f32.mxu0 %v982_v6  ;;  %3974 = vmatprep.mubr.f32.mxu1 %v1050_v3  ;;  %v1060_v6 = vld [vmem:[%s7000_s5 + $0x340] sm:$0xff]  ;;  %v993_v3 = vld [vmem:[%s7000_s5 + $0x128] sm:$0xff] }
 0x273   : > { %vm5831_vm4 = vcmp.lt.s32.totalorder %v2688_v30, %v2689_v17 }
 0x275   : > { %3873 = vmatmul.mubr.f32.gmra.mrb[34].mxu0 %v983_v12  ;;  %3975 = vmatmul.mubr.f32.gmra.mrb[42].mxu1 %v1051_v16  ;;  %v1061_v12 = vld [vmem:[%s7000_s5 + $0x348] sm:$0xff]  ;;  %v5584_v16 = vpop.permute.xlu1 %1429 }
 0x276   : > { %3875 = vmatprep.mubr.f32.mxu0 %v984_v5  ;;  %3977 = vmatprep.mubr.f32.mxu1 %v1052_v47  ;;  %7023 = vst [vmem:[#allocation22_spill] sm:$0xff] %v5584_v16  ;;  %v5586_v5 = vpop.permute.xlu0 %1434  ;;  %v994_v47 = vld [vmem:[%s7000_s5 + $0x130] sm:$0xff] }
 0x277   : > { %7024 = vst [vmem:[#allocation23_spill] sm:$0xff] %v5586_v5 }
 0x279   : > { %3876 = vmatmul.mubr.f32.gmra.mrb[36].mxu0 %v985_v8  ;;  %3978 = vmatmul.mubr.f32.gmra.mrb[44].mxu1 %v1053_v9  ;;  %v1062_v8 = vld [vmem:[%s7000_s5 + $0x350] sm:$0xff]  ;;  %v995_v9 = vld [vmem:[%s7000_s5 + $0x138] sm:$0xff] }
 0x27a   : > { %3878 = vmatprep.mubr.f32.mxu0 %v986_v13  ;;  %3980 = vmatprep.mubr.f32.mxu1 %v1054_v26  ;;  %v1063_v13 = vld [vmem:[%s7000_s5 + $0x358] sm:$0xff]  ;;  %v996_v26 = vld [vmem:[%s7000_s5 + $0x140] sm:$0xff] }
 0x27d   : > { %3879 = vmatmul.mubr.f32.gmra.mrb[38].mxu0 %v987_v15  ;;  %3981 = vmatmul.mubr.f32.gmra.mrb[46].mxu1 %v1055_v52  ;;  %v1064_v15 = vld [vmem:[%s7000_s5 + $0x360] sm:$0xff]  ;;  %v5606_v52 = vpop.permute.xlu1 %1439 }
 0x27e   : > { %3881 = vmatprep.mubr.f32.mxu0 %v988_v36  ;;  %3983 = vmatprep.mubr.f32.mxu1 %v1056_v44  ;;  %7025 = vst [vmem:[#allocation24_spill] sm:$0xff] %v5606_v52  ;;  %v5608_v36 = vpop.permute.xlu0 %1444  ;;  %v997_v44 = vld [vmem:[%s7000_s5 + $0x148] sm:$0xff] }
 0x27f   : > { %7026 = vst [vmem:[#allocation25_spill] sm:$0xff] %v5608_v36 }
 0x281   : > { %3882 = vmatmul.mubr.f32.gmra.mrb[40].mxu0 %v989_v57  ;;  %3984 = vmatmul.mubr.f32.gmra.mrb[48].mxu1 %v1057_v27  ;;  %v1065_v57 = vld [vmem:[%s7000_s5 + $0x368] sm:$0xff]  ;;  %v998_v27 = vld [vmem:[%s7000_s5 + $0x150] sm:$0xff] }
 0x282   : > { %3884 = vmatprep.mubr.f32.mxu0 %v990_v22  ;;  %3986 = vmatprep.mubr.f32.mxu1 %v1058_v56  ;;  %v1066_v22 = vld [vmem:[%s7000_s5 + $0x370] sm:$0xff]  ;;  %v999_v56 = vld [vmem:[%s7000_s5 + $0x158] sm:$0xff] }
 0x285   : > { %3885 = vmatmul.mubr.f32.gmra.mrb[42].mxu0 %v991_v61  ;;  %3987 = vmatmul.mubr.f32.gmra.mrb[50].mxu1 %v1059_v4  ;;  %v1067_v61 = vld [vmem:[%s7000_s5 + $0x378] sm:$0xff]  ;;  %v5628_v4 = vpop.permute.xlu1 %1449 }
 0x286   : > { %3887 = vmatprep.mubr.f32.mxu0 %v992_v63  ;;  %3989 = vmatprep.mubr.f32.mxu1 %v1060_v6  ;;  %7027 = vst [vmem:[#allocation26_spill] sm:$0xff] %v5628_v4  ;;  %v5630_v63 = vpop.permute.xlu0 %1454  ;;  %v1000_v6 = vld [vmem:[%s7000_s5 + $0x160] sm:$0xff] }
 0x287   : > { %7028 = vst [vmem:[#allocation27_spill] sm:$0xff] %v5630_v63 }
 0x289   : > { %3888 = vmatmul.mubr.f32.gmra.mrb[44].mxu0 %v993_v3  ;;  %3990 = vmatmul.mubr.f32.gmra.mrb[52].mxu1 %v1061_v12  ;;  %v1068_v3 = vld [vmem:[%s7000_s5 + $0x380] sm:$0xff]  ;;  %v1001_v12 = vld [vmem:[%s7000_s5 + $0x168] sm:$0xff] }
 0x28a   : > { %3890 = vmatprep.mubr.f32.mxu0 %v994_v47  ;;  %3992 = vmatprep.mubr.f32.mxu1 %v1062_v8  ;;  %v1069_v47 = vld [vmem:[%s7000_s5 + $0x388] sm:$0xff]  ;;  %v1002_v8 = vld [vmem:[%s7000_s5 + $0x170] sm:$0xff] }
 0x28d   : > { %3891 = vmatmul.mubr.f32.gmra.mrb[46].mxu0 %v995_v9  ;;  %3993 = vmatmul.mubr.f32.gmra.mrb[54].mxu1 %v1063_v13  ;;  %v1070_v9 = vld [vmem:[%s7000_s5 + $0x390] sm:$0xff]  ;;  %v5650_v13 = vpop.permute.xlu1 %1459 }
 0x28e   : > { %3893 = vmatprep.mubr.f32.mxu0 %v996_v26  ;;  %3995 = vmatprep.mubr.f32.mxu1 %v1064_v15  ;;  %7029 = vst [vmem:[#allocation28_spill] sm:$0xff] %v5650_v13  ;;  %v5652_v26 = vpop.permute.xlu0 %1464  ;;  %v1003_v15 = vld [vmem:[%s7000_s5 + $0x178] sm:$0xff] }
 0x28f   : > { %7030 = vst [vmem:[#allocation29_spill] sm:$0xff] %v5652_v26 }
 0x291   : > { %3894 = vmatmul.mubr.f32.gmra.mrb[48].mxu0 %v997_v44  ;;  %3996 = vmatmul.mubr.f32.gmra.mrb[56].mxu1 %v1065_v57  ;;  %v1071_v44 = vld [vmem:[%s7000_s5 + $0x398] sm:$0xff]  ;;  %v1004_v57 = vld [vmem:[%s7000_s5 + $0x180] sm:$0xff] }
 0x292   : > { %3896 = vmatprep.mubr.f32.mxu0 %v998_v27  ;;  %3998 = vmatprep.mubr.f32.mxu1 %v1066_v22  ;;  %v1072_v27 = vld [vmem:[%s7000_s5 + $0x3a0] sm:$0xff]  ;;  %v1005_v22 = vld [vmem:[%s7000_s5 + $0x188] sm:$0xff] }
 0x295   : > { %3897 = vmatmul.mubr.f32.gmra.mrb[50].mxu0 %v999_v56  ;;  %3999 = vmatmul.mubr.f32.gmra.mrb[58].mxu1 %v1067_v61  ;;  %v1073_v56 = vld [vmem:[%s7000_s5 + $0x3a8] sm:$0xff]  ;;  %v5672_v61 = vpop.permute.xlu1 %1469 }
 0x296   : > { %3899 = vmatprep.mubr.f32.mxu0 %v1000_v6  ;;  %4001 = vmatprep.mubr.f32.mxu1 %v1068_v3  ;;  %7031 = vst [vmem:[#allocation30_spill] sm:$0xff] %v5672_v61  ;;  %v5674_v6 = vpop.permute.xlu0 %1474  ;;  %v1006_v3 = vld [vmem:[%s7000_s5 + $0x190] sm:$0xff] }
 0x297   : > { %7032 = vst [vmem:[#allocation31_spill] sm:$0xff] %v5674_v6 }
 0x299   : > { %3900 = vmatmul.mubr.f32.gmra.mrb[52].mxu0 %v1001_v12  ;;  %4002 = vmatmul.mubr.f32.gmra.mrb[60].mxu1 %v1069_v47  ;;  %v1074_v12 = vld [vmem:[%s7000_s5 + $0x3b0] sm:$0xff]  ;;  %v1007_v47 = vld [vmem:[%s7000_s5 + $0x198] sm:$0xff] }
 0x29a   : > { %3902 = vmatprep.mubr.f32.mxu0 %v1002_v8  ;;  %4004 = vmatprep.mubr.f32.mxu1 %v1070_v9  ;;  %v1075_v8 = vld [vmem:[%s7000_s5 + $0x3b8] sm:$0xff]  ;;  %v1008_v9 = vld [vmem:[%s7000_s5 + $0x1a0] sm:$0xff] }
 0x29d   : > { %3903 = vmatmul.mubr.f32.gmra.mrb[54].mxu0 %v1003_v15  ;;  %4005 = vmatmul.mubr.f32.gmra.mrb[62].mxu1 %v1071_v44  ;;  %v1076_v15 = vld [vmem:[%s7000_s5 + $0x3c0] sm:$0xff]  ;;  %v5694_v44 = vpop.permute.xlu1 %1479 }
 0x29e   : > { %3905 = vmatprep.mubr.f32.mxu0 %v1004_v57  ;;  %4007 = vmatprep.mubr.f32.mxu1 %v1072_v27  ;;  %7033 = vst [vmem:[#allocation32_spill] sm:$0xff] %v5694_v44  ;;  %v5696_v57 = vpop.permute.xlu0 %1484  ;;  %v1009_v27 = vld [vmem:[%s7000_s5 + $0x1a8] sm:$0xff] }
 0x29f   : > { %7034 = vst [vmem:[#allocation33_spill] sm:$0xff] %v5696_v57 }
 0x2a1   : > { %3906 = vmatmul.mubr.f32.gmra.mrb[56].mxu0 %v1005_v22  ;;  %4008 = vmatmul.mubr.f32.gmra.mrb[64].mxu1 %v1073_v56  ;;  %v1077_v22 = vld [vmem:[%s7000_s5 + $0x3c8] sm:$0xff]  ;;  %v1010_v56 = vld [vmem:[%s7000_s5 + $0x1b0] sm:$0xff] }
 0x2a2   : > { %3908 = vmatprep.mubr.f32.mxu0 %v1006_v3  ;;  %4010 = vmatprep.mubr.f32.mxu1 %v1074_v12  ;;  %v1078_v3 = vld [vmem:[%s7000_s5 + $0x3d0] sm:$0xff]  ;;  %v1011_v12 = vld [vmem:[%s7000_s5 + $0x1b8] sm:$0xff] }
 0x2a5   : > { %3909 = vmatmul.mubr.f32.gmra.mrb[58].mxu0 %v1007_v47  ;;  %4011 = vmatmul.mubr.f32.gmra.mrb[66].mxu1 %v1075_v8  ;;  %v1079_v47 = vld [vmem:[%s7000_s5 + $0x3d8] sm:$0xff]  ;;  %v5716_v8 = vpop.permute.xlu1 %1489 }
 0x2a6   : > { %3911 = vmatprep.mubr.f32.mxu0 %v1008_v9  ;;  %4013 = vmatprep.mubr.f32.mxu1 %v1076_v15  ;;  %7035 = vst [vmem:[#allocation34_spill] sm:$0xff] %v5716_v8  ;;  %v5718_v9 = vpop.permute.xlu0 %1494  ;;  %v1012_v15 = vld [vmem:[%s7000_s5 + $0x1c0] sm:$0xff] }
 0x2a7   : > { %7036 = vst [vmem:[#allocation35_spill] sm:$0xff] %v5718_v9  ;;  %v1082_v9 = vld [vmem:[%s7000_s5 + $0x3f0] sm:$0xff]  ;;  %v1016_v8 = vld [vmem:[%s7000_s5 + $0x1e0] sm:$0xff] }
 0x2a9   : > { %3912 = vmatmul.mubr.f32.gmra.mrb[60].mxu0 %v1009_v27  ;;  %4014 = vmatmul.mubr.f32.gmra.mrb[68].mxu1 %v1077_v22  ;;  %v1080_v27 = vld [vmem:[%s7000_s5 + $0x3e0] sm:$0xff]  ;;  %v1013_v22 = vld [vmem:[%s7000_s5 + $0x1c8] sm:$0xff] }
 0x2aa   : > { %3914 = vmatprep.mubr.f32.mxu0 %v1010_v56  ;;  %4016 = vmatprep.mubr.f32.mxu1 %v1078_v3  ;;  %v1081_v56 = vld [vmem:[%s7000_s5 + $0x3e8] sm:$0xff]  ;;  %v1014_v3 = vld [vmem:[%s7000_s5 + $0x1d0] sm:$0xff] }
 0x2ad   : > { %3915 = vmatmul.mubr.f32.gmra.mrb[62].mxu0 %v1011_v12  ;;  %4017 = vmatmul.mubr.f32.gmra.mrb[70].mxu1 %v1079_v47  ;;  %v5738_v12 = vpop.permute.xlu1 %1499  ;;  %v5740_v47 = vpop.permute.xlu0 %1504 }
 0x2ae   : > { %3917 = vmatprep.mubr.f32.mxu0 %v1012_v15  ;;  %4019 = vmatprep.mubr.f32.mxu1 %v1080_v27  ;;  %7037 = vst [vmem:[#allocation36_spill] sm:$0xff] %v5738_v12  ;;  %7038 = vst [vmem:[#allocation37_spill] sm:$0xff] %v5740_v47  ;;  %v1015_v15 = vld [vmem:[%s7000_s5 + $0x1d8] sm:$0xff] }
 0x2af   : > { %v1083_v27 = vld [vmem:[%s7000_s5 + $0x3f8] sm:$0xff] }
 0x2b1   : > { %3918 = vmatmul.mubr.f32.gmra.mrb[64].mxu0 %v1013_v22  ;;  %4020 = vmatmul.mubr.f32.gmra.mrb[72].mxu1 %v1081_v56  ;;  %v1017_v22 = vld [vmem:[%s7000_s5 + $0x1e8] sm:$0xff]  ;;  %v5756_v56 = vpop.permute.xlu0 %1514 }
 0x2b2   : > { %3920 = vmatprep.mubr.f32.mxu0 %v1014_v3  ;;  %4022 = vmatprep.mubr.f32.mxu1 %v1082_v9  ;;  %v5754_v9 = vpop.permute.xlu1 %1509  ;;  %7040 = vst [vmem:[#allocation39_spill] sm:$0xff] %v5756_v56  ;;  %v1018_v3 = vld [vmem:[%s7000_s5 + $0x1f0] sm:$0xff] }
 0x2b3   : > { %7039 = vst [vmem:[#allocation38_spill] sm:$0xff] %v5754_v9  ;;  %v1021_v9 = vld [vmem:[%s7000_s5 + $0x208] sm:$0xff] }
 0x2b5   : > { %3921 = vmatmul.mubr.f32.gmra.mrb[66].mxu0 %v1015_v15  ;;  %4023 = vmatmul.mubr.f32.gmra.mrb[74].mxu1 %v1083_v27  ;;  %v1019_v15 = vld [vmem:[%s7000_s5 + $0x1f8] sm:$0xff]  ;;  %v5769_v47 = vpop.permute.xlu0 %1524 }
 0x2b6   : > { %3923 = vmatprep.mubr.f32.mxu0 %v1016_v8  ;;  %v1020_v8 = vld [vmem:[%s7000_s5 + $0x200] sm:$0xff]  ;;  %v5767_v27 = vpop.permute.xlu1 %1519  ;;  %7042 = vst [vmem:[#allocation41_spill] sm:$0xff] %v5769_v47 }
 0x2b7   : > { %7041 = vst [vmem:[#allocation40_spill] sm:$0xff] %v5767_v27 }
 0x2b9   : > { %3924 = vmatmul.mubr.f32.gmra.mrb[68].mxu0 %v1017_v22  ;;  %v1022_v22 = vld [vmem:[%s7000_s5 + $0x210] sm:$0xff]  ;;  %v5782_v27 = vpop.permute.xlu0 %1534 }
 0x2ba   : > { %3926 = vmatprep.mubr.f32.mxu0 %v1018_v3  ;;  %v1023_v3 = vld [vmem:[%s7000_s5 + $0x218] sm:$0xff]  ;;  %v5780_v56 = vpop.permute.xlu1 %1529  ;;  %7044 = vst [vmem:[#allocation43_spill] sm:$0xff] %v5782_v27 }
 0x2bb   : > { %7043 = vst [vmem:[#allocation42_spill] sm:$0xff] %v5780_v56 }
 0x2bd   : > { %3927 = vmatmul.mubr.f32.gmra.mrb[70].mxu0 %v1019_v15 }
 0x2be   : > { %3929 = vmatprep.mubr.f32.mxu0 %v1020_v8  ;;  %v5784_v15 = vpop.permute.xlu1 %1539  ;;  %v5786_v8 = vpop.permute.xlu0 %1544 }
 0x2bf   : > { %7045 = vst [vmem:[#allocation44_spill] sm:$0xff] %v5784_v15  ;;  %7046 = vst [vmem:[#allocation45_spill] sm:$0xff] %v5786_v8 }
 0x2c1   : > { %3930 = vmatmul.mubr.f32.gmra.mrb[72].mxu0 %v1021_v9 }
 0x2c2   : > { %3932 = vmatprep.mubr.f32.mxu0 %v1022_v22  ;;  %v5788_v47 = vpop.permute.xlu1 %1549  ;;  %v1555_v12 = vpop.permute.xlu0 %1554 }
 0x2c3   : > { %7047 = vst [vmem:[#allocation46_spill] sm:$0xff] %v5788_v47 }
 0x2c5   : > { %3933 = vmatmul.mubr.f32.gmra.mrb[74].mxu0 %v1023_v3 }
 0x2c6   : > { %v1560_v57 = vpop.permute.xlu1 %1559  ;;  %v1565_v44 = vpop.permute.xlu0 %1564 }
 0x2ca   : > { %v1570_v9 = vpop.permute.xlu1 %1569  ;;  %v5790_v22 = vpop.permute.xlu0 %1574 }
 0x2ce   : > { %v5792_v6 = vpop.permute.xlu1 %1579  ;;  %v5794_v61 = vpop.permute.xlu0 %1584 }
 0x2d2   : > { %v5796_v56 = vpop.permute.xlu1 %1589  ;;  %v5798_v3 = vpop.permute.xlu0 %1594 }
 0x2d6   : > { %v5800_v15 = vpop.permute.xlu1 %1599  ;;  %v5802_v8 = vpop.permute.xlu0 %1604 }
 0x2da   : > { %v5804_v47 = vpop.permute.xlu1 %1609  ;;  %v5806_v27 = vpop.permute.xlu0 %1614 }
 0x2de   : > { %v5808_v26 = vpop.permute.xlu1 %1619  ;;  %v5810_v13 = vpop.permute.xlu0 %1624 }
 0x2e2   : > { %v5812_v63 = vpop.permute.xlu1 %1629  ;;  %v5814_v4 = vpop.permute.xlu0 %1634 }
 0x2e6   : > { %v5816_v36 = vpop.permute.xlu1 %1639  ;;  %v5818_v52 = vpop.permute.xlu0 %1644 }
 0x2ea   : > { %v5820_v5 = vpop.permute.xlu1 %1649  ;;  %v5822_v16 = vpop.permute.xlu0 %1654 }
 0x2ee   : > { %v5825_v58 = vpop.permute.xlu1 %1659  ;;  %v5827_v35 = vpop.permute.xlu0 %1664 }
 0x2f2   : > { %v5835_v37 = vpop.permute.xlu1 %1669  ;;  %v5837_v60 = vpop.permute.xlu0 %1674 }
 0x314   : > { %v3835_v49 = vpop.f32.mrb[8].mxu0  ;;  %v3937_v43 = vpop.f32.mrb[16].mxu1 }
 0x315   : > { %v1924_v42 = vadd.f32 %v3835_v49, %v5061_v21  ;;  %v2264_v55 = vadd.f32 %v3937_v43, %v1560_v57  ;;  %v1918_v59 = vpop.f32.mrb[9].mxu0  ;;  %v2258_v53 = vpop.f32.mrb[17].mxu1 }
 0x316   : > { %v1919_v34 = vadd.f32 %v1918_v59, %v5064_v25  ;;  %v2259_v19 = vadd.f32 %v2258_v53, %v1555_v12 }
 0x317   : > { %v2558_v62 = vmax.f32 %v1924_v42, 0.0  ;;  %v2626_v1 = vmax.f32 %v2264_v55, 0.0 }
 0x318   : > { %v2557_v50 = vmax.f32 %v1919_v34, 0.0  ;;  %v3838_v54 = vpop.f32.mrb[10].mxu0  ;;  %v3940_v40 = vpop.f32.mrb[18].mxu1  ;;  %v2625_v21 = vmax.f32 %v2259_v19, 0.0 }
 0x319   : > { %v1934_v43 = vadd.f32 %v3838_v54, %v5077_v41  ;;  %v1928_v49 = vpop.f32.mrb[11].mxu0  ;;  %v2268_v57 = vpop.f32.mrb[19].mxu1  ;;  %v2760_v25 = vsel %vm5831_vm4, %v2626_v1, 0.0  ;;  %v2692_v53 = vsel %vm5831_vm4, %v2558_v62, 0.0  ;;  %v2274_v17 = vadd.f32 %v3940_v40, %v1570_v9 }
 0x31a   : > { %v2269_v59 = vadd.f32 %v2268_v57, %v1565_v44  ;;  %2957 = vmax.xlane.f32.xlu0 %v2760_v25  ;;  %2821 = vmax.xlane.f32.xlu1 %v2692_v53  ;;  %v2759_v41 = vsel %vm5831_vm4, %v2625_v21, 0.0  ;;  %v2691_v54 = vsel %vm5831_vm4, %v2557_v50, 0.0  ;;  %v5849_v44 = vpop.permute.xlu1 %1679  ;;  %v5851_v62 = vpop.permute.xlu0 %1684  ;;  %v1929_v9 = vadd.f32 %v1928_v49, %v5082_v46 }
 0x31b   : > { %v2560_v34 = vmax.f32 %v1934_v43, 0.0  ;;  %v2628_v40 = vmax.f32 %v2274_v17, 0.0 }
 0x31c   : > { %v3841_v42 = vpop.f32.mrb[12].mxu0  ;;  %v3943_v55 = vpop.f32.mrb[20].mxu1  ;;  %v2627_v30 = vmax.f32 %v2269_v59, 0.0 }
 0x31d   : > { %v1938_v12 = vpop.f32.mrb[13].mxu0  ;;  %v2278_v19 = vpop.f32.mrb[21].mxu1  ;;  %v1944_v17 = vadd.f32 %v3841_v42, %v5093_v0  ;;  %v2284_v0 = vadd.f32 %v3943_v55, %v5792_v6 }
 0x31e   : > { %v1939_v1 = vadd.f32 %v1938_v12, %v5096_v2  ;;  %2955 = vmax.xlane.f32.xlu1 %v2759_v41  ;;  %2819 = vmax.xlane.f32.xlu0 %v2691_v54  ;;  %v2279_v53 = vadd.f32 %v2278_v19, %v5790_v22  ;;  %v2761_v50 = vsel %vm5831_vm4, %v2627_v30, 0.0  ;;  %v2694_v2 = vsel %vm5831_vm4, %v2560_v34, 0.0  ;;  %v5867_v34 = vpop.permute.xlu1 %1689 }
 0x31f   : > { %v2559_v12 = vmax.f32 %v1929_v9, 0.0  ;;  %v2762_v30 = vsel %vm5831_vm4, %v2628_v40, 0.0  ;;  %7050 = vst [vmem:[#allocation47_spill] sm:$0xff] %v5867_v34  ;;  %v5869_v9 = vpop.permute.xlu0 %1694 }
 0x320   : > { %v3844_v43 = vpop.f32.mrb[14].mxu0  ;;  %v3946_v57 = vpop.f32.mrb[22].mxu1  ;;  %v2561_v25 = vmax.f32 %v1939_v1, 0.0  ;;  %v2629_v49 = vmax.f32 %v2279_v53, 0.0  ;;  %7051 = vst [vmem:[#allocation48_spill] sm:$0xff] %v5869_v9 }
 0x321   : > { %v1948_v21 = vpop.f32.mrb[15].mxu0  ;;  %v2288_v59 = vpop.f32.mrb[23].mxu1  ;;  %v1954_v6 = vadd.f32 %v3844_v43, %v5107_v11  ;;  %v2294_v43 = vadd.f32 %v3946_v57, %v5796_v56 }
 0x322   : > { %2959 = vmax.xlane.f32.xlu1 %v2761_v50  ;;  %2825 = vmax.xlane.f32.xlu0 %v2694_v2  ;;  %v1949_v54 = vadd.f32 %v1948_v21, %v5112_v14  ;;  %v2695_v1 = vsel %vm5831_vm4, %v2561_v25, 0.0  ;;  %v2693_v14 = vsel %vm5831_vm4, %v2559_v12, 0.0  ;;  %v2562_v21 = vmax.f32 %v1944_v17, 0.0 }
 0x323   : > { %v2289_v50 = vadd.f32 %v2288_v59, %v5794_v61  ;;  %v5895_v11 = vpop.permute.xlu0 %1704  ;;  %v2632_v56 = vmax.f32 %v2294_v43, 0.0 }
 0x324   : > { %v3847_v41 = vpop.f32.mrb[16].mxu0  ;;  %v5860_v46 = vpop.f32.mrb[24].mxu1  ;;  %v2563_v25 = vmax.f32 %v1949_v54, 0.0  ;;  %v2696_v59 = vsel %vm5831_vm4, %v2562_v21, 0.0  ;;  %7052 = vst [vmem:[#allocation49_spill] sm:$0xff] %v5895_v11 }
 0x325   : > { %v1958_v22 = vpop.f32.mrb[17].mxu0  ;;  %v2298_v19 = vpop.f32.mrb[25].mxu1  ;;  %v2631_v34 = vmax.f32 %v2289_v50, 0.0  ;;  %v1964_v57 = vadd.f32 %v3847_v41, %v5131_v24  ;;  %v2304_v43 = vadd.f32 %v5860_v46, %v5800_v15 }
 0x326   : > { %2827 = vmax.xlane.f32.xlu1 %v2695_v1  ;;  %2961 = vmax.xlane.f32.xlu0 %v2762_v30  ;;  %v2763_v1 = vsel %vm5831_vm4, %v2629_v49, 0.0  ;;  %v2630_v30 = vmax.f32 %v2284_v0, 0.0  ;;  %v1959_v12 = vadd.f32 %v1958_v22, %v5136_v28  ;;  %v2697_v61 = vsel %vm5831_vm4, %v2563_v25, 0.0  ;;  %v5893_v49 = vpop.permute.xlu1 %1699 }
 0x327   : > { %v2299_v50 = vadd.f32 %v2298_v19, %v5798_v3  ;;  %v5925_v41 = vpop.permute.xlu0 %1714  ;;  %v2634_v15 = vmax.f32 %v2304_v43, 0.0 }
 0x328   : > { %v5872_v42 = vpop.f32.mrb[18].mxu0  ;;  %v5874_v53 = vpop.f32.mrb[26].mxu1  ;;  %v2764_v22 = vsel %vm5831_vm4, %v2630_v30, 0.0  ;;  %v2565_v25 = vmax.f32 %v1959_v12, 0.0  ;;  %7053 = vst [vmem:[#allocation50_spill] sm:$0xff] %v5925_v41 }
 0x329   : > { %v1968_v40 = vpop.f32.mrb[19].mxu0  ;;  %v2308_v2 = vpop.f32.mrb[27].mxu1  ;;  %v2633_v30 = vmax.f32 %v2299_v50, 0.0  ;;  %v1974_v46 = vadd.f32 %v5872_v42, %v5155_v23 }
 0x32a   : > { %2963 = vmax.xlane.f32.xlu1 %v2763_v1  ;;  %2823 = vmax.xlane.f32.xlu0 %v2693_v14  ;;  %v2564_v14 = vmax.f32 %v1954_v6, 0.0  ;;  %v1969_v6 = vadd.f32 %v1968_v40, %v5161_v38  ;;  %v2699_v19 = vsel %vm5831_vm4, %v2565_v25, 0.0  ;;  %v5923_v24 = vpop.permute.xlu1 %1709  ;;  %v2566_v25 = vmax.f32 %v1964_v57, 0.0 }
 0x32b   : > { %v5959_v42 = vpop.permute.xlu0 %1724 }
 0x32c   : > { %v5882_v55 = vpop.f32.mrb[20].mxu0  ;;  %v5884_v9 = vpop.f32.mrb[28].mxu1  ;;  %v2567_v50 = vmax.f32 %v1969_v6, 0.0  ;;  %v2700_v43 = vsel %vm5831_vm4, %v2566_v25, 0.0  ;;  %7055 = vst [vmem:[#allocation52_spill] sm:$0xff] %v5959_v42 }
 0x32d   : > { %v1978_v17 = vpop.f32.mrb[21].mxu0  ;;  %v5887_v54 = vpop.f32.mrb[29].mxu1 }
 0x32e   : > { %2831 = vmax.xlane.f32.xlu1 %v2697_v61  ;;  %2829 = vmax.xlane.f32.xlu0 %v2696_v59  ;;  %v2765_v61 = vsel %vm5831_vm4, %v2631_v34, 0.0  ;;  %v2698_v34 = vsel %vm5831_vm4, %v2564_v14, 0.0  ;;  %v2309_v14 = vadd.f32 %v2308_v2, %v5802_v8  ;;  %v1979_v8 = vadd.f32 %v1978_v17, %v5186_v51  ;;  %v5957_v23 = vpop.permute.xlu1 %1719 }
 0x32f   : > { %7054 = vst [vmem:[#allocation51_spill] sm:$0xff] %v5957_v23  ;;  %v2319_v25 = vadd.f32 %v5887_v54, %v5806_v27 }
 0x330   : > { %v5898_v0 = vpop.f32.mrb[22].mxu0  ;;  %v5900_v28 = vpop.f32.mrb[30].mxu1  ;;  %v2635_v57 = vmax.f32 %v2309_v14, 0.0  ;;  %v2768_v14 = vsel %vm5831_vm4, %v2634_v15, 0.0 }
 0x331   : > { %v1988_v21 = vpop.f32.mrb[23].mxu0  ;;  %v5905_v1 = vpop.f32.mrb[31].mxu1 }
 0x332   : > { %2967 = vmax.xlane.f32.xlu1 %v2765_v61  ;;  %2965 = vmax.xlane.f32.xlu0 %v2764_v22  ;;  %v2766_v22 = vsel %vm5831_vm4, %v2632_v56, 0.0  ;;  %v2769_v42 = vsel %vm5831_vm4, %v2635_v57, 0.0  ;;  %v1989_v27 = vadd.f32 %v1988_v21, %v5211_v33 }
 0x334   : > { %v5910_v59 = vpop.f32.mrb[24].mxu0  ;;  %v5912_v11 = vpop.f32.mrb[32].mxu1 }
 0x335   : > { %v5915_v12 = vpop.f32.mrb[25].mxu0  ;;  %v5917_v3 = vpop.f32.mrb[33].mxu1 }
 0x336   : > { %2835 = vmax.xlane.f32.xlu1 %v2699_v19  ;;  %2833 = vmax.xlane.f32.xlu0 %v2698_v34  ;;  %v2767_v34 = vsel %vm5831_vm4, %v2633_v30, 0.0  ;;  %v2701_v30 = vsel %vm5831_vm4, %v2567_v50, 0.0  ;;  %v2568_v50 = vmax.f32 %v1974_v46, 0.0  ;;  %v2637_v46 = vmax.f32 %v2319_v25, 0.0 }
 0x337   : > { %v2571_v25 = vmax.f32 %v1989_v27, 0.0 }
 0x338   : > { %v5929_v38 = vpop.f32.mrb[26].mxu0  ;;  %v5931_v40 = vpop.f32.mrb[34].mxu1 }
 0x339   : > { %v5936_v61 = vpop.f32.mrb[27].mxu0  ;;  %v5938_v19 = vpop.f32.mrb[35].mxu1 }
 0x33a   : > { %2971 = vmax.xlane.f32.xlu1 %v2767_v34  ;;  %2969 = vmax.xlane.f32.xlu0 %v2766_v22  ;;  %v2314_v22 = vadd.f32 %v5874_v53, %v5804_v47  ;;  %v2569_v34 = vmax.f32 %v1979_v8, 0.0  ;;  %v1984_v53 = vadd.f32 %v5882_v55, %v5181_v48  ;;  %v5992_v48 = vpop.permute.xlu1 %1729  ;;  %v5994_v55 = vpop.permute.xlu0 %1734 }
 0x33b   : > { %7056 = vst [vmem:[#allocation53_spill] sm:$0xff] %v5992_v48  ;;  %7057 = vst [vmem:[#allocation54_spill] sm:$0xff] %v5994_v55  ;;  %v2771_v55 = vsel %vm5831_vm4, %v2637_v46, 0.0  ;;  %v2705_v46 = vsel %vm5831_vm4, %v2571_v25, 0.0 }
 0x33c   : > { %v5944_v41 = vpop.f32.mrb[28].mxu0  ;;  %v5946_v56 = vpop.f32.mrb[36].mxu1  ;;  %v2636_v47 = vmax.f32 %v2314_v22, 0.0  ;;  %v2703_v57 = vsel %vm5831_vm4, %v2569_v34, 0.0  ;;  %v2324_v22 = vadd.f32 %v5884_v9, %v5808_v26  ;;  %v2570_v34 = vmax.f32 %v1984_v53, 0.0 }
 0x33d   : > { %v5949_v2 = vpop.f32.mrb[29].mxu0  ;;  %v5951_v6 = vpop.f32.mrb[37].mxu1  ;;  %v1994_v9 = vadd.f32 %v5898_v0, %v5205_v32 }
 0x33e   : > { %2839 = vmax.xlane.f32.xlu1 %v2701_v30  ;;  %2837 = vmax.xlane.f32.xlu0 %v2700_v43  ;;  %v2638_v26 = vmax.f32 %v2324_v22, 0.0  ;;  %v6028_v32 = vpop.permute.xlu1 %1739  ;;  %v6030_v0 = vpop.permute.xlu0 %1744  ;;  %v2334_v22 = vadd.f32 %v5900_v28, %v5812_v63  ;;  %v2004_v28 = vadd.f32 %v5910_v59, %v5231_v10 }
 0x33f   : > { %7058 = vst [vmem:[#allocation55_spill] sm:$0xff] %v6028_v32  ;;  %7059 = vst [vmem:[#allocation56_spill] sm:$0xff] %v6030_v0  ;;  %v2572_v25 = vmax.f32 %v1994_v9, 0.0 }
 0x340   : > { %v5963_v51 = vpop.f32.mrb[30].mxu0  ;;  %v5965_v17 = vpop.f32.mrb[38].mxu1  ;;  %v2640_v63 = vmax.f32 %v2334_v22, 0.0  ;;  %v2344_v22 = vadd.f32 %v5912_v11, %v5816_v36  ;;  %v2014_v11 = vadd.f32 %v5929_v38, %v5245_v18 }
 0x341   : > { %v5971_v30 = vpop.f32.mrb[31].mxu0  ;;  %v5973_v43 = vpop.f32.mrb[39].mxu1 }
 0x342   : > { %2975 = vmax.xlane.f32.xlu1 %v2769_v42  ;;  %2973 = vmax.xlane.f32.xlu0 %v2768_v14  ;;  %v2702_v42 = vsel %vm5831_vm4, %v2568_v50, 0.0  ;;  %v2770_v14 = vsel %vm5831_vm4, %v2636_v47, 0.0  ;;  %v2329_v50 = vadd.f32 %v5905_v1, %v5810_v13  ;;  %v1999_v13 = vadd.f32 %v5915_v12, %v5233_v39  ;;  %v6064_v10 = vpop.permute.xlu1 %1749  ;;  %v6066_v59 = vpop.permute.xlu0 %1754 }
 0x343   : > { %7060 = vst [vmem:[#allocation57_spill] sm:$0xff] %v6064_v10  ;;  %7061 = vst [vmem:[#allocation58_spill] sm:$0xff] %v6066_v59  ;;  %v2642_v36 = vmax.f32 %v2344_v22, 0.0  ;;  %v2354_v22 = vadd.f32 %v5931_v40, %v5820_v5  ;;  %v2024_v40 = vadd.f32 %v5944_v41, %v5258_v31 }
 0x344   : > { %v5979_v23 = vpop.f32.mrb[32].mxu0  ;;  %v5981_v15 = vpop.f32.mrb[40].mxu1  ;;  %v2639_v53 = vmax.f32 %v2329_v50, 0.0  ;;  %v2573_v50 = vmax.f32 %v1999_v13, 0.0 }
 0x345   : > { %v5984_v54 = vpop.f32.mrb[33].mxu0  ;;  %v5986_v8 = vpop.f32.mrb[41].mxu1  ;;  %v2644_v5 = vmax.f32 %v2354_v22, 0.0  ;;  %v2578_v22 = vmax.f32 %v2024_v40, 0.0 }
 0x346   : > { %2843 = vmax.xlane.f32.xlu1 %v2703_v57  ;;  %2841 = vmax.xlane.f32.xlu0 %v2702_v42  ;;  %v2773_v0 = vsel %vm5831_vm4, %v2639_v53, 0.0  ;;  %v2707_v53 = vsel %vm5831_vm4, %v2573_v50, 0.0  ;;  %v2574_v50 = vmax.f32 %v2004_v28, 0.0  ;;  %v6100_v18 = vpop.permute.xlu1 %1759  ;;  %v6102_v38 = vpop.permute.xlu0 %1764 }
 0x347   : > { %7062 = vst [vmem:[#allocation59_spill] sm:$0xff] %v6100_v18  ;;  %7063 = vst [vmem:[#allocation60_spill] sm:$0xff] %v6102_v38 }
 0x348   : > { %v5998_v33 = vpop.f32.mrb[34].mxu0  ;;  %v6000_v21 = vpop.f32.mrb[42].mxu1 }
 0x349   : > { %v6006_v57 = vpop.f32.mrb[35].mxu0  ;;  %v6008_v42 = vpop.f32.mrb[43].mxu1 }
 0x34a   : > { %2979 = vmax.xlane.f32.xlu1 %v2771_v55  ;;  %2977 = vmax.xlane.f32.xlu0 %v2770_v14  ;;  %v2704_v55 = vsel %vm5831_vm4, %v2570_v34, 0.0  ;;  %v2772_v14 = vsel %vm5831_vm4, %v2638_v26, 0.0  ;;  %v2339_v34 = vadd.f32 %v5917_v3, %v5814_v4  ;;  %v2009_v4 = vadd.f32 %v5936_v61, %v5250_v20  ;;  %v1770_v31 = vpop.permute.xlu1 %1769  ;;  %v6136_v41 = vpop.permute.xlu0 %1774 }
 0x34b   : > { %7065 = vst [vmem:[#allocation62_spill] sm:$0xff] %v6136_v41 }
 0x34c   : > { %v6014_v48 = vpop.f32.mrb[36].mxu0  ;;  %v6016_v47 = vpop.f32.mrb[44].mxu1  ;;  %v2641_v9 = vmax.f32 %v2339_v34, 0.0  ;;  %v2575_v34 = vmax.f32 %v2009_v4, 0.0 }
 0x34d   : > { %v6020_v1 = vpop.f32.mrb[37].mxu0  ;;  %v6022_v27 = vpop.f32.mrb[45].mxu1 }
 0x34e   : > { %2847 = vmax.xlane.f32.xlu1 %v2705_v46  ;;  %2845 = vmax.xlane.f32.xlu0 %v2704_v55  ;;  %v2775_v59 = vsel %vm5831_vm4, %v2641_v9, 0.0  ;;  %v2709_v9 = vsel %vm5831_vm4, %v2575_v34, 0.0  ;;  %v2576_v34 = vmax.f32 %v2014_v11, 0.0 }
 0x350   : > { %v6034_v39 = vpop.f32.mrb[38].mxu0  ;;  %v6036_v12 = vpop.f32.mrb[46].mxu1 }
 0x351   : > { %v6042_v46 = vpop.f32.mrb[39].mxu0  ;;  %v6044_v55 = vpop.f32.mrb[47].mxu1 }
 0x352   : > { %2983 = vmax.xlane.f32.xlu1 %v2773_v0  ;;  %2981 = vmax.xlane.f32.xlu0 %v2772_v14  ;;  %v2706_v0 = vsel %vm5831_vm4, %v2572_v25, 0.0  ;;  %v2774_v14 = vsel %vm5831_vm4, %v2640_v63, 0.0  ;;  %v2349_v25 = vadd.f32 %v5938_v19, %v5818_v52  ;;  %v2019_v52 = vadd.f32 %v5949_v2, %v5260_v29 }
 0x354   : > { %v6050_v32 = vpop.f32.mrb[40].mxu0  ;;  %v6052_v26 = vpop.f32.mrb[48].mxu1  ;;  %v2643_v28 = vmax.f32 %v2349_v25, 0.0  ;;  %v2577_v25 = vmax.f32 %v2019_v52, 0.0 }
 0x355   : > { %v6056_v3 = vpop.f32.mrb[41].mxu0  ;;  %v6058_v13 = vpop.f32.mrb[49].mxu1 }
 0x356   : > { %2851 = vmax.xlane.f32.xlu1 %v2707_v53  ;;  %2849 = vmax.xlane.f32.xlu0 %v2706_v0  ;;  %v2777_v38 = vsel %vm5831_vm4, %v2643_v28, 0.0  ;;  %v2711_v28 = vsel %vm5831_vm4, %v2577_v25, 0.0  ;;  %v2369_v25 = vadd.f32 %v5973_v43, %v5827_v35  ;;  %v7069_v43 = vld [vmem:[#allocation4_spill] sm:$0xff] }
 0x358   : > { %v6070_v20 = vpop.f32.mrb[42].mxu0  ;;  %v6072_v61 = vpop.f32.mrb[50].mxu1  ;;  %v2647_v35 = vmax.f32 %v2369_v25, 0.0 }
 0x359   : > { %v6078_v53 = vpop.f32.mrb[43].mxu0  ;;  %v6080_v0 = vpop.f32.mrb[51].mxu1 }
 0x35a   : > { %2987 = vmax.xlane.f32.xlu1 %v2775_v59  ;;  %2985 = vmax.xlane.f32.xlu0 %v2774_v14  ;;  %v2708_v59 = vsel %vm5831_vm4, %v2574_v50, 0.0  ;;  %v2776_v14 = vsel %vm5831_vm4, %v2642_v36, 0.0  ;;  %v2359_v50 = vadd.f32 %v5951_v6, %v5822_v16  ;;  %v2029_v16 = vadd.f32 %v5971_v30, %v5276_v45 }
 0x35c   : > { %v6086_v10 = vpop.f32.mrb[44].mxu0  ;;  %v6088_v63 = vpop.f32.mrb[52].mxu1  ;;  %v2645_v11 = vmax.f32 %v2359_v50, 0.0  ;;  %v2778_v50 = vsel %vm5831_vm4, %v2644_v5, 0.0 }
 0x35d   : > { %v6092_v19 = vpop.f32.mrb[45].mxu0  ;;  %v6094_v4 = vpop.f32.mrb[53].mxu1 }
 0x35e   : > { %2855 = vmax.xlane.f32.xlu1 %v2709_v9  ;;  %2853 = vmax.xlane.f32.xlu0 %v2708_v59  ;;  %v2779_v40 = vsel %vm5831_vm4, %v2645_v11, 0.0 }
 0x360   : > { %v6106_v29 = vpop.f32.mrb[46].mxu0  ;;  %v6108_v2 = vpop.f32.mrb[54].mxu1 }
 0x361   : > { %v6114_v9 = vpop.f32.mrb[47].mxu0  ;;  %v6116_v59 = vpop.f32.mrb[55].mxu1 }
 0x362   : > { %2991 = vmax.xlane.f32.xlu1 %v2777_v38  ;;  %2989 = vmax.xlane.f32.xlu0 %v2776_v14  ;;  %v2710_v38 = vsel %vm5831_vm4, %v2576_v34, 0.0  ;;  %v2364_v14 = vadd.f32 %v5946_v56, %v5825_v58  ;;  %v7067_v56 = vld [vmem:[#allocation2_spill] sm:$0xff] }
 0x363   : > { %v2034_v41 = vadd.f32 %v5963_v51, %v7067_v56  ;;  %v1785_v51 = vpop.permute.xlu0 %1784 }
 0x364   : > { %v6122_v18 = vpop.f32.mrb[48].mxu0  ;;  %v6124_v36 = vpop.f32.mrb[56].mxu1  ;;  %v2646_v58 = vmax.f32 %v2364_v14, 0.0  ;;  %v2712_v14 = vsel %vm5831_vm4, %v2578_v22, 0.0 }
 0x365   : > { %7064 = vst [vmem:[#allocation61_spill] sm:$0xff] %v6124_v36  ;;  %v6128_v6 = vpop.f32.mrb[49].mxu0  ;;  %v6130_v52 = vpop.f32.mrb[57].mxu1  ;;  %v2579_v36 = vmax.f32 %v2029_v16, 0.0  ;;  %v2580_v56 = vmax.f32 %v2034_v41, 0.0 }
 0x366   : > { %2859 = vmax.xlane.f32.xlu1 %v2711_v28  ;;  %2857 = vmax.xlane.f32.xlu0 %v2710_v38 }
 0x367   : > { %v2713_v11 = vsel %vm5831_vm4, %v2579_v36, 0.0  ;;  %v2379_v36 = vadd.f32 %v5986_v8, %v5837_v60  ;;  %v7074_v8 = vld [vmem:[#allocation6_spill] sm:$0xff] }
 0x368   : > { %v6140_v45 = vpop.f32.mrb[50].mxu0  ;;  %v4000_v30 = vpop.f32.mrb[58].mxu1 }
 0x369   : > { %v6146_v34 = vadd.f32 %v4000_v30, %v1770_v31  ;;  %v6148_v28 = vpop.f32.mrb[51].mxu0  ;;  %v6150_v38 = vpop.f32.mrb[59].mxu1  ;;  %v2039_v31 = vadd.f32 %v5984_v54, %v7069_v43  ;;  %v2780_v54 = vsel %vm5831_vm4, %v2646_v58, 0.0  ;;  %v2649_v60 = vmax.f32 %v2379_v36, 0.0 }
 0x36a   : > { %2995 = vmax.xlane.f32.xlu1 %v2779_v40  ;;  %2993 = vmax.xlane.f32.xlu0 %v2778_v50  ;;  %v2374_v50 = vadd.f32 %v5965_v17, %v5835_v37  ;;  %v6186_v37 = vpop.permute.xlu1 %1779 }
 0x36b   : > { %7066 = vst [vmem:[#allocation63_spill] sm:$0xff] %v6146_v34  ;;  %v2581_v43 = vmax.f32 %v2039_v31, 0.0 }
 0x36c   : > { %v6156_v5 = vpop.f32.mrb[52].mxu0  ;;  %v6158_v16 = vpop.f32.mrb[60].mxu1  ;;  %v2648_v17 = vmax.f32 %v2374_v50, 0.0  ;;  %v2714_v50 = vsel %vm5831_vm4, %v2580_v56, 0.0 }
 0x36d   : > { %7068 = vst [vmem:[#allocation2_spill] sm:$0xff] %v6158_v16  ;;  %v6162_v30 = vpop.f32.mrb[53].mxu0  ;;  %v6164_v34 = vpop.f32.mrb[61].mxu1 }
 0x36e   : > { %2863 = vmax.xlane.f32.xlu1 %v2713_v11  ;;  %2861 = vmax.xlane.f32.xlu0 %v2712_v14  ;;  %v2781_v11 = vsel %vm5831_vm4, %v2647_v35, 0.0 }
 0x370   : > { %v6172_v25 = vpop.f32.mrb[54].mxu0  ;;  %v6174_v40 = vpop.f32.mrb[62].mxu1 }
 0x371   : > { %7070 = vst [vmem:[#allocation4_spill] sm:$0xff] %v6172_v25  ;;  %7071 = vst [vmem:[#allocation64_spill] sm:$0xff] %v6174_v40  ;;  %v6180_v16 = vpop.f32.mrb[55].mxu0  ;;  %v2488_v22 = vpop.f32.mrb[63].mxu1  ;;  %v7073_v40 = vld [vmem:[#allocation3_spill] sm:$0xff]  ;;  %v2049_v25 = vadd.f32 %v6006_v57, %v7074_v8  ;;  %v2782_v57 = vsel %vm5831_vm4, %v2648_v17, 0.0 }
 0x372   : > { %7072 = vst [vmem:[#allocation65_spill] sm:$0xff] %v6180_v16  ;;  %v6184_v14 = vadd.f32 %v2488_v22, %v1785_v51  ;;  %2999 = vmax.xlane.f32.xlu1 %v2781_v11  ;;  %2997 = vmax.xlane.f32.xlu0 %v2780_v54  ;;  %v2044_v41 = vadd.f32 %v5979_v23, %v7073_v40  ;;  %v2715_v51 = vsel %vm5831_vm4, %v2581_v43, 0.0  ;;  %v2783_v8 = vsel %vm5831_vm4, %v2649_v60, 0.0 }
 0x373   : > { %v2384_v23 = vadd.f32 %v5981_v15, %v5849_v44  ;;  %v2583_v22 = vmax.f32 %v2049_v25, 0.0  ;;  %v2389_v43 = vadd.f32 %v6008_v42, %v5851_v62  ;;  %v6220_v44 = vpop.permute.xlu1 %1789  ;;  %v7080_v42 = vld [vmem:[#allocation8_spill] sm:$0xff] }
 0x374   : > { %v6190_v58 = vpop.f32.mrb[56].mxu0  ;;  %v6192_v31 = vpop.f32.mrb[64].mxu1  ;;  %v2582_v36 = vmax.f32 %v2044_v41, 0.0 }
 0x375   : > { %v6196_v16 = vpop.f32.mrb[57].mxu0  ;;  %v6198_v35 = vpop.f32.mrb[65].mxu1  ;;  %v2650_v15 = vmax.f32 %v2384_v23, 0.0  ;;  %v2651_v62 = vmax.f32 %v2389_v43, 0.0  ;;  %v2717_v60 = vsel %vm5831_vm4, %v2583_v22, 0.0 }
 0x376   : > { %2867 = vmax.xlane.f32.xlu1 %v2715_v51  ;;  %2865 = vmax.xlane.f32.xlu0 %v2714_v50  ;;  %v7077_v51 = vld [vmem:[#allocation5_spill] sm:$0xff]  ;;  %v2059_v50 = vadd.f32 %v6020_v1, %v7080_v42  ;;  %v2716_v23 = vsel %vm5831_vm4, %v2582_v36, 0.0 }
 0x377   : > { %v2054_v17 = vadd.f32 %v5998_v33, %v7077_v51  ;;  %v7081_v33 = vld [vmem:[#allocation47_spill] sm:$0xff]  ;;  %v2784_v1 = vsel %vm5831_vm4, %v2650_v15, 0.0 }
 0x378   : > { %v6206_v40 = vpop.f32.mrb[58].mxu0  ;;  %v6208_v54 = vpop.f32.mrb[66].mxu1  ;;  %v2585_v42 = vmax.f32 %v2059_v50, 0.0  ;;  %v7086_v15 = vld [vmem:[#allocation7_spill] sm:$0xff] }
 0x379   : > { %7075 = vst [vmem:[#allocation3_spill] sm:$0xff] %v6206_v40  ;;  %7076 = vst [vmem:[#allocation6_spill] sm:$0xff] %v6208_v54  ;;  %v6214_v11 = vpop.f32.mrb[59].mxu0  ;;  %v6216_v56 = vpop.f32.mrb[67].mxu1  ;;  %v2584_v51 = vmax.f32 %v2054_v17, 0.0  ;;  %v2064_v17 = vadd.f32 %v6014_v48, %v7086_v15  ;;  %v2404_v48 = vadd.f32 %v6016_v47, %v5893_v49 }
 0x37a   : > { %3003 = vmax.xlane.f32.xlu1 %v2783_v8  ;;  %3001 = vmax.xlane.f32.xlu0 %v2782_v57  ;;  %v2394_v57 = vadd.f32 %v6000_v21, %v7081_v33  ;;  %v6254_v21 = vpop.permute.xlu1 %1799 }
 0x37c   : > { %v6224_v41 = vpop.f32.mrb[60].mxu0  ;;  %v6226_v25 = vpop.f32.mrb[68].mxu1  ;;  %v2652_v33 = vmax.f32 %v2394_v57, 0.0  ;;  %v2718_v57 = vsel %vm5831_vm4, %v2584_v51, 0.0 }
 0x37d   : > { %7078 = vst [vmem:[#allocation5_spill] sm:$0xff] %v6224_v41  ;;  %7079 = vst [vmem:[#allocation66_spill] sm:$0xff] %v6226_v25  ;;  %v6230_v54 = vpop.f32.mrb[61].mxu0  ;;  %v6232_v40 = vpop.f32.mrb[69].mxu1  ;;  %v7084_v25 = vld [vmem:[#allocation48_spill] sm:$0xff] }
 0x37e   : > { %2871 = vmax.xlane.f32.xlu1 %v2717_v60  ;;  %2869 = vmax.xlane.f32.xlu0 %v2716_v23  ;;  %v2399_v22 = vadd.f32 %v6022_v27, %v7084_v25  ;;  %v2785_v60 = vsel %vm5831_vm4, %v2651_v62, 0.0  ;;  %v6256_v23 = vpop.permute.xlu0 %1794  ;;  %v6290_v49 = vpop.permute.xlu1 %1809 }
 0x380   : > { %v6240_v8 = vpop.f32.mrb[62].mxu0  ;;  %v6242_v43 = vpop.f32.mrb[70].mxu1  ;;  %v2653_v25 = vmax.f32 %v2399_v22, 0.0 }
 0x381   : > { %7082 = vst [vmem:[#allocation8_spill] sm:$0xff] %v6240_v8  ;;  %7083 = vst [vmem:[#allocation47_spill] sm:$0xff] %v6242_v43  ;;  %v6248_v41 = vpop.f32.mrb[63].mxu0  ;;  %v6250_v36 = vpop.f32.mrb[71].mxu1  ;;  %v7089_v43 = vld [vmem:[#allocation9_spill] sm:$0xff] }
 0x382   : > { %7085 = vst [vmem:[#allocation48_spill] sm:$0xff] %v6250_v36  ;;  %3007 = vmax.xlane.f32.xlu1 %v2785_v60  ;;  %3005 = vmax.xlane.f32.xlu0 %v2784_v1  ;;  %v2069_v8 = vadd.f32 %v6042_v46, %v7089_v43  ;;  %v2719_v1 = vsel %vm5831_vm4, %v2585_v42, 0.0  ;;  %v2786_v46 = vsel %vm5831_vm4, %v2652_v33, 0.0  ;;  %v2586_v43 = vmax.f32 %v2064_v17, 0.0  ;;  %v6292_v47 = vpop.permute.xlu0 %1804  ;;  %v7094_v33 = vld [vmem:[#allocation10_spill] sm:$0xff] }
 0x384   : > { %v6260_v50 = vpop.f32.mrb[64].mxu0  ;;  %v6262_v27 = vpop.f32.mrb[72].mxu1  ;;  %v2587_v15 = vmax.f32 %v2069_v8, 0.0  ;;  %v2074_v8 = vadd.f32 %v6034_v39, %v7094_v33  ;;  %v2414_v39 = vadd.f32 %v6036_v12, %v5923_v24  ;;  %v7099_v12 = vld [vmem:[#allocation12_spill] sm:$0xff] }
 0x385   : > { %7087 = vst [vmem:[#allocation7_spill] sm:$0xff] %v6260_v50  ;;  %7088 = vst [vmem:[#allocation67_spill] sm:$0xff] %v6262_v27  ;;  %v6266_v36 = vpop.f32.mrb[65].mxu0  ;;  %v6268_v62 = vpop.f32.mrb[73].mxu1  ;;  %v7092_v27 = vld [vmem:[#allocation49_spill] sm:$0xff] }
 0x386   : > { %2875 = vmax.xlane.f32.xlu1 %v2719_v1  ;;  %2873 = vmax.xlane.f32.xlu0 %v2718_v57  ;;  %v2409_v42 = vadd.f32 %v6044_v55, %v7092_v27  ;;  %v2787_v1 = vsel %vm5831_vm4, %v2653_v25, 0.0  ;;  %v2654_v57 = vmax.f32 %v2404_v48, 0.0  ;;  %v7096_v27 = vld [vmem:[#allocation11_spill] sm:$0xff]  ;;  %v2721_v25 = vsel %vm5831_vm4, %v2587_v15, 0.0  ;;  %v6306_v48 = vpop.permute.xlu1 %1819  ;;  %v7098_v15 = vld [vmem:[#allocation50_spill] sm:$0xff] }
 0x387   : > { %v2588_v33 = vmax.f32 %v2074_v8, 0.0  ;;  %v2656_v24 = vmax.f32 %v2414_v39, 0.0 }
 0x388   : > { %v6276_v60 = vpop.f32.mrb[66].mxu0  ;;  %v6278_v22 = vpop.f32.mrb[74].mxu1  ;;  %v2655_v55 = vmax.f32 %v2409_v42, 0.0 }
 0x389   : > { %7090 = vst [vmem:[#allocation9_spill] sm:$0xff] %v6276_v60  ;;  %7091 = vst [vmem:[#allocation68_spill] sm:$0xff] %v6278_v22  ;;  %v6284_v50 = vpop.f32.mrb[67].mxu0  ;;  %v6286_v51 = vpop.f32.mrb[75].mxu1  ;;  %v2079_v22 = vadd.f32 %v6056_v3, %v7096_v27  ;;  %v2788_v3 = vsel %vm5831_vm4, %v2654_v57, 0.0  ;;  %v7101_v60 = vld [vmem:[#allocation13_spill] sm:$0xff] }
 0x38a   : > { %7093 = vst [vmem:[#allocation49_spill] sm:$0xff] %v6286_v51  ;;  %3011 = vmax.xlane.f32.xlu1 %v2787_v1  ;;  %3009 = vmax.xlane.f32.xlu0 %v2786_v46  ;;  %v2720_v46 = vsel %vm5831_vm4, %v2586_v43, 0.0  ;;  %v6314_v42 = vpop.permute.xlu0 %1814  ;;  %v6334_v39 = vpop.permute.xlu1 %1829 }
 0x38b   : > { %v2589_v27 = vmax.f32 %v2079_v22, 0.0  ;;  %v2089_v22 = vadd.f32 %v6078_v53, %v7101_v60  ;;  %v2790_v53 = vsel %vm5831_vm4, %v2656_v24, 0.0 }
 0x38c   : > { %v6296_v17 = vpop.f32.mrb[68].mxu0 }
 0x38d   : > { %7095 = vst [vmem:[#allocation10_spill] sm:$0xff] %v6296_v17  ;;  %v6300_v51 = vpop.f32.mrb[69].mxu0  ;;  %v2419_v17 = vadd.f32 %v6058_v13, %v7098_v15  ;;  %v2723_v13 = vsel %vm5831_vm4, %v2589_v27, 0.0  ;;  %v7104_v27 = vld [vmem:[#allocation52_spill] sm:$0xff] }
 0x38e   : > { %2879 = vmax.xlane.f32.xlu1 %v2721_v25  ;;  %2877 = vmax.xlane.f32.xlu0 %v2720_v46  ;;  %v2789_v25 = vsel %vm5831_vm4, %v2655_v55, 0.0  ;;  %v2084_v46 = vadd.f32 %v6050_v32, %v7099_v12  ;;  %v2722_v55 = vsel %vm5831_vm4, %v2588_v33, 0.0  ;;  %v7102_v32 = vld [vmem:[#allocation51_spill] sm:$0xff]  ;;  %v2429_v12 = vadd.f32 %v6080_v0, %v7104_v27 }
 0x38f   : > { %v2657_v57 = vmax.f32 %v2419_v17, 0.0  ;;  %v2424_v17 = vadd.f32 %v6052_v26, %v7102_v32  ;;  %v6352_v32 = vpop.permute.xlu1 %1839 }
 0x390   : > { %v6310_v1 = vpop.f32.mrb[70].mxu0  ;;  %v2590_v60 = vmax.f32 %v2084_v46, 0.0  ;;  %v2659_v24 = vmax.f32 %v2429_v12, 0.0  ;;  %v7106_v46 = vld [vmem:[#allocation15_spill] sm:$0xff]  ;;  %v7108_v12 = vld [vmem:[#allocation54_spill] sm:$0xff] }
 0x391   : > { %7097 = vst [vmem:[#allocation11_spill] sm:$0xff] %v6310_v1  ;;  %v6318_v43 = vpop.f32.mrb[71].mxu0 }
 0x392   : > { %3015 = vmax.xlane.f32.xlu1 %v2789_v25  ;;  %3013 = vmax.xlane.f32.xlu0 %v2788_v3  ;;  %v6336_v3 = vpop.permute.xlu0 %1824  ;;  %v2591_v25 = vmax.f32 %v2089_v22, 0.0  ;;  %v2099_v22 = vadd.f32 %v6092_v19, %v7106_v46  ;;  %v2439_v19 = vadd.f32 %v6094_v4, %v7108_v12  ;;  %v7110_v46 = vld [vmem:[#allocation16_spill] sm:$0xff] }
 0x394   : > { %v6324_v1 = vpop.f32.mrb[72].mxu0  ;;  %v2725_v0 = vsel %vm5831_vm4, %v2591_v25, 0.0  ;;  %v2593_v27 = vmax.f32 %v2099_v22, 0.0  ;;  %v2793_v25 = vsel %vm5831_vm4, %v2659_v24, 0.0  ;;  %v3144_v22 = vld [vmem:[%s4253_s13 + $0x228] sm:$0xff] }
 0x395   : > { %7100 = vst [vmem:[#allocation50_spill] sm:$0xff] %v6324_v1  ;;  %v6328_v8 = vpop.f32.mrb[73].mxu0  ;;  %v7105_v1 = vld [vmem:[#allocation14_spill] sm:$0xff] }
 0x396   : > { %2883 = vmax.xlane.f32.xlu1 %v2723_v13  ;;  %2881 = vmax.xlane.f32.xlu0 %v2722_v55  ;;  %v2791_v13 = vsel %vm5831_vm4, %v2657_v57, 0.0  ;;  %v2658_v55 = vmax.f32 %v2424_v17, 0.0  ;;  %v2094_v26 = vadd.f32 %v6070_v20, %v7105_v1  ;;  %v2724_v57 = vsel %vm5831_vm4, %v2590_v60, 0.0  ;;  %v7107_v17 = vld [vmem:[#allocation53_spill] sm:$0xff]  ;;  %v6370_v60 = vpop.permute.xlu1 %1849 }
 0x397   : > { %7109 = vst [vmem:[#allocation13_spill] sm:$0xff] %v6370_v60  ;;  %v2727_v4 = vsel %vm5831_vm4, %v2593_v27, 0.0  ;;  %v3075_v60 = vld [vmem:[%s4253_s13] sm:$0xff] }
 0x398   : > { %v6340_v15 = vpop.f32.mrb[74].mxu0  ;;  %v2792_v20 = vsel %vm5831_vm4, %v2658_v55, 0.0  ;;  %v2592_v1 = vmax.f32 %v2094_v26, 0.0  ;;  %v2661_v55 = vmax.f32 %v2439_v19, 0.0 }
 0x399   : > { %7103 = vst [vmem:[#allocation12_spill] sm:$0xff] %v6340_v15  ;;  %v6346_v33 = vpop.f32.mrb[75].mxu0  ;;  %v6354_v15 = vpop.permute.xlu0 %1834 }
 0x39a   : > { %3019 = vmax.xlane.f32.xlu1 %v2791_v13  ;;  %3017 = vmax.xlane.f32.xlu0 %v2790_v53  ;;  %v2434_v53 = vadd.f32 %v6072_v61, %v7107_v17  ;;  %v2726_v24 = vsel %vm5831_vm4, %v2592_v1, 0.0  ;;  %v3076_v17 = vld [vmem:[%s4253_s13 + $0x8] sm:$0xff] }
 0x39c   : > { %v2660_v61 = vmax.f32 %v2434_v53, 0.0 }
 0x39d   : > { %v6372_v13 = vpop.permute.xlu0 %1844 }
 0x39e   : > { %2887 = vmax.xlane.f32.xlu1 %v2725_v0  ;;  %2885 = vmax.xlane.f32.xlu0 %v2724_v57  ;;  %v2104_v0 = vadd.f32 %v6086_v10, %v7110_v46  ;;  %v7111_v57 = vld [vmem:[#allocation17_spill] sm:$0xff]  ;;  %v2794_v27 = vsel %vm5831_vm4, %v2660_v61, 0.0  ;;  %v7113_v46 = vld [vmem:[#allocation56_spill] sm:$0xff] }
 0x39f   : > { %v2109_v26 = vadd.f32 %v6114_v9, %v7111_v57  ;;  %v2449_v57 = vadd.f32 %v6116_v59, %v7113_v46 }
 0x3a0   : > { %v2594_v1 = vmax.f32 %v2104_v0, 0.0 }
 0x3a2   : > { %3023 = vmax.xlane.f32.xlu1 %v2793_v25  ;;  %3021 = vmax.xlane.f32.xlu0 %v2792_v20  ;;  %v7112_v20 = vld [vmem:[#allocation55_spill] sm:$0xff]  ;;  %v2595_v25 = vmax.f32 %v2109_v26, 0.0  ;;  %v7114_v26 = vld [vmem:[#allocation18_spill] sm:$0xff] }
 0x3a3   : > { %v2444_v9 = vadd.f32 %v6088_v63, %v7112_v20  ;;  %v2114_v59 = vadd.f32 %v6106_v29, %v7114_v26  ;;  %v3079_v26 = vld [vmem:[%s4253_s13 + $0x20] sm:$0xff] }
 0x3a4   : > { %v2729_v20 = vsel %vm5831_vm4, %v2595_v25, 0.0 }
 0x3a5   : > { %v2662_v0 = vmax.f32 %v2444_v9, 0.0 }
 0x3a6   : > { %2891 = vmax.xlane.f32.xlu1 %v2727_v4  ;;  %2889 = vmax.xlane.f32.xlu0 %v2726_v24  ;;  %v2795_v4 = vsel %vm5831_vm4, %v2661_v55, 0.0  ;;  %v3143_v24 = vld [vmem:[%s4253_s13 + $0x220] sm:$0xff] }
 0x3a7   : > { %v2958_v10 = vpop.xlane.xlu0 %2957  ;;  %v2822_v53 = vpop.xlane.xlu1 %2821 }
 0x3a8   : > { %v3272_v12 = vmax.f32 %v3144_v22, %v2958_v10  ;;  %v3204_v19 = vmax.f32 %v3076_v17, %v2822_v53  ;;  %v2663_v17 = vmax.f32 %v2449_v57, 0.0  ;;  %v7115_v10 = vld [vmem:[#allocation19_spill] sm:$0xff]  ;;  %v2596_v57 = vmax.f32 %v2114_v59, 0.0 }
 0x3a9   : > { %v2119_v53 = vadd.f32 %v6128_v6, %v7115_v10 }
 0x3aa   : > { %3401 = vst.msk [vmem:[%s4253_s13 + $0x228] sm:$0xff] %vm3331_vm5, %v3272_v12  ;;  %3333 = vst.msk [vmem:[%s4253_s13 + $0x8] sm:$0xff] %vm3331_vm5, %v3204_v19  ;;  %3027 = vmax.xlane.f32.xlu1 %v2795_v4  ;;  %3025 = vmax.xlane.f32.xlu0 %v2794_v27  ;;  %v2728_v12 = vsel %vm5831_vm4, %v2594_v1, 0.0  ;;  %v3145_v19 = vld [vmem:[%s4253_s13 + $0x230] sm:$0xff]  ;;  %v3078_v27 = vld [vmem:[%s4253_s13 + $0x18] sm:$0xff]  ;;  %v2796_v1 = vsel %vm5831_vm4, %v2662_v0, 0.0 }
 0x3ab   : > { %v2956_v63 = vpop.xlane.xlu1 %2955  ;;  %v2820_v61 = vpop.xlane.xlu0 %2819  ;;  %v2597_v4 = vmax.f32 %v2119_v53, 0.0 }
 0x3ac   : > { %v3271_v22 = vmax.f32 %v3143_v24, %v2956_v63  ;;  %v3203_v55 = vmax.f32 %v3075_v60, %v2820_v61  ;;  %v7116_v60 = vld [vmem:[#allocation57_spill] sm:$0xff]  ;;  %v7117_v24 = vld [vmem:[#allocation58_spill] sm:$0xff]  ;;  %v2797_v61 = vsel %vm5831_vm4, %v2663_v17, 0.0 }
 0x3ad   : > { %v2454_v9 = vadd.f32 %v6108_v2, %v7116_v60  ;;  %v2459_v63 = vadd.f32 %v6130_v52, %v7117_v24  ;;  %v7120_v60 = vld [vmem:[#allocation59_spill] sm:$0xff] }
 0x3ae   : > { %3400 = vst.msk [vmem:[%s4253_s13 + $0x220] sm:$0xff] %vm3331_vm5, %v3271_v22  ;;  %3332 = vst.msk [vmem:[%s4253_s13] sm:$0xff] %vm3331_vm5, %v3203_v55  ;;  %2895 = vmax.xlane.f32.xlu1 %v2729_v20  ;;  %2893 = vmax.xlane.f32.xlu0 %v2728_v12  ;;  %v3146_v22 = vld [vmem:[%s4253_s13 + $0x238] sm:$0xff]  ;;  %v7118_v55 = vld [vmem:[#allocation20_spill] sm:$0xff] }
 0x3af   : > { %v2960_v29 = vpop.xlane.xlu1 %2959  ;;  %v2826_v6 = vpop.xlane.xlu0 %2825  ;;  %v2664_v59 = vmax.f32 %v2454_v9, 0.0  ;;  %v2124_v52 = vadd.f32 %v6122_v18, %v7118_v55  ;;  %v2665_v53 = vmax.f32 %v2459_v63, 0.0  ;;  %v7119_v20 = vld [vmem:[#allocation21_spill] sm:$0xff]  ;;  %v7122_v63 = vld [vmem:[#allocation60_spill] sm:$0xff] }
 0x3b0   : > { %v3273_v25 = vmax.f32 %v3145_v19, %v2960_v29  ;;  %v3206_v46 = vmax.f32 %v3078_v27, %v2826_v6  ;;  %v2129_v12 = vadd.f32 %v6148_v28, %v7119_v20  ;;  %v2731_v19 = vsel %vm5831_vm4, %v2597_v4, 0.0  ;;  %v3147_v29 = vld [vmem:[%s4253_s13 + $0x240] sm:$0xff]  ;;  %v3077_v6 = vld [vmem:[%s4253_s13 + $0x10] sm:$0xff]  ;;  %v7121_v9 = vld [vmem:[#allocation61_spill] sm:$0xff] }
 0x3b1   : > { %v2730_v27 = vsel %vm5831_vm4, %v2596_v57, 0.0  ;;  %v2798_v57 = vsel %vm5831_vm4, %v2664_v59, 0.0  ;;  %v2598_v4 = vmax.f32 %v2124_v52, 0.0  ;;  %v7123_v52 = vld [vmem:[#allocation22_spill] sm:$0xff]  ;;  %v7124_v20 = vld [vmem:[#allocation23_spill] sm:$0xff] }
 0x3b2   : > { %3402 = vst.msk [vmem:[%s4253_s13 + $0x230] sm:$0xff] %vm3331_vm5, %v3273_v25  ;;  %3335 = vst.msk [vmem:[%s4253_s13 + $0x18] sm:$0xff] %vm3331_vm5, %v3206_v46  ;;  %3031 = vmax.xlane.f32.xlu1 %v2797_v61  ;;  %3029 = vmax.xlane.f32.xlu0 %v2796_v1  ;;  %v2464_v25 = vadd.f32 %v7121_v9, %v7120_v60  ;;  %v2599_v24 = vmax.f32 %v2129_v12, 0.0  ;;  %v2469_v61 = vadd.f32 %v6150_v38, %v7122_v63 }
 0x3b3   : > { %v2828_v2 = vpop.xlane.xlu1 %2827  ;;  %v2962_v0 = vpop.xlane.xlu0 %2961  ;;  %v2134_v38 = vadd.f32 %v6140_v45, %v7123_v52  ;;  %v2139_v12 = vadd.f32 %v6162_v30, %v7124_v20  ;;  %v7128_v52 = vld [vmem:[#allocation25_spill] sm:$0xff]  ;;  %v3151_v20 = vld [vmem:[%s4253_s13 + $0x260] sm:$0xff] }
 0x3b4   : > { %v3207_v10 = vmax.f32 %v3079_v26, %v2828_v2  ;;  %v3274_v17 = vmax.f32 %v3146_v22, %v2962_v0  ;;  %v2799_v26 = vsel %vm5831_vm4, %v2665_v53, 0.0  ;;  %v3081_v22 = vld [vmem:[%s4253_s13 + $0x30] sm:$0xff]  ;;  %v3080_v2 = vld [vmem:[%s4253_s13 + $0x28] sm:$0xff]  ;;  %v2666_v55 = vmax.f32 %v2464_v25, 0.0 }
 0x3b5   : > { %v2667_v53 = vmax.f32 %v2469_v61, 0.0  ;;  %v2600_v9 = vmax.f32 %v2134_v38, 0.0  ;;  %v2601_v25 = vmax.f32 %v2139_v12, 0.0  ;;  %v7129_v38 = vld [vmem:[#allocation65_spill] sm:$0xff] }
 0x3b6   : > { %3336 = vst.msk [vmem:[%s4253_s13 + $0x20] sm:$0xff] %vm3331_vm5, %v3207_v10  ;;  %3403 = vst.msk [vmem:[%s4253_s13 + $0x238] sm:$0xff] %vm3331_vm5, %v3274_v17  ;;  %2899 = vmax.xlane.f32.xlu1 %v2731_v19  ;;  %2897 = vmax.xlane.f32.xlu0 %v2730_v27  ;;  %v2733_v19 = vsel %vm5831_vm4, %v2599_v24, 0.0  ;;  %v2732_v27 = vsel %vm5831_vm4, %v2598_v4, 0.0  ;;  %v2800_v60 = vsel %vm5831_vm4, %v2666_v55, 0.0  ;;  %v3083_v4 = vld [vmem:[%s4253_s13 + $0x40] sm:$0xff] }
 0x3b7   : > { %v2964_v18 = vpop.xlane.xlu1 %2963  ;;  %v2824_v28 = vpop.xlane.xlu0 %2823  ;;  %v3082_v24 = vld [vmem:[%s4253_s13 + $0x38] sm:$0xff] }
 0x3b8   : > { %v3275_v46 = vmax.f32 %v3147_v29, %v2964_v18  ;;  %v3205_v1 = vmax.f32 %v3077_v6, %v2824_v28  ;;  %v3149_v29 = vld [vmem:[%s4253_s13 + $0x250] sm:$0xff]  ;;  %v3148_v6 = vld [vmem:[%s4253_s13 + $0x248] sm:$0xff]  ;;  %v3150_v12 = vld [vmem:[%s4253_s13 + $0x258] sm:$0xff] }
 0x3ba   : > { %3404 = vst.msk [vmem:[%s4253_s13 + $0x240] sm:$0xff] %vm3331_vm5, %v3275_v46  ;;  %3334 = vst.msk [vmem:[%s4253_s13 + $0x10] sm:$0xff] %vm3331_vm5, %v3205_v1  ;;  %3035 = vmax.xlane.f32.xlu1 %v2799_v26  ;;  %3033 = vmax.xlane.f32.xlu0 %v2798_v57  ;;  %v7125_v46 = vld [vmem:[#allocation62_spill] sm:$0xff]  ;;  %v2801_v57 = vsel %vm5831_vm4, %v2667_v53, 0.0  ;;  %v7126_v26 = vld [vmem:[#allocation63_spill] sm:$0xff]  ;;  %v2734_v53 = vsel %vm5831_vm4, %v2600_v9, 0.0 }
 0x3bb   : > { %v2832_v0 = vpop.xlane.xlu1 %2831  ;;  %v2830_v59 = vpop.xlane.xlu0 %2829  ;;  %v2479_v1 = vadd.f32 %v6164_v34, %v7125_v46  ;;  %v7127_v34 = vld [vmem:[#allocation24_spill] sm:$0xff] }
 0x3bc   : > { %v3209_v10 = vmax.f32 %v3081_v22, %v2832_v0  ;;  %v3208_v17 = vmax.f32 %v3080_v2, %v2830_v59  ;;  %v2668_v22 = vmax.f32 %v7126_v26, 0.0  ;;  %v2144_v2 = vadd.f32 %v6156_v5, %v7127_v34  ;;  %v3085_v9 = vld [vmem:[%s4253_s13 + $0x50] sm:$0xff] }
 0x3bd   : > { %v2669_v55 = vmax.f32 %v2479_v1, 0.0  ;;  %v2671_v26 = vmax.f32 %v6184_v14, 0.0 }
 0x3be   : > { %3338 = vst.msk [vmem:[%s4253_s13 + $0x30] sm:$0xff] %vm3331_vm5, %v3209_v10  ;;  %3337 = vst.msk [vmem:[%s4253_s13 + $0x28] sm:$0xff] %vm3331_vm5, %v3208_v17  ;;  %2903 = vmax.xlane.f32.xlu1 %v2733_v19  ;;  %2901 = vmax.xlane.f32.xlu0 %v2732_v27  ;;  %v2149_v10 = vadd.f32 %v7129_v38, %v7128_v52  ;;  %v2735_v17 = vsel %vm5831_vm4, %v2601_v25, 0.0  ;;  %v7130_v27 = vld [vmem:[#allocation2_spill] sm:$0xff]  ;;  %v3084_v25 = vld [vmem:[%s4253_s13 + $0x48] sm:$0xff] }
 0x3bf   : > { %v2968_v45 = vpop.xlane.xlu1 %2967  ;;  %v2966_v30 = vpop.xlane.xlu0 %2965  ;;  %v7134_v52 = vld [vmem:[#allocation64_spill] sm:$0xff] }
 0x3c0   : > { %v3277_v18 = vmax.f32 %v3149_v29, %v2968_v45  ;;  %v3276_v28 = vmax.f32 %v3148_v6, %v2966_v30  ;;  %v2484_v29 = vadd.f32 %v7130_v27, %v6186_v37  ;;  %v2602_v30 = vmax.f32 %v2144_v2, 0.0  ;;  %v3087_v27 = vld [vmem:[%s4253_s13 + $0x60] sm:$0xff] }
 0x3c1   : > { %v2494_v38 = vadd.f32 %v7134_v52, %v6220_v44 }
 0x3c2   : > { %3406 = vst.msk [vmem:[%s4253_s13 + $0x250] sm:$0xff] %vm3331_vm5, %v3277_v18  ;;  %3405 = vst.msk [vmem:[%s4253_s13 + $0x248] sm:$0xff] %vm3331_vm5, %v3276_v28  ;;  %3039 = vmax.xlane.f32.xlu1 %v2801_v57  ;;  %3037 = vmax.xlane.f32.xlu0 %v2800_v60  ;;  %v2603_v18 = vmax.f32 %v2149_v10, 0.0  ;;  %v2803_v28 = vsel %vm5831_vm4, %v2669_v55, 0.0  ;;  %v2802_v60 = vsel %vm5831_vm4, %v2668_v22, 0.0  ;;  %v2670_v1 = vmax.f32 %v2484_v29, 0.0 }
 0x3c3   : > { %v2836_v63 = vpop.xlane.xlu1 %2835  ;;  %v2834_v61 = vpop.xlane.xlu0 %2833  ;;  %v7131_v57 = vld [vmem:[#allocation26_spill] sm:$0xff]  ;;  %v7133_v22 = vld [vmem:[#allocation27_spill] sm:$0xff]  ;;  %v3086_v29 = vld [vmem:[%s4253_s13 + $0x58] sm:$0xff] }
 0x3c4   : > { %v3211_v0 = vmax.f32 %v3083_v4, %v2836_v63  ;;  %v3210_v59 = vmax.f32 %v3082_v24, %v2834_v61  ;;  %v7132_v4 = vld [vmem:[#allocation4_spill] sm:$0xff]  ;;  %v2159_v34 = vadd.f32 %v6196_v16, %v7133_v22  ;;  %v2737_v2 = vsel %vm5831_vm4, %v2603_v18, 0.0  ;;  %v3152_v55 = vld [vmem:[%s4253_s13 + $0x268] sm:$0xff] }
 0x3c5   : > { %v2154_v24 = vadd.f32 %v7132_v4, %v7131_v57  ;;  %v2504_v57 = vadd.f32 %v6192_v31, %v6254_v21  ;;  %v2509_v22 = vadd.f32 %v6216_v56, %v6292_v47  ;;  %v7138_v56 = vld [vmem:[#allocation3_spill] sm:$0xff] }
 0x3c6   : > { %3340 = vst.msk [vmem:[%s4253_s13 + $0x40] sm:$0xff] %vm3331_vm5, %v3211_v0  ;;  %3339 = vst.msk [vmem:[%s4253_s13 + $0x38] sm:$0xff] %vm3331_vm5, %v3210_v59  ;;  %2907 = vmax.xlane.f32.xlu1 %v2735_v17  ;;  %2905 = vmax.xlane.f32.xlu0 %v2734_v53  ;;  %v2736_v0 = vsel %vm5831_vm4, %v2602_v30, 0.0  ;;  %v3153_v59 = vld [vmem:[%s4253_s13 + $0x270] sm:$0xff]  ;;  %v2804_v53 = vsel %vm5831_vm4, %v2670_v1, 0.0  ;;  %v3154_v1 = vld [vmem:[%s4253_s13 + $0x278] sm:$0xff] }
 0x3c7   : > { %v2972_v5 = vpop.xlane.xlu1 %2971  ;;  %v2970_v19 = vpop.xlane.xlu0 %2969  ;;  %v7135_v30 = vld [vmem:[#allocation28_spill] sm:$0xff]  ;;  %v2675_v52 = vmax.f32 %v2509_v22, 0.0 }
 0x3c8   : > { %v3279_v6 = vmax.f32 %v3151_v20, %v2972_v5  ;;  %v3278_v45 = vmax.f32 %v3150_v12, %v2970_v19  ;;  %v2604_v20 = vmax.f32 %v2154_v24, 0.0  ;;  %v2605_v12 = vmax.f32 %v2159_v34, 0.0 }
 0x3c9   : > { %v2499_v5 = vadd.f32 %v6198_v35, %v6256_v23  ;;  %v2805_v19 = vsel %vm5831_vm4, %v2671_v26, 0.0  ;;  %v2164_v35 = vadd.f32 %v6190_v58, %v7135_v30 }
 0x3ca   : > { %3408 = vst.msk [vmem:[%s4253_s13 + $0x260] sm:$0xff] %vm3331_vm5, %v3279_v6  ;;  %3407 = vst.msk [vmem:[%s4253_s13 + $0x258] sm:$0xff] %vm3331_vm5, %v3278_v45  ;;  %3043 = vmax.xlane.f32.xlu1 %v2803_v28  ;;  %3041 = vmax.xlane.f32.xlu0 %v2802_v60  ;;  %v2672_v45 = vmax.f32 %v2494_v38, 0.0  ;;  %v7136_v60 = vld [vmem:[#allocation29_spill] sm:$0xff]  ;;  %v7139_v38 = vld [vmem:[#allocation31_spill] sm:$0xff] }
 0x3cb   : > { %v2840_v37 = vpop.xlane.xlu1 %2839  ;;  %v2838_v46 = vpop.xlane.xlu0 %2837  ;;  %v2673_v28 = vmax.f32 %v2499_v5, 0.0 }
 0x3cc   : > { %v3213_v63 = vmax.f32 %v3085_v9, %v2840_v37  ;;  %v3212_v61 = vmax.f32 %v3084_v25, %v2838_v46  ;;  %v2169_v9 = vadd.f32 %v6214_v11, %v7136_v60  ;;  %v2739_v25 = vsel %vm5831_vm4, %v2605_v12, 0.0  ;;  %v3155_v46 = vld [vmem:[%s4253_s13 + $0x280] sm:$0xff]  ;;  %v3156_v12 = vld [vmem:[%s4253_s13 + $0x288] sm:$0xff] }
 0x3cd   : > { %v2738_v37 = vsel %vm5831_vm4, %v2604_v20, 0.0  ;;  %v2807_v34 = vsel %vm5831_vm4, %v2673_v28, 0.0  ;;  %v3157_v20 = vld [vmem:[%s4253_s13 + $0x290] sm:$0xff]  ;;  %v3090_v28 = vld [vmem:[%s4253_s13 + $0x78] sm:$0xff] }
 0x3ce   : > { %3342 = vst.msk [vmem:[%s4253_s13 + $0x50] sm:$0xff] %vm3331_vm5, %v3213_v63  ;;  %3341 = vst.msk [vmem:[%s4253_s13 + $0x48] sm:$0xff] %vm3331_vm5, %v3212_v61  ;;  %2911 = vmax.xlane.f32.xlu1 %v2737_v2  ;;  %2909 = vmax.xlane.f32.xlu0 %v2736_v0  ;;  %v2806_v63 = vsel %vm5831_vm4, %v2672_v45, 0.0  ;;  %v2606_v61 = vmax.f32 %v2164_v35, 0.0  ;;  %v2607_v26 = vmax.f32 %v2169_v9, 0.0  ;;  %v3089_v2 = vld [vmem:[%s4253_s13 + $0x70] sm:$0xff]  ;;  %v2519_v35 = vadd.f32 %v6232_v40, %v6314_v42 }
 0x3cf   : > { %v2976_v14 = vpop.xlane.xlu1 %2975  ;;  %v2974_v16 = vpop.xlane.xlu0 %2973  ;;  %v3088_v0 = vld [vmem:[%s4253_s13 + $0x68] sm:$0xff]  ;;  %v7142_v40 = vld [vmem:[#allocation5_spill] sm:$0xff] }
 0x3d0   : > { %v3281_v10 = vmax.f32 %v3153_v59, %v2976_v14  ;;  %v3280_v17 = vmax.f32 %v3152_v55, %v2974_v16  ;;  %v2674_v59 = vmax.f32 %v2504_v57, 0.0  ;;  %v7137_v55 = vld [vmem:[#allocation30_spill] sm:$0xff] }
 0x3d1   : > { %v2174_v47 = vadd.f32 %v7138_v56, %v7137_v55 }
 0x3d2   : > { %3410 = vst.msk [vmem:[%s4253_s13 + $0x270] sm:$0xff] %vm3331_vm5, %v3281_v10  ;;  %3409 = vst.msk [vmem:[%s4253_s13 + $0x268] sm:$0xff] %vm3331_vm5, %v3280_v17  ;;  %3047 = vmax.xlane.f32.xlu1 %v2805_v19  ;;  %3045 = vmax.xlane.f32.xlu0 %v2804_v53  ;;  %v2179_v10 = vadd.f32 %v6230_v54, %v7139_v38  ;;  %v2741_v17 = vsel %vm5831_vm4, %v2607_v26, 0.0  ;;  %v2740_v53 = vsel %vm5831_vm4, %v2606_v61, 0.0  ;;  %v7140_v19 = vld [vmem:[#allocation6_spill] sm:$0xff] }
 0x3d3   : > { %v2844_v44 = vpop.xlane.xlu1 %2843  ;;  %v2842_v6 = vpop.xlane.xlu0 %2841  ;;  %v2608_v45 = vmax.f32 %v2174_v47, 0.0  ;;  %v7144_v26 = vld [vmem:[#allocation66_spill] sm:$0xff]  ;;  %v3093_v47 = vld [vmem:[%s4253_s13 + $0x90] sm:$0xff] }
 0x3d4   : > { %v3215_v23 = vmax.f32 %v3087_v27, %v2844_v44  ;;  %v3214_v18 = vmax.f32 %v3086_v29, %v2842_v6  ;;  %v2514_v27 = vadd.f32 %v7140_v19, %v6290_v49  ;;  %v2808_v6 = vsel %vm5831_vm4, %v2674_v59, 0.0  ;;  %v7145_v59 = vld [vmem:[#allocation48_spill] sm:$0xff]  ;;  %v7146_v38 = vld [vmem:[#allocation34_spill] sm:$0xff] }
 0x3d5   : > { %v2609_v30 = vmax.f32 %v2179_v10, 0.0  ;;  %v2524_v22 = vadd.f32 %v7144_v26, %v6306_v48  ;;  %v2529_v55 = vadd.f32 %v7145_v59, %v6336_v3  ;;  %v7147_v3 = vld [vmem:[#allocation8_spill] sm:$0xff]  ;;  %v7153_v26 = vld [vmem:[#allocation67_spill] sm:$0xff] }
 0x3d6   : > { %3344 = vst.msk [vmem:[%s4253_s13 + $0x60] sm:$0xff] %vm3331_vm5, %v3215_v23  ;;  %3343 = vst.msk [vmem:[%s4253_s13 + $0x58] sm:$0xff] %vm3331_vm5, %v3214_v18  ;;  %2915 = vmax.xlane.f32.xlu1 %v2739_v25  ;;  %2913 = vmax.xlane.f32.xlu0 %v2738_v37  ;;  %v2809_v23 = vsel %vm5831_vm4, %v2675_v52, 0.0  ;;  %v3091_v18 = vld [vmem:[%s4253_s13 + $0x80] sm:$0xff]  ;;  %v2676_v9 = vmax.f32 %v2514_v27, 0.0  ;;  %v7141_v25 = vld [vmem:[#allocation32_spill] sm:$0xff]  ;;  %v2194_v10 = vadd.f32 %v7147_v3, %v7146_v38 }
 0x3d7   : > { %v2980_v58 = vpop.xlane.xlu1 %2979  ;;  %v2978_v11 = vpop.xlane.xlu0 %2977  ;;  %v2184_v42 = vadd.f32 %v7142_v40, %v7141_v25  ;;  %v2743_v57 = vsel %vm5831_vm4, %v2609_v30, 0.0  ;;  %v2678_v52 = vmax.f32 %v2524_v22, 0.0  ;;  %v3161_v27 = vld [vmem:[%s4253_s13 + $0x2b0] sm:$0xff]  ;;  %v3094_v25 = vld [vmem:[%s4253_s13 + $0x98] sm:$0xff]  ;;  %v2544_v22 = vadd.f32 %v7153_v26, %v6352_v32  ;;  %v7154_v59 = vld [vmem:[#allocation39_spill] sm:$0xff] }
 0x3d8   : > { %v3283_v4 = vmax.f32 %v3155_v46, %v2980_v58  ;;  %v3282_v24 = vmax.f32 %v3154_v1, %v2978_v11  ;;  %v2677_v1 = vmax.f32 %v2519_v35, 0.0  ;;  %v7143_v58 = vld [vmem:[#allocation33_spill] sm:$0xff] }
 0x3d9   : > { %v2189_v11 = vadd.f32 %v6248_v41, %v7143_v58 }
 0x3da   : > { %3412 = vst.msk [vmem:[%s4253_s13 + $0x280] sm:$0xff] %vm3331_vm5, %v3283_v4  ;;  %3411 = vst.msk [vmem:[%s4253_s13 + $0x278] sm:$0xff] %vm3331_vm5, %v3282_v24  ;;  %3051 = vmax.xlane.f32.xlu1 %v2807_v34  ;;  %3049 = vmax.xlane.f32.xlu0 %v2806_v63  ;;  %v2742_v4 = vsel %vm5831_vm4, %v2608_v45, 0.0  ;;  %v3159_v24 = vld [vmem:[%s4253_s13 + $0x2a0] sm:$0xff]  ;;  %v3158_v63 = vld [vmem:[%s4253_s13 + $0x298] sm:$0xff]  ;;  %v2811_v56 = vsel %vm5831_vm4, %v2677_v1, 0.0 }
 0x3db   : > { %v2848_v31 = vpop.xlane.xlu1 %2847  ;;  %v2846_v21 = vpop.xlane.xlu0 %2845 }
 0x3dc   : > { %v3217_v14 = vmax.f32 %v3089_v2, %v2848_v31  ;;  %v3216_v16 = vmax.f32 %v3088_v0, %v2846_v21  ;;  %v2810_v0 = vsel %vm5831_vm4, %v2676_v9, 0.0  ;;  %v2610_v31 = vmax.f32 %v2184_v42, 0.0  ;;  %v3095_v9 = vld [vmem:[%s4253_s13 + $0xa0] sm:$0xff] }
 0x3dd   : > { %v2611_v21 = vmax.f32 %v2189_v11, 0.0  ;;  %v7152_v11 = vld [vmem:[#allocation37_spill] sm:$0xff] }
 0x3de   : > { %3346 = vst.msk [vmem:[%s4253_s13 + $0x70] sm:$0xff] %vm3331_vm5, %v3217_v14  ;;  %3345 = vst.msk [vmem:[%s4253_s13 + $0x68] sm:$0xff] %vm3331_vm5, %v3216_v16  ;;  %2919 = vmax.xlane.f32.xlu1 %v2741_v17  ;;  %2917 = vmax.xlane.f32.xlu0 %v2740_v53  ;;  %v3092_v14 = vld [vmem:[%s4253_s13 + $0x88] sm:$0xff]  ;;  %v2744_v19 = vsel %vm5831_vm4, %v2610_v31, 0.0 }
 0x3df   : > { %v2984_v5 = vpop.xlane.xlu1 %2983  ;;  %v2982_v54 = vpop.xlane.xlu0 %2981 }
 0x3e0   : > { %v3285_v29 = vmax.f32 %v3157_v20, %v2984_v5  ;;  %v3284_v44 = vmax.f32 %v3156_v12, %v2982_v54  ;;  %v2679_v20 = vmax.f32 %v2529_v55, 0.0  ;;  %v7148_v12 = vld [vmem:[#allocation35_spill] sm:$0xff]  ;;  %v2745_v54 = vsel %vm5831_vm4, %v2611_v21, 0.0 }
 0x3e1   : > { %v2199_v5 = vadd.f32 %v6266_v36, %v7148_v12  ;;  %v2219_v55 = vadd.f32 %v6300_v51, %v7154_v59  ;;  %v7156_v51 = vld [vmem:[#allocation9_spill] sm:$0xff] }
 0x3e2   : > { %3414 = vst.msk [vmem:[%s4253_s13 + $0x290] sm:$0xff] %vm3331_vm5, %v3285_v29  ;;  %3413 = vst.msk [vmem:[%s4253_s13 + $0x288] sm:$0xff] %vm3331_vm5, %v3284_v44  ;;  %3055 = vmax.xlane.f32.xlu1 %v2809_v23  ;;  %3053 = vmax.xlane.f32.xlu0 %v2808_v6  ;;  %v3160_v29 = vld [vmem:[%s4253_s13 + $0x2a8] sm:$0xff]  ;;  %v2812_v23 = vsel %vm5831_vm4, %v2678_v52, 0.0  ;;  %v7155_v52 = vld [vmem:[#allocation38_spill] sm:$0xff] }
 0x3e3   : > { %v2852_v49 = vpop.xlane.xlu1 %2851  ;;  %v2850_v60 = vpop.xlane.xlu0 %2849  ;;  %v7149_v6 = vld [vmem:[#allocation47_spill] sm:$0xff]  ;;  %v2214_v38 = vadd.f32 %v7156_v51, %v7155_v52  ;;  %v7167_v52 = vld [vmem:[#allocation46_spill] sm:$0xff]  ;;  %v7168_v51 = vld [vmem:[#allocation12_spill] sm:$0xff] }
 0x3e4   : > { %v3219_v37 = vmax.f32 %v3091_v18, %v2852_v49  ;;  %v3218_v46 = vmax.f32 %v3090_v28, %v2850_v60  ;;  %v2534_v45 = vadd.f32 %v7149_v6, %v6334_v39  ;;  %v2612_v18 = vmax.f32 %v2194_v10, 0.0 }
 0x3e5   : > { %v2613_v28 = vmax.f32 %v2199_v5, 0.0  ;;  %v2539_v49 = vadd.f32 %v6268_v62, %v6354_v15  ;;  %v2813_v60 = vsel %vm5831_vm4, %v2679_v20, 0.0  ;;  %v7151_v62 = vld [vmem:[#allocation7_spill] sm:$0xff] }
 0x3e6   : > { %3348 = vst.msk [vmem:[%s4253_s13 + $0x80] sm:$0xff] %vm3331_vm5, %v3219_v37  ;;  %3347 = vst.msk [vmem:[%s4253_s13 + $0x78] sm:$0xff] %vm3331_vm5, %v3218_v46  ;;  %2923 = vmax.xlane.f32.xlu1 %v2743_v57  ;;  %2921 = vmax.xlane.f32.xlu0 %v2742_v4  ;;  %v2680_v42 = vmax.f32 %v2534_v45, 0.0  ;;  %v7150_v37 = vld [vmem:[#allocation36_spill] sm:$0xff]  ;;  %v2209_v57 = vadd.f32 %v6284_v50, %v7152_v11 }
 0x3e7   : > { %v2988_v61 = vpop.xlane.xlu1 %2987  ;;  %v2986_v41 = vpop.xlane.xlu0 %2985  ;;  %v2204_v15 = vadd.f32 %v7151_v62, %v7150_v37  ;;  %v2681_v58 = vmax.f32 %v2539_v49, 0.0  ;;  %v2747_v4 = vsel %vm5831_vm4, %v2613_v28, 0.0  ;;  %v7161_v62 = vld [vmem:[#allocation42_spill] sm:$0xff] }
 0x3e8   : > { %v3287_v34 = vmax.f32 %v3159_v24, %v2988_v61  ;;  %v3286_v2 = vmax.f32 %v3158_v63, %v2986_v41  ;;  %v2746_v24 = vsel %vm5831_vm4, %v2612_v18, 0.0  ;;  %v3163_v63 = vld [vmem:[%s4253_s13 + $0x2c0] sm:$0xff]  ;;  %v3162_v61 = vld [vmem:[%s4253_s13 + $0x2b8] sm:$0xff]  ;;  %v2615_v21 = vmax.f32 %v2209_v57, 0.0 }
 0x3e9   : > { %v2614_v31 = vmax.f32 %v2204_v15, 0.0  ;;  %v7162_v15 = vld [vmem:[#allocation11_spill] sm:$0xff] }
 0x3ea   : > { %3416 = vst.msk [vmem:[%s4253_s13 + $0x2a0] sm:$0xff] %vm3331_vm5, %v3287_v34  ;;  %3415 = vst.msk [vmem:[%s4253_s13 + $0x298] sm:$0xff] %vm3331_vm5, %v3286_v2  ;;  %3059 = vmax.xlane.f32.xlu1 %v2811_v56  ;;  %3057 = vmax.xlane.f32.xlu0 %v2810_v0  ;;  %v2814_v0 = vsel %vm5831_vm4, %v2680_v42, 0.0  ;;  %v2815_v56 = vsel %vm5831_vm4, %v2681_v58, 0.0  ;;  %v2749_v12 = vsel %vm5831_vm4, %v2615_v21, 0.0  ;;  %v7163_v58 = vld [vmem:[#allocation45_spill] sm:$0xff] }
 0x3eb   : > { %v2856_v48 = vpop.xlane.xlu1 %2855  ;;  %v2854_v16 = vpop.xlane.xlu0 %2853  ;;  %v2748_v5 = vsel %vm5831_vm4, %v2614_v31, 0.0  ;;  %v2249_v11 = vadd.f32 %v6346_v33, %v7163_v58 }
 0x3ec   : > { %v3221_v17 = vmax.f32 %v3093_v47, %v2856_v48  ;;  %v3220_v53 = vmax.f32 %v3092_v14, %v2854_v16  ;;  %v3097_v47 = vld [vmem:[%s4253_s13 + $0xb0] sm:$0xff]  ;;  %v3096_v14 = vld [vmem:[%s4253_s13 + $0xa8] sm:$0xff]  ;;  %v2682_v16 = vmax.f32 %v2544_v22, 0.0 }
 0x3ed   : > { %v2623_v21 = vmax.f32 %v2249_v11, 0.0  ;;  %v3173_v11 = vld [vmem:[%s4253_s13 + $0x310] sm:$0xff] }
 0x3ee   : > { %3350 = vst.msk [vmem:[%s4253_s13 + $0x90] sm:$0xff] %vm3331_vm5, %v3221_v17  ;;  %3349 = vst.msk [vmem:[%s4253_s13 + $0x88] sm:$0xff] %vm3331_vm5, %v3220_v53  ;;  %2927 = vmax.xlane.f32.xlu1 %v2745_v54  ;;  %2925 = vmax.xlane.f32.xlu0 %v2744_v19  ;;  %v2617_v17 = vmax.f32 %v2219_v55, 0.0  ;;  %v7157_v53 = vld [vmem:[#allocation41_spill] sm:$0xff]  ;;  %v3165_v54 = vld [vmem:[%s4253_s13 + $0x2d0] sm:$0xff]  ;;  %v2816_v49 = vsel %vm5831_vm4, %v2682_v16, 0.0 }
 0x3ef   : > { %v2992_v44 = vpop.xlane.xlu1 %2991  ;;  %v2990_v36 = vpop.xlane.xlu0 %2989  ;;  %v2229_v20 = vadd.f32 %v6318_v43, %v7157_v53  ;;  %v3164_v19 = vld [vmem:[%s4253_s13 + $0x2c8] sm:$0xff]  ;;  %v3101_v55 = vld [vmem:[%s4253_s13 + $0xd0] sm:$0xff] }
 0x3f0   : > { %v3289_v30 = vmax.f32 %v3161_v27, %v2992_v44  ;;  %v3288_v35 = vmax.f32 %v3160_v29, %v2990_v36  ;;  %v2616_v29 = vmax.f32 %v2214_v38, 0.0  ;;  %v7158_v44 = vld [vmem:[#allocation40_spill] sm:$0xff]  ;;  %v7159_v36 = vld [vmem:[#allocation10_spill] sm:$0xff]  ;;  %v2751_v28 = vsel %vm5831_vm4, %v2617_v17, 0.0  ;;  %v3168_v53 = vld [vmem:[%s4253_s13 + $0x2e8] sm:$0xff] }
 0x3f1   : > { %v2224_v6 = vadd.f32 %v7159_v36, %v7158_v44  ;;  %v2254_v38 = vadd.f32 %v7168_v51, %v7167_v52  ;;  %v3169_v17 = vld [vmem:[%s4253_s13 + $0x2f0] sm:$0xff] }
 0x3f2   : > { %3418 = vst.msk [vmem:[%s4253_s13 + $0x2b0] sm:$0xff] %vm3331_vm5, %v3289_v30  ;;  %3417 = vst.msk [vmem:[%s4253_s13 + $0x2a8] sm:$0xff] %vm3331_vm5, %v3288_v35  ;;  %3063 = vmax.xlane.f32.xlu1 %v2813_v60  ;;  %3061 = vmax.xlane.f32.xlu0 %v2812_v23  ;;  %v2619_v35 = vmax.f32 %v2229_v20, 0.0  ;;  %v7160_v23 = vld [vmem:[#allocation43_spill] sm:$0xff]  ;;  %v3099_v60 = vld [vmem:[%s4253_s13 + $0xc0] sm:$0xff]  ;;  %v2750_v37 = vsel %vm5831_vm4, %v2616_v29, 0.0 }
 0x3f3   : > { %v2860_v39 = vpop.xlane.xlu1 %2859  ;;  %v2858_v40 = vpop.xlane.xlu0 %2857  ;;  %v2239_v18 = vadd.f32 %v6328_v8, %v7160_v23  ;;  %v2624_v29 = vmax.f32 %v2254_v38, 0.0 }
 0x3f4   : > { %v3223_v46 = vmax.f32 %v3095_v9, %v2860_v39  ;;  %v3222_v1 = vmax.f32 %v3094_v25, %v2858_v40  ;;  %v3098_v9 = vld [vmem:[%s4253_s13 + $0xb8] sm:$0xff]  ;;  %v2618_v39 = vmax.f32 %v2224_v6, 0.0  ;;  %v2753_v57 = vsel %vm5831_vm4, %v2619_v35, 0.0  ;;  %v3103_v6 = vld [vmem:[%s4253_s13 + $0xe0] sm:$0xff] }
 0x3f6   : > { %3352 = vst.msk [vmem:[%s4253_s13 + $0xa0] sm:$0xff] %vm3331_vm5, %v3223_v46  ;;  %3351 = vst.msk [vmem:[%s4253_s13 + $0x98] sm:$0xff] %vm3331_vm5, %v3222_v1  ;;  %2931 = vmax.xlane.f32.xlu1 %v2747_v4  ;;  %2929 = vmax.xlane.f32.xlu0 %v2746_v24  ;;  %v2234_v46 = vadd.f32 %v7162_v15, %v7161_v62  ;;  %v2621_v1 = vmax.f32 %v2239_v18, 0.0  ;;  %v3167_v4 = vld [vmem:[%s4253_s13 + $0x2e0] sm:$0xff]  ;;  %v3166_v24 = vld [vmem:[%s4253_s13 + $0x2d8] sm:$0xff]  ;;  %v2752_v22 = vsel %vm5831_vm4, %v2618_v39, 0.0 }
 0x3f7   : > { %v2996_v41 = vpop.xlane.xlu1 %2995  ;;  %v2994_v50 = vpop.xlane.xlu0 %2993  ;;  %v3104_v62 = vld [vmem:[%s4253_s13 + $0xe8] sm:$0xff] }
 0x3f8   : > { %v3291_v34 = vmax.f32 %v3163_v63, %v2996_v41  ;;  %v3290_v2 = vmax.f32 %v3162_v61, %v2994_v50  ;;  %v7164_v41 = vld [vmem:[#allocation49_spill] sm:$0xff]  ;;  %v2755_v59 = vsel %vm5831_vm4, %v2621_v1, 0.0 }
 0x3f9   : > { %v2549_v33 = vadd.f32 %v7164_v41, %v6372_v13  ;;  %v3106_v41 = vld [vmem:[%s4253_s13 + $0xf8] sm:$0xff] }
 0x3fa   : > { %3420 = vst.msk [vmem:[%s4253_s13 + $0x2c0] sm:$0xff] %vm3331_vm5, %v3291_v34  ;;  %3419 = vst.msk [vmem:[%s4253_s13 + $0x2b8] sm:$0xff] %vm3331_vm5, %v3290_v2  ;;  %3067 = vmax.xlane.f32.xlu1 %v2815_v56  ;;  %3065 = vmax.xlane.f32.xlu0 %v2814_v0  ;;  %v2620_v34 = vmax.f32 %v2234_v46, 0.0  ;;  %v7165_v2 = vld [vmem:[#allocation44_spill] sm:$0xff]  ;;  %v7166_v0 = vld [vmem:[#allocation50_spill] sm:$0xff] }
 0x3fb   : > { %v2864_v32 = vpop.xlane.xlu1 %2863  ;;  %v2862_v48 = vpop.xlane.xlu0 %2861  ;;  %v2244_v31 = vadd.f32 %v7166_v0, %v7165_v2  ;;  %v3100_v56 = vld [vmem:[%s4253_s13 + $0xc8] sm:$0xff]  ;;  %v3174_v2 = vld [vmem:[%s4253_s13 + $0x318] sm:$0xff] }
 0x3fc   : > { %v3225_v3 = vmax.f32 %v3097_v47, %v2864_v32  ;;  %v3224_v10 = vmax.f32 %v3096_v14, %v2862_v48  ;;  %v2683_v14 = vmax.f32 %v2549_v33, 0.0 }
 0x3fd   : > { %v2622_v16 = vmax.f32 %v2244_v31, 0.0 }
 0x3fe   : > { %3354 = vst.msk [vmem:[%s4253_s13 + $0xb0] sm:$0xff] %vm3331_vm5, %v3225_v3  ;;  %3353 = vst.msk [vmem:[%s4253_s13 + $0xa8] sm:$0xff] %vm3331_vm5, %v3224_v10  ;;  %2935 = vmax.xlane.f32.xlu1 %v2749_v12  ;;  %2933 = vmax.xlane.f32.xlu0 %v2748_v5  ;;  %v2757_v3 = vsel %vm5831_vm4, %v2623_v21, 0.0  ;;  %v2754_v10 = vsel %vm5831_vm4, %v2620_v34, 0.0  ;;  %v2817_v44 = vsel %vm5831_vm4, %v2683_v14, 0.0  ;;  %v3175_v34 = vld [vmem:[%s4253_s13 + $0x320] sm:$0xff] }
 0x3ff   : > { %v3000_v27 = vpop.xlane.xlu1 %2999  ;;  %v2998_v43 = vpop.xlane.xlu0 %2997  ;;  %v2756_v36 = vsel %vm5831_vm4, %v2622_v16, 0.0  ;;  %v3176_v16 = vld [vmem:[%s4253_s13 + $0x328] sm:$0xff] }
 0x400   : > { %v3293_v45 = vmax.f32 %v3165_v54, %v3000_v27  ;;  %v3292_v30 = vmax.f32 %v3164_v19, %v2998_v43  ;;  %v7169_v19 = vld [vmem:[#allocation13_spill] sm:$0xff]  ;;  %v7170_v27 = vld [vmem:[#allocation68_spill] sm:$0xff] }
 0x401   : > { %v2554_v43 = vadd.f32 %v7170_v27, %v7169_v19  ;;  %v3178_v19 = vld [vmem:[%s4253_s13 + $0x338] sm:$0xff] }
 0x402   : > { %3422 = vst.msk [vmem:[%s4253_s13 + $0x2d0] sm:$0xff] %vm3331_vm5, %v3293_v45  ;;  %3421 = vst.msk [vmem:[%s4253_s13 + $0x2c8] sm:$0xff] %vm3331_vm5, %v3292_v30  ;;  %2939 = vmax.xlane.f32.xlu1 %v2751_v28  ;;  %3069 = vmax.xlane.f32.xlu0 %v2816_v49  ;;  %v3102_v45 = vld [vmem:[%s4253_s13 + $0xd8] sm:$0xff]  ;;  %v2758_v49 = vsel %vm5831_vm4, %v2624_v29, 0.0 }
 0x403   : > { %v2868_v25 = vpop.xlane.xlu1 %2867  ;;  %v2866_v8 = vpop.xlane.xlu0 %2865  ;;  %v2684_v28 = vmax.f32 %v2554_v43, 0.0 }
 0x404   : > { %v3227_v40 = vmax.f32 %v3099_v60, %v2868_v25  ;;  %v3226_v42 = vmax.f32 %v3098_v9, %v2866_v8  ;;  %v3171_v60 = vld [vmem:[%s4253_s13 + $0x300] sm:$0xff]  ;;  %v3170_v9 = vld [vmem:[%s4253_s13 + $0x2f8] sm:$0xff] }
 0x406   : > { %3356 = vst.msk [vmem:[%s4253_s13 + $0xc0] sm:$0xff] %vm3331_vm5, %v3227_v40  ;;  %3355 = vst.msk [vmem:[%s4253_s13 + $0xb8] sm:$0xff] %vm3331_vm5, %v3226_v42  ;;  %2943 = vmax.xlane.f32.xlu1 %v2753_v57  ;;  %2937 = vmax.xlane.f32.xlu0 %v2750_v37  ;;  %v2818_v42 = vsel %vm5831_vm4, %v2684_v28, 0.0  ;;  %v3105_v37 = vld [vmem:[%s4253_s13 + $0xf0] sm:$0xff]  ;;  %v3172_v57 = vld [vmem:[%s4253_s13 + $0x308] sm:$0xff] }
 0x407   : > { %v3004_v63 = vpop.xlane.xlu1 %3003  ;;  %v3002_v61 = vpop.xlane.xlu0 %3001  ;;  %v3180_v28 = vld [vmem:[%s4253_s13 + $0x348] sm:$0xff] }
 0x408   : > { %v3295_v50 = vmax.f32 %v3167_v4, %v3004_v63  ;;  %v3294_v26 = vmax.f32 %v3166_v24, %v3002_v61  ;;  %v3107_v61 = vld [vmem:[%s4253_s13 + $0x100] sm:$0xff] }
 0x40a   : > { %3424 = vst.msk [vmem:[%s4253_s13 + $0x2e0] sm:$0xff] %vm3331_vm5, %v3295_v50  ;;  %3423 = vst.msk [vmem:[%s4253_s13 + $0x2d8] sm:$0xff] %vm3331_vm5, %v3294_v26  ;;  %2947 = vmax.xlane.f32.xlu1 %v2755_v59  ;;  %2941 = vmax.xlane.f32.xlu0 %v2752_v22 }
 0x40b   : > { %v2872_v13 = vpop.xlane.xlu1 %2871  ;;  %v2870_v47 = vpop.xlane.xlu0 %2869 }
 0x40c   : > { %v3229_v32 = vmax.f32 %v3101_v55, %v2872_v13  ;;  %v3228_v48 = vmax.f32 %v3100_v56, %v2870_v47  ;;  %v3109_v55 = vld [vmem:[%s4253_s13 + $0x110] sm:$0xff]  ;;  %v3108_v56 = vld [vmem:[%s4253_s13 + $0x108] sm:$0xff] }
 0x40e   : > { %3358 = vst.msk [vmem:[%s4253_s13 + $0xd0] sm:$0xff] %vm3331_vm5, %v3229_v32  ;;  %3357 = vst.msk [vmem:[%s4253_s13 + $0xc8] sm:$0xff] %vm3331_vm5, %v3228_v48  ;;  %2951 = vmax.xlane.f32.xlu1 %v2757_v3  ;;  %2945 = vmax.xlane.f32.xlu0 %v2754_v10  ;;  %v3177_v48 = vld [vmem:[%s4253_s13 + $0x330] sm:$0xff]  ;;  %v3111_v10 = vld [vmem:[%s4253_s13 + $0x120] sm:$0xff] }
 0x40f   : > { %v3008_v20 = vpop.xlane.xlu1 %3007  ;;  %v3006_v12 = vpop.xlane.xlu0 %3005 }
 0x410   : > { %v3297_v5 = vmax.f32 %v3169_v17, %v3008_v20  ;;  %v3296_v54 = vmax.f32 %v3168_v53, %v3006_v12  ;;  %v3110_v17 = vld [vmem:[%s4253_s13 + $0x118] sm:$0xff] }
 0x412   : > { %3426 = vst.msk [vmem:[%s4253_s13 + $0x2f0] sm:$0xff] %vm3331_vm5, %v3297_v5  ;;  %3425 = vst.msk [vmem:[%s4253_s13 + $0x2e8] sm:$0xff] %vm3331_vm5, %v3296_v54  ;;  %3071 = vmax.xlane.f32.xlu1 %v2817_v44  ;;  %2949 = vmax.xlane.f32.xlu0 %v2756_v36  ;;  %v3179_v54 = vld [vmem:[%s4253_s13 + $0x340] sm:$0xff]  ;;  %v3113_v36 = vld [vmem:[%s4253_s13 + $0x130] sm:$0xff] }
 0x413   : > { %v2876_v30 = vpop.xlane.xlu1 %2875  ;;  %v2874_v35 = vpop.xlane.xlu0 %2873 }
 0x414   : > { %v3231_v23 = vmax.f32 %v3103_v6, %v2876_v30  ;;  %v3230_v18 = vmax.f32 %v3102_v45, %v2874_v35  ;;  %v3112_v6 = vld [vmem:[%s4253_s13 + $0x128] sm:$0xff] }
 0x416   : > { %3360 = vst.msk [vmem:[%s4253_s13 + $0xe0] sm:$0xff] %vm3331_vm5, %v3231_v23  ;;  %3359 = vst.msk [vmem:[%s4253_s13 + $0xd8] sm:$0xff] %vm3331_vm5, %v3230_v18  ;;  %2953 = vmax.xlane.f32.xlu0 %v2758_v49  ;;  %v3181_v18 = vld [vmem:[%s4253_s13 + $0x350] sm:$0xff] }
 0x417   : > { %v3012_v25 = vpop.xlane.xlu1 %3011  ;;  %v3010_v8 = vpop.xlane.xlu0 %3009 }
 0x418   : > { %v3299_v39 = vmax.f32 %v3171_v60, %v3012_v25  ;;  %v3298_v40 = vmax.f32 %v3170_v9, %v3010_v8  ;;  %v3115_v8 = vld [vmem:[%s4253_s13 + $0x140] sm:$0xff] }
 0x41a   : > { %3428 = vst.msk [vmem:[%s4253_s13 + $0x300] sm:$0xff] %vm3331_vm5, %v3299_v39  ;;  %3427 = vst.msk [vmem:[%s4253_s13 + $0x2f8] sm:$0xff] %vm3331_vm5, %v3298_v40  ;;  %3073 = vmax.xlane.f32.xlu0 %v2818_v42  ;;  %v3114_v39 = vld [vmem:[%s4253_s13 + $0x138] sm:$0xff] }
 0x41b   : > { %v2880_v15 = vpop.xlane.xlu1 %2879  ;;  %v2878_v46 = vpop.xlane.xlu0 %2877 }
 0x41c   : > { %v3233_v1 = vmax.f32 %v3105_v37, %v2880_v15  ;;  %v3232_v58 = vmax.f32 %v3104_v62, %v2878_v46  ;;  %v3183_v15 = vld [vmem:[%s4253_s13 + $0x360] sm:$0xff]  ;;  %v3182_v46 = vld [vmem:[%s4253_s13 + $0x358] sm:$0xff] }
 0x41e   : > { %3362 = vst.msk [vmem:[%s4253_s13 + $0xf0] sm:$0xff] %vm3331_vm5, %v3233_v1  ;;  %3361 = vst.msk [vmem:[%s4253_s13 + $0xe8] sm:$0xff] %vm3331_vm5, %v3232_v58 }
 0x41f   : > { %v3016_v7 = vpop.xlane.xlu1 %3015  ;;  %v3014_v4 = vpop.xlane.xlu0 %3013 }
 0x420   : > { %v3301_v24 = vmax.f32 %v3173_v11, %v3016_v7  ;;  %v3300_v63 = vmax.f32 %v3172_v57, %v3014_v4  ;;  %v3117_v7 = vld [vmem:[%s4253_s13 + $0x150] sm:$0xff]  ;;  %v3116_v4 = vld [vmem:[%s4253_s13 + $0x148] sm:$0xff] }
 0x422   : > { %3430 = vst.msk [vmem:[%s4253_s13 + $0x310] sm:$0xff] %vm3331_vm5, %v3301_v24  ;;  %3429 = vst.msk [vmem:[%s4253_s13 + $0x308] sm:$0xff] %vm3331_vm5, %v3300_v63 }
 0x423   : > { %v2884_v33 = vpop.xlane.xlu1 %2883  ;;  %v2882_v50 = vpop.xlane.xlu0 %2881 }
 0x424   : > { %v3235_v26 = vmax.f32 %v3107_v61, %v2884_v33  ;;  %v3234_v22 = vmax.f32 %v3106_v41, %v2882_v50  ;;  %v3185_v33 = vld [vmem:[%s4253_s13 + $0x370] sm:$0xff]  ;;  %v3184_v50 = vld [vmem:[%s4253_s13 + $0x368] sm:$0xff] }
 0x426   : > { %3364 = vst.msk [vmem:[%s4253_s13 + $0x100] sm:$0xff] %vm3331_vm5, %v3235_v26  ;;  %3363 = vst.msk [vmem:[%s4253_s13 + $0xf8] sm:$0xff] %vm3331_vm5, %v3234_v22 }
 0x427   : > { %v3020_v0 = vpop.xlane.xlu1 %3019  ;;  %v3018_v31 = vpop.xlane.xlu0 %3017 }
 0x428   : > { %v3303_v21 = vmax.f32 %v3175_v34, %v3020_v0  ;;  %v3302_v59 = vmax.f32 %v3174_v2, %v3018_v31  ;;  %v3119_v0 = vld [vmem:[%s4253_s13 + $0x160] sm:$0xff]  ;;  %v3118_v31 = vld [vmem:[%s4253_s13 + $0x158] sm:$0xff] }
 0x42a   : > { %3432 = vst.msk [vmem:[%s4253_s13 + $0x320] sm:$0xff] %vm3331_vm5, %v3303_v21  ;;  %3431 = vst.msk [vmem:[%s4253_s13 + $0x318] sm:$0xff] %vm3331_vm5, %v3302_v59 }
 0x42b   : > { %v2888_v13 = vpop.xlane.xlu1 %2887  ;;  %v2886_v47 = vpop.xlane.xlu0 %2885 }
 0x42c   : > { %v3237_v14 = vmax.f32 %v3109_v55, %v2888_v13  ;;  %v3236_v32 = vmax.f32 %v3108_v56, %v2886_v47  ;;  %v3187_v13 = vld [vmem:[%s4253_s13 + $0x380] sm:$0xff]  ;;  %v3186_v47 = vld [vmem:[%s4253_s13 + $0x378] sm:$0xff] }
 0x42e   : > { %3366 = vst.msk [vmem:[%s4253_s13 + $0x110] sm:$0xff] %vm3331_vm5, %v3237_v14  ;;  %3365 = vst.msk [vmem:[%s4253_s13 + $0x108] sm:$0xff] %vm3331_vm5, %v3236_v32 }
 0x42f   : > { %v3024_v52 = vpop.xlane.xlu1 %3023  ;;  %v3022_v51 = vpop.xlane.xlu0 %3021 }
 0x430   : > { %v3305_v38 = vmax.f32 %v3177_v48, %v3024_v52  ;;  %v3304_v3 = vmax.f32 %v3176_v16, %v3022_v51  ;;  %v3121_v52 = vld [vmem:[%s4253_s13 + $0x170] sm:$0xff]  ;;  %v3120_v51 = vld [vmem:[%s4253_s13 + $0x168] sm:$0xff] }
 0x432   : > { %3434 = vst.msk [vmem:[%s4253_s13 + $0x330] sm:$0xff] %vm3331_vm5, %v3305_v38  ;;  %3433 = vst.msk [vmem:[%s4253_s13 + $0x328] sm:$0xff] %vm3331_vm5, %v3304_v3 }
 0x433   : > { %v2892_v53 = vpop.xlane.xlu1 %2891  ;;  %v2890_v20 = vpop.xlane.xlu0 %2889 }
 0x434   : > { %v3239_v12 = vmax.f32 %v3111_v10, %v2892_v53  ;;  %v3238_v5 = vmax.f32 %v3110_v17, %v2890_v20  ;;  %v3189_v53 = vld [vmem:[%s4253_s13 + $0x390] sm:$0xff]  ;;  %v3188_v20 = vld [vmem:[%s4253_s13 + $0x388] sm:$0xff] }
 0x436   : > { %3368 = vst.msk [vmem:[%s4253_s13 + $0x120] sm:$0xff] %vm3331_vm5, %v3239_v12  ;;  %3367 = vst.msk [vmem:[%s4253_s13 + $0x118] sm:$0xff] %vm3331_vm5, %v3238_v5 }
 0x437   : > { %v3028_v27 = vpop.xlane.xlu1 %3027  ;;  %v3026_v43 = vpop.xlane.xlu0 %3025 }
 0x438   : > { %v3307_v29 = vmax.f32 %v3179_v54, %v3028_v27  ;;  %v3306_v44 = vmax.f32 %v3178_v19, %v3026_v43  ;;  %v3123_v27 = vld [vmem:[%s4253_s13 + $0x180] sm:$0xff]  ;;  %v3122_v43 = vld [vmem:[%s4253_s13 + $0x178] sm:$0xff] }
 0x43a   : > { %3436 = vst.msk [vmem:[%s4253_s13 + $0x340] sm:$0xff] %vm3331_vm5, %v3307_v29  ;;  %3435 = vst.msk [vmem:[%s4253_s13 + $0x338] sm:$0xff] %vm3331_vm5, %v3306_v44 }
 0x43b   : > { %v2896_v45 = vpop.xlane.xlu1 %2895  ;;  %v2894_v30 = vpop.xlane.xlu0 %2893 }
 0x43c   : > { %v3241_v35 = vmax.f32 %v3113_v36, %v2896_v45  ;;  %v3240_v23 = vmax.f32 %v3112_v6, %v2894_v30  ;;  %v3191_v45 = vld [vmem:[%s4253_s13 + $0x3a0] sm:$0xff]  ;;  %v3190_v30 = vld [vmem:[%s4253_s13 + $0x398] sm:$0xff] }
 0x43e   : > { %3370 = vst.msk [vmem:[%s4253_s13 + $0x130] sm:$0xff] %vm3331_vm5, %v3241_v35  ;;  %3369 = vst.msk [vmem:[%s4253_s13 + $0x128] sm:$0xff] %vm3331_vm5, %v3240_v23 }
 0x43f   : > { %v3032_v49 = vpop.xlane.xlu1 %3031  ;;  %v3030_v60 = vpop.xlane.xlu0 %3029 }
 0x440   : > { %v3309_v9 = vmax.f32 %v3181_v18, %v3032_v49  ;;  %v3308_v25 = vmax.f32 %v3180_v28, %v3030_v60  ;;  %v3125_v49 = vld [vmem:[%s4253_s13 + $0x190] sm:$0xff]  ;;  %v3124_v60 = vld [vmem:[%s4253_s13 + $0x188] sm:$0xff] }
 0x442   : > { %3438 = vst.msk [vmem:[%s4253_s13 + $0x350] sm:$0xff] %vm3331_vm5, %v3309_v9  ;;  %3437 = vst.msk [vmem:[%s4253_s13 + $0x348] sm:$0xff] %vm3331_vm5, %v3308_v25 }
 0x443   : > { %v2900_v40 = vpop.xlane.xlu1 %2899  ;;  %v2898_v42 = vpop.xlane.xlu0 %2897 }
 0x444   : > { %v3243_v37 = vmax.f32 %v3115_v8, %v2900_v40  ;;  %v3242_v62 = vmax.f32 %v3114_v39, %v2898_v42  ;;  %v3193_v40 = vld [vmem:[%s4253_s13 + $0x3b0] sm:$0xff]  ;;  %v3192_v42 = vld [vmem:[%s4253_s13 + $0x3a8] sm:$0xff] }
 0x446   : > { %3372 = vst.msk [vmem:[%s4253_s13 + $0x140] sm:$0xff] %vm3331_vm5, %v3243_v37  ;;  %3371 = vst.msk [vmem:[%s4253_s13 + $0x138] sm:$0xff] %vm3331_vm5, %v3242_v62 }
 0x447   : > { %v3036_v1 = vpop.xlane.xlu1 %3035  ;;  %v3034_v58 = vpop.xlane.xlu0 %3033 }
 0x448   : > { %v3311_v11 = vmax.f32 %v3183_v15, %v3036_v1  ;;  %v3310_v57 = vmax.f32 %v3182_v46, %v3034_v58  ;;  %v3127_v1 = vld [vmem:[%s4253_s13 + $0x1a0] sm:$0xff]  ;;  %v3126_v58 = vld [vmem:[%s4253_s13 + $0x198] sm:$0xff] }
 0x44a   : > { %3440 = vst.msk [vmem:[%s4253_s13 + $0x360] sm:$0xff] %vm3331_vm5, %v3311_v11  ;;  %3439 = vst.msk [vmem:[%s4253_s13 + $0x358] sm:$0xff] %vm3331_vm5, %v3310_v57 }
 0x44b   : > { %v2904_v24 = vpop.xlane.xlu1 %2903  ;;  %v2902_v63 = vpop.xlane.xlu0 %2901 }
 0x44c   : > { %v3245_v61 = vmax.f32 %v3117_v7, %v2904_v24  ;;  %v3244_v41 = vmax.f32 %v3116_v4, %v2902_v63  ;;  %v3195_v24 = vld [vmem:[%s4253_s13 + $0x3c0] sm:$0xff]  ;;  %v3194_v63 = vld [vmem:[%s4253_s13 + $0x3b8] sm:$0xff] }
 0x44e   : > { %3374 = vst.msk [vmem:[%s4253_s13 + $0x150] sm:$0xff] %vm3331_vm5, %v3245_v61  ;;  %3373 = vst.msk [vmem:[%s4253_s13 + $0x148] sm:$0xff] %vm3331_vm5, %v3244_v41 }
 0x44f   : > { %v3040_v26 = vpop.xlane.xlu1 %3039  ;;  %v3038_v22 = vpop.xlane.xlu0 %3037 }
 0x450   : > { %v3313_v34 = vmax.f32 %v3185_v33, %v3040_v26  ;;  %v3312_v2 = vmax.f32 %v3184_v50, %v3038_v22  ;;  %v3129_v26 = vld [vmem:[%s4253_s13 + $0x1b0] sm:$0xff]  ;;  %v3128_v22 = vld [vmem:[%s4253_s13 + $0x1a8] sm:$0xff] }
 0x452   : > { %3442 = vst.msk [vmem:[%s4253_s13 + $0x370] sm:$0xff] %vm3331_vm5, %v3313_v34  ;;  %3441 = vst.msk [vmem:[%s4253_s13 + $0x368] sm:$0xff] %vm3331_vm5, %v3312_v2 }
 0x453   : > { %v2908_v21 = vpop.xlane.xlu1 %2907  ;;  %v2906_v59 = vpop.xlane.xlu0 %2905 }
 0x454   : > { %v3247_v55 = vmax.f32 %v3119_v0, %v2908_v21  ;;  %v3246_v56 = vmax.f32 %v3118_v31, %v2906_v59  ;;  %v3197_v21 = vld [vmem:[%s4253_s13 + $0x3d0] sm:$0xff]  ;;  %v3196_v59 = vld [vmem:[%s4253_s13 + $0x3c8] sm:$0xff] }
 0x456   : > { %3376 = vst.msk [vmem:[%s4253_s13 + $0x160] sm:$0xff] %vm3331_vm5, %v3247_v55  ;;  %3375 = vst.msk [vmem:[%s4253_s13 + $0x158] sm:$0xff] %vm3331_vm5, %v3246_v56 }
 0x457   : > { %v3044_v14 = vpop.xlane.xlu1 %3043  ;;  %v3042_v32 = vpop.xlane.xlu0 %3041 }
 0x458   : > { %v3315_v48 = vmax.f32 %v3187_v13, %v3044_v14  ;;  %v3314_v16 = vmax.f32 %v3186_v47, %v3042_v32  ;;  %v3131_v14 = vld [vmem:[%s4253_s13 + $0x1c0] sm:$0xff]  ;;  %v3130_v32 = vld [vmem:[%s4253_s13 + $0x1b8] sm:$0xff] }
 0x45a   : > { %3444 = vst.msk [vmem:[%s4253_s13 + $0x380] sm:$0xff] %vm3331_vm5, %v3315_v48  ;;  %3443 = vst.msk [vmem:[%s4253_s13 + $0x378] sm:$0xff] %vm3331_vm5, %v3314_v16 }
 0x45b   : > { %v2912_v38 = vpop.xlane.xlu1 %2911  ;;  %v2910_v3 = vpop.xlane.xlu0 %2909 }
 0x45c   : > { %v3249_v10 = vmax.f32 %v3121_v52, %v2912_v38  ;;  %v3248_v17 = vmax.f32 %v3120_v51, %v2910_v3  ;;  %v3199_v38 = vld [vmem:[%s4253_s13 + $0x3e0] sm:$0xff]  ;;  %v3198_v3 = vld [vmem:[%s4253_s13 + $0x3d8] sm:$0xff] }
 0x45e   : > { %3378 = vst.msk [vmem:[%s4253_s13 + $0x170] sm:$0xff] %vm3331_vm5, %v3249_v10  ;;  %3377 = vst.msk [vmem:[%s4253_s13 + $0x168] sm:$0xff] %vm3331_vm5, %v3248_v17 }
 0x45f   : > { %v3048_v12 = vpop.xlane.xlu1 %3047  ;;  %v3046_v5 = vpop.xlane.xlu0 %3045 }
 0x460   : > { %v3317_v54 = vmax.f32 %v3189_v53, %v3048_v12  ;;  %v3316_v19 = vmax.f32 %v3188_v20, %v3046_v5  ;;  %v3133_v12 = vld [vmem:[%s4253_s13 + $0x1d0] sm:$0xff]  ;;  %v3132_v5 = vld [vmem:[%s4253_s13 + $0x1c8] sm:$0xff] }
 0x462   : > { %3446 = vst.msk [vmem:[%s4253_s13 + $0x390] sm:$0xff] %vm3331_vm5, %v3317_v54  ;;  %3445 = vst.msk [vmem:[%s4253_s13 + $0x388] sm:$0xff] %vm3331_vm5, %v3316_v19 }
 0x463   : > { %v2916_v29 = vpop.xlane.xlu1 %2915  ;;  %v2914_v44 = vpop.xlane.xlu0 %2913 }
 0x464   : > { %v3251_v36 = vmax.f32 %v3123_v27, %v2916_v29  ;;  %v3250_v6 = vmax.f32 %v3122_v43, %v2914_v44  ;;  %v3135_v29 = vld [vmem:[%s4253_s13 + $0x1e0] sm:$0xff]  ;;  %v3200_v44 = vld [vmem:[%s4253_s13 + $0x3e8] sm:$0xff] }
 0x466   : > { %3380 = vst.msk [vmem:[%s4253_s13 + $0x180] sm:$0xff] %vm3331_vm5, %v3251_v36  ;;  %3379 = vst.msk [vmem:[%s4253_s13 + $0x178] sm:$0xff] %vm3331_vm5, %v3250_v6 }
 0x467   : > { %v3052_v35 = vpop.xlane.xlu1 %3051  ;;  %v3050_v23 = vpop.xlane.xlu0 %3049 }
 0x468   : > { %v3319_v18 = vmax.f32 %v3191_v45, %v3052_v35  ;;  %v3318_v28 = vmax.f32 %v3190_v30, %v3050_v23  ;;  %v3137_v35 = vld [vmem:[%s4253_s13 + $0x1f0] sm:$0xff]  ;;  %v3134_v23 = vld [vmem:[%s4253_s13 + $0x1d8] sm:$0xff] }
 0x46a   : > { %3448 = vst.msk [vmem:[%s4253_s13 + $0x3a0] sm:$0xff] %vm3331_vm5, %v3319_v18  ;;  %3447 = vst.msk [vmem:[%s4253_s13 + $0x398] sm:$0xff] %vm3331_vm5, %v3318_v28 }
 0x46b   : > { %v2920_v9 = vpop.xlane.xlu1 %2919  ;;  %v2918_v25 = vpop.xlane.xlu0 %2917 }
 0x46c   : > { %v3253_v8 = vmax.f32 %v3125_v49, %v2920_v9  ;;  %v3252_v39 = vmax.f32 %v3124_v60, %v2918_v25  ;;  %v3139_v9 = vld [vmem:[%s4253_s13 + $0x200] sm:$0xff]  ;;  %v3136_v25 = vld [vmem:[%s4253_s13 + $0x1e8] sm:$0xff] }
 0x46e   : > { %3382 = vst.msk [vmem:[%s4253_s13 + $0x190] sm:$0xff] %vm3331_vm5, %v3253_v8  ;;  %3381 = vst.msk [vmem:[%s4253_s13 + $0x188] sm:$0xff] %vm3331_vm5, %v3252_v39 }
 0x46f   : > { %v3056_v37 = vpop.xlane.xlu1 %3055  ;;  %v3054_v62 = vpop.xlane.xlu0 %3053 }
 0x470   : > { %v3321_v15 = vmax.f32 %v3193_v40, %v3056_v37  ;;  %v3320_v46 = vmax.f32 %v3192_v42, %v3054_v62  ;;  %v3141_v37 = vld [vmem:[%s4253_s13 + $0x210] sm:$0xff]  ;;  %v3138_v62 = vld [vmem:[%s4253_s13 + $0x1f8] sm:$0xff] }
 0x472   : > { %3450 = vst.msk [vmem:[%s4253_s13 + $0x3b0] sm:$0xff] %vm3331_vm5, %v3321_v15  ;;  %3449 = vst.msk [vmem:[%s4253_s13 + $0x3a8] sm:$0xff] %vm3331_vm5, %v3320_v46 }
 0x473   : > { %v2924_v11 = vpop.xlane.xlu1 %2923  ;;  %v2922_v57 = vpop.xlane.xlu0 %2921 }
 0x474   : > { %v3255_v7 = vmax.f32 %v3127_v1, %v2924_v11  ;;  %v3254_v4 = vmax.f32 %v3126_v58, %v2922_v57  ;;  %v3201_v11 = vld [vmem:[%s4253_s13 + $0x3f0] sm:$0xff]  ;;  %v3140_v57 = vld [vmem:[%s4253_s13 + $0x208] sm:$0xff] }
 0x476   : > { %3384 = vst.msk [vmem:[%s4253_s13 + $0x1a0] sm:$0xff] %vm3331_vm5, %v3255_v7  ;;  %3383 = vst.msk [vmem:[%s4253_s13 + $0x198] sm:$0xff] %vm3331_vm5, %v3254_v4 }
 0x477   : > { %v3060_v61 = vpop.xlane.xlu1 %3059  ;;  %v3058_v41 = vpop.xlane.xlu0 %3057 }
 0x478   : > { %v3323_v33 = vmax.f32 %v3195_v24, %v3060_v61  ;;  %v3322_v50 = vmax.f32 %v3194_v63, %v3058_v41  ;;  %v3142_v61 = vld [vmem:[%s4253_s13 + $0x218] sm:$0xff] }
 0x47a   : > { %3452 = vst.msk [vmem:[%s4253_s13 + $0x3c0] sm:$0xff] %vm3331_vm5, %v3323_v33  ;;  %3451 = vst.msk [vmem:[%s4253_s13 + $0x3b8] sm:$0xff] %vm3331_vm5, %v3322_v50  ;;  %v3202_v50 = vld [vmem:[%s4253_s13 + $0x3f8] sm:$0xff] }
 0x47b   : > { %v2928_v34 = vpop.xlane.xlu1 %2927  ;;  %v2926_v2 = vpop.xlane.xlu0 %2925 }
 0x47c   : > { %v3257_v0 = vmax.f32 %v3129_v26, %v2928_v34  ;;  %v3256_v31 = vmax.f32 %v3128_v22, %v2926_v2 }
 0x47e   : > { %3386 = vst.msk [vmem:[%s4253_s13 + $0x1b0] sm:$0xff] %vm3331_vm5, %v3257_v0  ;;  %3385 = vst.msk [vmem:[%s4253_s13 + $0x1a8] sm:$0xff] %vm3331_vm5, %v3256_v31 }
 0x47f   : > { %v3064_v55 = vpop.xlane.xlu1 %3063  ;;  %v3062_v56 = vpop.xlane.xlu0 %3061 }
 0x480   : > { %v3325_v13 = vmax.f32 %v3197_v21, %v3064_v55  ;;  %v3324_v47 = vmax.f32 %v3196_v59, %v3062_v56 }
 0x482   : > { %3454 = vst.msk [vmem:[%s4253_s13 + $0x3d0] sm:$0xff] %vm3331_vm5, %v3325_v13  ;;  %3453 = vst.msk [vmem:[%s4253_s13 + $0x3c8] sm:$0xff] %vm3331_vm5, %v3324_v47 }
 0x483   : > { %v2932_v48 = vpop.xlane.xlu1 %2931  ;;  %v2930_v16 = vpop.xlane.xlu0 %2929 }
 0x484   : > { %v3259_v52 = vmax.f32 %v3131_v14, %v2932_v48  ;;  %v3258_v51 = vmax.f32 %v3130_v32, %v2930_v16 }
 0x486   : > { %3388 = vst.msk [vmem:[%s4253_s13 + $0x1c0] sm:$0xff] %vm3331_vm5, %v3259_v52  ;;  %3387 = vst.msk [vmem:[%s4253_s13 + $0x1b8] sm:$0xff] %vm3331_vm5, %v3258_v51 }
 0x487   : > { %v3068_v10 = vpop.xlane.xlu1 %3067  ;;  %v3066_v17 = vpop.xlane.xlu0 %3065 }
 0x488   : > { %v3327_v53 = vmax.f32 %v3199_v38, %v3068_v10  ;;  %v3326_v20 = vmax.f32 %v3198_v3, %v3066_v17 }
 0x48a   : > { %3456 = vst.msk [vmem:[%s4253_s13 + $0x3e0] sm:$0xff] %vm3331_vm5, %v3327_v53  ;;  %3455 = vst.msk [vmem:[%s4253_s13 + $0x3d8] sm:$0xff] %vm3331_vm5, %v3326_v20 }
 0x48b   : > { %v2936_v54 = vpop.xlane.xlu1 %2935  ;;  %v2934_v19 = vpop.xlane.xlu0 %2933 }
 0x48c   : > { %v3261_v27 = vmax.f32 %v3133_v12, %v2936_v54  ;;  %v3260_v43 = vmax.f32 %v3132_v5, %v2934_v19 }
 0x48e   : > { %3390 = vst.msk [vmem:[%s4253_s13 + $0x1d0] sm:$0xff] %vm3331_vm5, %v3261_v27  ;;  %3389 = vst.msk [vmem:[%s4253_s13 + $0x1c8] sm:$0xff] %vm3331_vm5, %v3260_v43 }
 0x48f   : > { %v2940_v36 = vpop.xlane.xlu1 %2939  ;;  %v3070_v6 = vpop.xlane.xlu0 %3069 }
 0x490   : > { %v3263_v45 = vmax.f32 %v3135_v29, %v2940_v36  ;;  %v3328_v30 = vmax.f32 %v3200_v44, %v3070_v6 }
 0x492   : > { %3392 = vst.msk [vmem:[%s4253_s13 + $0x1e0] sm:$0xff] %vm3331_vm5, %v3263_v45  ;;  %3457 = vst.msk [vmem:[%s4253_s13 + $0x3e8] sm:$0xff] %vm3331_vm5, %v3328_v30 }
 0x493   : > { %v2944_v18 = vpop.xlane.xlu1 %2943  ;;  %v2938_v28 = vpop.xlane.xlu0 %2937 }
 0x494   : > { %v3265_v49 = vmax.f32 %v3137_v35, %v2944_v18  ;;  %v3262_v60 = vmax.f32 %v3134_v23, %v2938_v28 }
 0x496   : > { %3394 = vst.msk [vmem:[%s4253_s13 + $0x1f0] sm:$0xff] %vm3331_vm5, %v3265_v49  ;;  %3391 = vst.msk [vmem:[%s4253_s13 + $0x1d8] sm:$0xff] %vm3331_vm5, %v3262_v60 }
 0x497   : > { %v2948_v8 = vpop.xlane.xlu1 %2947  ;;  %v2942_v39 = vpop.xlane.xlu0 %2941 }
 0x498   : > { %v3267_v40 = vmax.f32 %v3139_v9, %v2948_v8  ;;  %v3264_v42 = vmax.f32 %v3136_v25, %v2942_v39 }
 0x49a   : > { %3396 = vst.msk [vmem:[%s4253_s13 + $0x200] sm:$0xff] %vm3331_vm5, %v3267_v40  ;;  %3393 = vst.msk [vmem:[%s4253_s13 + $0x1e8] sm:$0xff] %vm3331_vm5, %v3264_v42 }
 0x49b   : > { %v2952_v15 = vpop.xlane.xlu1 %2951  ;;  %v2946_v46 = vpop.xlane.xlu0 %2945 }
 0x49c   : > { %v3269_v1 = vmax.f32 %v3141_v37, %v2952_v15  ;;  %v3266_v58 = vmax.f32 %v3138_v62, %v2946_v46 }
 0x49e   : > { %3398 = vst.msk [vmem:[%s4253_s13 + $0x210] sm:$0xff] %vm3331_vm5, %v3269_v1  ;;  %3395 = vst.msk [vmem:[%s4253_s13 + $0x1f8] sm:$0xff] %vm3331_vm5, %v3266_v58 }
 0x49f   : > { %v3072_v7 = vpop.xlane.xlu1 %3071  ;;  %v2950_v4 = vpop.xlane.xlu0 %2949 }
 0x4a0   : > { %v3329_v24 = vmax.f32 %v3201_v11, %v3072_v7  ;;  %v3268_v63 = vmax.f32 %v3140_v57, %v2950_v4 }
 0x4a2   : > { %3458 = vst.msk [vmem:[%s4253_s13 + $0x3f0] sm:$0xff] %vm3331_vm5, %v3329_v24  ;;  %3397 = vst.msk [vmem:[%s4253_s13 + $0x208] sm:$0xff] %vm3331_vm5, %v3268_v63 }
 0x4a3   : > { %v2954_v41 = vpop.xlane.xlu0 %2953 }
 0x4a4   : > { %v3270_v33 = vmax.f32 %v3142_v61, %v2954_v41 }
 0x4a6   : > { %3399 = vst.msk [vmem:[%s4253_s13 + $0x218] sm:$0xff] %vm3331_vm5, %v3270_v33 }
 0x4a7   : > { %v3074_v26 = vpop.xlane.xlu0 %3073 }
 0x4a8   : > { %v3330_v22 = vmax.f32 %v3202_v50, %v3074_v26 }
 0x4aa   : > { %3459 = vst.msk [vmem:[%s4253_s13 + $0x3f8] sm:$0xff] %vm3331_vm5, %v3330_v22 }
 0x4ab PF: > { %s17_s28 = sadd.s32 1, %s4172_s28   ;;  %s7171_s24 = smov %s4164_s26 }
 0x4ac   : > { %p14_p8 = scmp.ge.s32.totalorder %s17_s28, 8   ;;  %s7172_s25 = smov %s4168_s27 }
 0x4ad   : > { %s7173_s26 = smov %s7176_s29  ;;  %s7174_s27 = smov %s7180_s30 }
 0x4ae   :  { %16 = sbr.rel (!%p14_p8) target bundleno = 3 (0x3), region = 82 }

</bundles_post_ra>
